<compile_context>
chip_gen: v7x
topology: tpu7x:2x2x1
jax: 0.10.0
libtpu: 0.0.40
codegen_flags: <defaults>
</compile_context>

<pallas_src>
import numpy as np
import jax
import jax.numpy as jnp
from jax import lax
from jax.experimental import pallas as pl
from jax.experimental.pallas import tpu as pltpu

# Static sizes for input_size = (16, 16)  ->  shape_after_conv = 64*4*4 = 1024
H1, W1, CIN = 16, 16, 3        # conv1 input
C1 = 32                        # conv1 out channels
H2, W2 = 8, 8                  # after pool1
C2 = 64                        # conv2 out channels
H3, W3 = 4, 4                  # after pool2
NPIX1 = H1 * W1                # 256
NPIX2 = H2 * W2                # 64
NPIX3 = H3 * W3                # 16
K1 = 9 * CIN                   # 27 (im2col depth of conv1)
PADH, PADW = H2 + 2, 16        # conv2 padded scratch (W padded to 16 for clean tiling)
FC1, FC2 = 128, 64


# ----------------------------------------------------------------------------
# Fused forward kernel: one grid step == one tile of BT batch elements;
# all stages stay in VMEM.
# ----------------------------------------------------------------------------
def _fused_cnn_kernel(p1_ref, w1_ref, b1_ref, w2_ref, b2_ref, pmat_ref, qmat_ref,
                      wf1_ref, bf1_ref, wf2_ref, bf2_ref, wf3_ref, bf3_ref,
                      out_ref, pad_scr, feat_scr):
    f32 = jnp.float32
    bf16 = jnp.bfloat16
    BT = out_ref.shape[0]

    # ---- conv1: a single batched im2col matmul + bias + relu ----------------
    p1 = p1_ref[...].reshape(BT * NPIX1, K1)                         # (BT*256, 27)
    a1 = jnp.dot(p1, w1_ref[...], preferred_element_type=f32)        # (BT*256, 32)
    a1 = jnp.maximum(a1 + b1_ref[...], 0.0)

    # ---- maxpool1: rows pre-ordered (batch, corner, window) by the wrapper --
    pooled1 = jnp.max(a1.reshape(BT, 4, NPIX2, C1), axis=1)          # (BT, 64, 32)

    # ---- zero-pad + scatter into conv2 spatial layout via 0/1 matmul --------
    for b in range(BT):
        padded = jnp.dot(pmat_ref[...], pooled1[b].astype(bf16),
                         preferred_element_type=f32)                 # (160, 32)
        pad_scr[b] = padded.reshape(PADH, PADW, C1)                  # (10, 16, 32)

    # ---- conv2: 9 shifted taps, each one batched MXU matmul -----------------
    acc2 = jnp.zeros((BT * NPIX2, C2), f32)
    for kh in range(3):
        for kw in range(3):
            patch = pad_scr[:, kh:kh + H2, kw:kw + W2, :]            # (BT, 8, 8, 32)
            patch = patch.reshape(BT * NPIX2, C1).astype(bf16)       # (BT*64, 32)
            acc2 = acc2 + jnp.dot(patch, w2_ref[kh * 3 + kw],
                                  preferred_element_type=f32)
    a2 = jnp.maximum(acc2 + b2_ref[...], 0.0).reshape(BT, NPIX2, C2)  # (BT, 64, 64)

    # ---- maxpool2: permute rows to (corner, window) with a 0/1 matmul -------
    for b in range(BT):
        a2p = jnp.dot(qmat_ref[...], a2[b].astype(bf16),
                      preferred_element_type=f32)                    # (64, 64)
        feat_scr[b] = jnp.max(a2p.reshape(4, NPIX3, C2), axis=0)     # (16, 64)

    feat = feat_scr[...]                                             # (BT, 16, 64)

    # ---- fc1: 1024-long contraction done as 16 batched (BT,64)x(64,128) -----
    # (avoids an in-kernel lane-merging (16,64)->(1,1024) reshape; fc1 weights
    #  were pre-permuted to match torch's (C,H,W) flatten order)
    h1 = jnp.broadcast_to(bf1_ref[...], (BT, FC1)).astype(f32)       # (BT, 128)
    for r in range(NPIX3):
        h1 = h1 + jnp.dot(feat[:, r, :].astype(bf16), wf1_ref[r],
                          preferred_element_type=f32)
    h1 = jnp.maximum(h1, 0.0)

    # ---- fc2 -----------------------------------------------------------------
    h2 = jnp.dot(h1.astype(bf16), wf2_ref[...], preferred_element_type=f32)
    h2 = jnp.maximum(h2 + bf2_ref[...], 0.0)                         # (BT, 64)

    # ---- fc3 + sigmoid --------------------------------------------------------
    z = jnp.sum(h2.astype(bf16).astype(f32) * wf3_ref[...].astype(f32),
                axis=-1, keepdims=True) + bf3_ref[...]               # (BT, 1)
    out_ref[...] = 1.0 / (1.0 + jnp.exp(-z))


# ----------------------------------------------------------------------------
# Parameter prep (runs once, outside jit): torch-format params -> kernel format.
# ----------------------------------------------------------------------------
def prepare_params(params):
    c1w, c1b, c2w, c2b, f1w, f1b, f2w, f2b, f3w, f3b = params
    bf16, f32 = jnp.bfloat16, jnp.float32

    # conv weights: (cout,cin,kh,kw) -> (kh,kw,cin,cout) flattened
    w1k = jnp.transpose(c1w, (2, 3, 1, 0)).reshape(K1, C1).astype(bf16)     # (27, 32)
    b1k = c1b.reshape(1, C1).astype(f32)
    w2k = jnp.transpose(c2w, (2, 3, 1, 0)).reshape(9, C1, C2).astype(bf16)  # (9, 32, 64)
    b2k = c2b.reshape(1, C2).astype(f32)

    # P: scatter pooled1 (8x8 raster rows) into the zero-padded (10,16) grid.
    P = np.zeros((PADH * PADW, NPIX2), np.float32)
    for wh in range(H2):
        for ww in range(W2):
            P[(wh + 1) * PADW + (ww + 1), wh * W2 + ww] = 1.0
    # Q: permute conv2 output rows (8x8 raster) to (pool-corner, pool-window).
    Q = np.zeros((NPIX2, NPIX2), np.float32)
    for ch in range(2):
        for cw in range(2):
            for wh in range(H3):
                for ww in range(W3):
                    Q[(ch * 2 + cw) * NPIX3 + wh * W3 + ww,
                      (2 * wh + ch) * W2 + (2 * ww + cw)] = 1.0
    pmat = jnp.asarray(P, bf16)
    qmat = jnp.asarray(Q, bf16)

    # fc1 weight (128, 1024): torch flatten index = c*16 + (h*4 + w).
    # Re-order once so the kernel consumes features as (spatial r, channel c).
    wf1 = jnp.transpose(f1w.reshape(FC1, C2, NPIX3), (2, 1, 0)).astype(bf16)  # (16, 64, 128)
    bf1 = f1b.reshape(1, FC1).astype(f32)
    wf2 = jnp.transpose(f2w, (1, 0)).astype(bf16)                             # (128, 64)
    bf2 = f2b.reshape(1, FC2).astype(f32)
    wf3 = f3w.reshape(1, FC2).astype(bf16)                                    # (1, 64)
    bf3 = f3b.reshape(1, 1).astype(f32)
    return (w1k, b1k, w2k, b2k, pmat, qmat, wf1, bf1, wf2, bf2, wf3, bf3)


# ----------------------------------------------------------------------------
# Forward wrapper: builds conv1 im2col patches (absorbs NCHW->NHWC transpose and
# zero padding), then runs the single fused, batch-tiled Pallas kernel.
# ----------------------------------------------------------------------------
@jax.jit
def pallas_forward(x_nchw, kparams):
    (w1k, b1k, w2k, b2k, pmat, qmat, wf1, bf1, wf2, bf2, wf3, bf3) = kparams
    B = x_nchw.shape[0]
    BT = B if B <= 8 else 8            # batch tile: whole batch for small B
    assert B % BT == 0, "batch must be a multiple of the batch tile"
    num_tiles = B // BT

    # im2col for conv1 with rows pre-ordered (pool corner, pool window):
    #   row = (ch*2+cw)*64 + wh*8+ww  for output pixel (h,w) = (2wh+ch, 2ww+cw)
    #   col = (kh*3+kw)*3 + cin
    xpad = jnp.pad(x_nchw, ((0, 0), (0, 0), (1, 1), (1, 1)))                  # (B,3,18,18)
    taps = jnp.stack([xpad[:, :, kh:kh + H1, kw:kw + W1]
                      for kh in range(3) for kw in range(3)], axis=-1)        # (B,3,16,16,9)
    taps = taps.reshape(B, CIN, H2, 2, W2, 2, 9)
    p1 = taps.transpose(0, 3, 5, 2, 4, 6, 1).reshape(B, NPIX1, K1)
    p1 = p1.astype(jnp.bfloat16)                                              # (B,256,27)

    grid_spec = pltpu.PrefetchScalarGridSpec(
        num_scalar_prefetch=0,
        grid=(num_tiles,),
        in_specs=[
            pl.BlockSpec((BT, NPIX1, K1), lambda t: (t, 0, 0)),     # patches (per-tile)
            pl.BlockSpec((K1, C1), lambda t: (0, 0)),               # conv1 weight
            pl.BlockSpec((1, C1), lambda t: (0, 0)),                # conv1 bias
            pl.BlockSpec((9, C1, C2), lambda t: (0, 0, 0)),         # conv2 weight
            pl.BlockSpec((1, C2), lambda t: (0, 0)),                # conv2 bias
            pl.BlockSpec((PADH * PADW, NPIX2), lambda t: (0, 0)),   # P (pad scatter)
            pl.BlockSpec((NPIX2, NPIX2), lambda t: (0, 0)),         # Q (pool2 permute)
            pl.BlockSpec((NPIX3, C2, FC1), lambda t: (0, 0, 0)),    # fc1 weight
            pl.BlockSpec((1, FC1), lambda t: (0, 0)),               # fc1 bias
            pl.BlockSpec((FC1, FC2), lambda t: (0, 0)),             # fc2 weight
            pl.BlockSpec((1, FC2), lambda t: (0, 0)),               # fc2 bias
            pl.BlockSpec((1, FC2), lambda t: (0, 0)),               # fc3 weight (row)
            pl.BlockSpec((1, 1), lambda t: (0, 0)),                 # fc3 bias
        ],
        out_specs=pl.BlockSpec((BT, 1), lambda t: (t, 0)),
        scratch_shapes=[
            pltpu.VMEM((BT, PADH, PADW, C1), jnp.float32),          # padded conv2 input
            pltpu.VMEM((BT, NPIX3, C2), jnp.float32),               # pooled features
        ],
    )
    out = pl.pallas_call(
        _fused_cnn_kernel,
        out_shape=jax.ShapeDtypeStruct((B, 1), jnp.float32),
        grid_spec=grid_spec,
        compiler_params=pltpu.CompilerParams(dimension_semantics=("parallel",)),
    )(p1, w1k, b1k, w2k, b2k, pmat, qmat, wf1, bf1, wf2, bf2, wf3, bf3)
    return out


# ----------------------------------------------------------------------------
# Pure-JAX references (torch semantics). matmul_bf16=True mirrors the kernel's
# numerics (bf16 operands, f32 accumulation) for a tight comparison.
# ----------------------------------------------------------------------------
def reference_forward(x, params, *, matmul_bf16):
    c1w, c1b, c2w, c2b, f1w, f1b, f2w, f2b, f3w, f3b = params
    if matmul_bf16:
        cast, prec = (lambda a: a.astype(jnp.bfloat16)), None
    else:
        cast, prec = (lambda a: a), lax.Precision.HIGHEST

    def conv(h, w, b):
        y = lax.conv_general_dilated(
            cast(h), cast(w), window_strides=(1, 1), padding=((1, 1), (1, 1)),
            dimension_numbers=("NCHW", "OIHW", "NCHW"),
            precision=prec, preferred_element_type=jnp.float32)
        return jnp.maximum(y + b[None, :, None, None], 0.0)

    def pool(h):
        return lax.reduce_window(h, -jnp.inf, lax.max,
                                 (1, 1, 2, 2), (1, 1, 2, 2), "VALID")

    def dense(h, w, b):
        return jnp.dot(cast(h), cast(w.T), precision=prec,
                       preferred_element_type=jnp.float32) + b

    h = pool(conv(x, c1w, c1b))
    h = pool(conv(h, c2w, c2b))
    h = h.reshape(h.shape[0], -1)                      # torch (C,H,W) flatten order
    h = jnp.maximum(dense(h, f1w, f1b), 0.0)
    h = jnp.maximum(dense(h, f2w, f2b), 0.0)
    z = dense(h, f3w, f3b)
    return 1.0 / (1.0 + jnp.exp(-z))


if __name__ == "__main__":
    key = jax.random.PRNGKey(0)
    ks = jax.random.split(key, 11)

    params = (
        jax.random.normal(ks[0], (32, 3, 3, 3), jnp.float32) * 0.10,   # conv1.weight
        jax.random.normal(ks[1], (32,), jnp.float32) * 0.10,           # conv1.bias
        jax.random.normal(ks[2], (64, 32, 3, 3), jnp.float32) * 0.05,  # conv2.weight
        jax.random.normal(ks[3], (64,), jnp.float32) * 0.05,           # conv2.bias
        jax.random.normal(ks[4], (128, 1024), jnp.float32) * 0.05,     # fc1.weight
        jax.random.normal(ks[5], (128,), jnp.float32) * 0.05,          # fc1.bias
        jax.random.normal(ks[6], (64, 128), jnp.float32) * 0.10,       # fc2.weight
        jax.random.normal(ks[7], (64,), jnp.float32) * 0.10,           # fc2.bias
        jax.random.normal(ks[8], (1, 64), jnp.float32) * 0.30,         # fc3.weight
        jax.random.normal(ks[9], (1,), jnp.float32) * 0.30,            # fc3.bias
    )
    x = jax.random.normal(ks[10], (2, 3, 16, 16), jnp.float32)         # NCHW, like torch

    kparams = prepare_params(params)
    out = jax.block_until_ready(pallas_forward(x, kparams))
    assert out.shape == (2, 1), out.shape

    ref_matched = reference_forward(x, params, matmul_bf16=True)   # same matmul numerics
    ref_f32 = reference_forward(x, params, matmul_bf16=False)      # full-f32 torch-like

    if not bool(jnp.allclose(out, ref_matched, atol=2e-3, rtol=2e-3)):
        raise AssertionError(
            f"mismatch vs bf16-matched reference: "
            f"{float(jnp.max(jnp.abs(out - ref_matched)))}")
    if not bool(jnp.allclose(out, ref_f32, atol=5e-2, rtol=5e-2)):
        raise AssertionError(
            f"mismatch vs f32 reference: {float(jnp.max(jnp.abs(out - ref_f32)))}")

    print("KERNEL_OK")
</pallas_src>

<mosaic_0001>
module attributes {stable_mosaic.version = 11 : i64} {
  func.func @_fused_cnn_kernel(%arg0: i32, %arg1: memref<2x256x27xbf16, #tpu.memory_space<vmem>>, %arg2: memref<27x32xbf16, #tpu.memory_space<vmem>>, %arg3: memref<1x32xf32, #tpu.memory_space<vmem>>, %arg4: memref<9x32x64xbf16, #tpu.memory_space<vmem>>, %arg5: memref<1x64xf32, #tpu.memory_space<vmem>>, %arg6: memref<160x64xbf16, #tpu.memory_space<vmem>>, %arg7: memref<64x64xbf16, #tpu.memory_space<vmem>>, %arg8: memref<16x64x128xbf16, #tpu.memory_space<vmem>>, %arg9: memref<1x128xf32, #tpu.memory_space<vmem>>, %arg10: memref<128x64xbf16, #tpu.memory_space<vmem>>, %arg11: memref<1x64xf32, #tpu.memory_space<vmem>>, %arg12: memref<1x64xbf16, #tpu.memory_space<vmem>>, %arg13: memref<1x1xf32, #tpu.memory_space<vmem>>, %arg14: memref<2x1xf32, #tpu.memory_space<vmem>>, %arg15: memref<2x10x16x32xf32, #tpu.memory_space<vmem>>, %arg16: memref<2x16x64xf32, #tpu.memory_space<vmem>>) attributes {dimension_semantics = [#tpu.dimension_semantics<parallel>], iteration_bounds = array<i64: 1>, scalar_prefetch = 0 : i64, scratch_operands = 2 : i64, tpu.core_type = #tpu.core_type<tc>, window_params = [{transform_indices = @transform_0, window_bounds = array<i64: 2, 256, 27>}, {pipeline_mode = #tpu.pipeline_mode<synchronous>, transform_indices = @transform_1, window_bounds = array<i64: 27, 32>}, {pipeline_mode = #tpu.pipeline_mode<synchronous>, transform_indices = @transform_2, window_bounds = array<i64: 1, 32>}, {pipeline_mode = #tpu.pipeline_mode<synchronous>, transform_indices = @transform_3, window_bounds = array<i64: 9, 32, 64>}, {pipeline_mode = #tpu.pipeline_mode<synchronous>, transform_indices = @transform_4, window_bounds = array<i64: 1, 64>}, {pipeline_mode = #tpu.pipeline_mode<synchronous>, transform_indices = @transform_5, window_bounds = array<i64: 160, 64>}, {pipeline_mode = #tpu.pipeline_mode<synchronous>, transform_indices = @transform_6, window_bounds = array<i64: 64, 64>}, {pipeline_mode = #tpu.pipeline_mode<synchronous>, transform_indices = @transform_7, window_bounds = array<i64: 16, 64, 128>}, {pipeline_mode = #tpu.pipeline_mode<synchronous>, transform_indices = @transform_8, window_bounds = array<i64: 1, 128>}, {pipeline_mode = #tpu.pipeline_mode<synchronous>, transform_indices = @transform_9, window_bounds = array<i64: 128, 64>}, {pipeline_mode = #tpu.pipeline_mode<synchronous>, transform_indices = @transform_10, window_bounds = array<i64: 1, 64>}, {pipeline_mode = #tpu.pipeline_mode<synchronous>, transform_indices = @transform_11, window_bounds = array<i64: 1, 64>}, {pipeline_mode = #tpu.pipeline_mode<synchronous>, transform_indices = @transform_12, window_bounds = array<i64: 1, 1>}, {transform_indices = @transform_13, window_bounds = array<i64: 2, 1>}]} {
    %c0 = arith.constant 0 : index
    %c0_0 = arith.constant 0 : index
    %c0_1 = arith.constant 0 : index
    %0 = vector.load %arg1[%c0, %c0_0, %c0_1] : memref<2x256x27xbf16, #tpu.memory_space<vmem>>, vector<2x256x27xbf16>
    %1 = vector.shape_cast %0 : vector<2x256x27xbf16> to vector<512x27xbf16>
    %c0_2 = arith.constant 0 : index
    %c0_3 = arith.constant 0 : index
    %2 = vector.load %arg2[%c0_2, %c0_3] : memref<27x32xbf16, #tpu.memory_space<vmem>>, vector<27x32xbf16>
    %cst = arith.constant dense<0.000000e+00> : vector<512x32xf32>
    %3 = tpu.matmul %1, %2, %cst {dimension_numbers = #tpu.dot_dimension_numbers<[1], [0], [0], [1], [0, 0, 1, 1], [], []>} : vector<512x27xbf16>, vector<27x32xbf16>, vector<512x32xf32> -> vector<512x32xf32>
    %c0_4 = arith.constant 0 : index
    %c0_5 = arith.constant 0 : index
    %4 = vector.load %arg3[%c0_4, %c0_5] : memref<1x32xf32, #tpu.memory_space<vmem>>, vector<1x32xf32>
    %5 = vector.broadcast %4 : vector<1x32xf32> to vector<512x32xf32>
    %6 = arith.addf %3, %5 : vector<512x32xf32>
    %cst_6 = arith.constant 0.000000e+00 : f32
    %7 = vector.broadcast %cst_6 : f32 to vector<512x32xf32>
    %8 = arith.maximumf %6, %7 : vector<512x32xf32>
    %9 = vector.shape_cast %8 : vector<512x32xf32> to vector<2x4x64x32xf32>
    %cst_7 = arith.constant dense<0xFF800000> : vector<2x64x32xf32>
    %10 = vector.multi_reduction <maximumf>, %9, %cst_7 [1] : vector<2x4x64x32xf32> to vector<2x64x32xf32>
    %c0_8 = arith.constant 0 : index
    %c0_9 = arith.constant 0 : index
    %11 = vector.load %arg6[%c0_8, %c0_9] : memref<160x64xbf16, #tpu.memory_space<vmem>>, vector<160x64xbf16>
    %12 = vector.extract_strided_slice %10 {offsets = [0, 0, 0], sizes = [1, 64, 32], strides = [1, 1, 1]} : vector<2x64x32xf32> to vector<1x64x32xf32>
    %13 = vector.shape_cast %12 : vector<1x64x32xf32> to vector<64x32xf32>
    %14 = arith.truncf %13 : vector<64x32xf32> to vector<64x32xbf16>
    %cst_10 = arith.constant dense<0.000000e+00> : vector<160x32xf32>
    %15 = tpu.matmul %11, %14, %cst_10 {dimension_numbers = #tpu.dot_dimension_numbers<[1], [0], [0], [1], [0, 0, 1, 1], [], []>} : vector<160x64xbf16>, vector<64x32xbf16>, vector<160x32xf32> -> vector<160x32xf32>
    %16 = vector.shape_cast %15 : vector<160x32xf32> to vector<10x16x32xf32>
    %c0_11 = arith.constant 0 : index
    %c0_12 = arith.constant 0 : index
    %c0_13 = arith.constant 0 : index
    %c0_14 = arith.constant 0 : index
    %17 = vector.load %arg15[%c0_11, %c0_12, %c0_13, %c0_14] : memref<2x10x16x32xf32, #tpu.memory_space<vmem>>, vector<1x10x16x32xf32>
    %18 = vector.shape_cast %17 : vector<1x10x16x32xf32> to vector<10x16x32xf32>
    %19 = vector.shape_cast %16 : vector<10x16x32xf32> to vector<1x10x16x32xf32>
    tpu.vector_store %arg15[%c0_11, %c0_12, %c0_13, %c0_14], %19 {strides = array<i32>} : memref<2x10x16x32xf32, #tpu.memory_space<vmem>>, vector<1x10x16x32xf32>,
    %c0_15 = arith.constant 0 : index
    %c0_16 = arith.constant 0 : index
    %20 = vector.load %arg6[%c0_15, %c0_16] : memref<160x64xbf16, #tpu.memory_space<vmem>>, vector<160x64xbf16>
    %21 = vector.extract_strided_slice %10 {offsets = [1, 0, 0], sizes = [1, 64, 32], strides = [1, 1, 1]} : vector<2x64x32xf32> to vector<1x64x32xf32>
    %22 = vector.shape_cast %21 : vector<1x64x32xf32> to vector<64x32xf32>
    %23 = arith.truncf %22 : vector<64x32xf32> to vector<64x32xbf16>
    %cst_17 = arith.constant dense<0.000000e+00> : vector<160x32xf32>
    %24 = tpu.matmul %20, %23, %cst_17 {dimension_numbers = #tpu.dot_dimension_numbers<[1], [0], [0], [1], [0, 0, 1, 1], [], []>} : vector<160x64xbf16>, vector<64x32xbf16>, vector<160x32xf32> -> vector<160x32xf32>
    %25 = vector.shape_cast %24 : vector<160x32xf32> to vector<10x16x32xf32>
    %c1 = arith.constant 1 : index
    %c0_18 = arith.constant 0 : index
    %c0_19 = arith.constant 0 : index
    %c0_20 = arith.constant 0 : index
    %26 = vector.load %arg15[%c1, %c0_18, %c0_19, %c0_20] : memref<2x10x16x32xf32, #tpu.memory_space<vmem>>, vector<1x10x16x32xf32>
    %27 = vector.shape_cast %26 : vector<1x10x16x32xf32> to vector<10x16x32xf32>
    %28 = vector.shape_cast %25 : vector<10x16x32xf32> to vector<1x10x16x32xf32>
    tpu.vector_store %arg15[%c1, %c0_18, %c0_19, %c0_20], %28 {strides = array<i32>} : memref<2x10x16x32xf32, #tpu.memory_space<vmem>>, vector<1x10x16x32xf32>,
    %cst_21 = arith.constant 0.000000e+00 : f32
    %29 = vector.broadcast %cst_21 : f32 to vector<128x64xf32>
    %c0_22 = arith.constant 0 : index
    %c0_23 = arith.constant 0 : index
    %c0_24 = arith.constant 0 : index
    %c0_25 = arith.constant 0 : index
    %30 = vector.load %arg15[%c0_22, %c0_23, %c0_24, %c0_25] : memref<2x10x16x32xf32, #tpu.memory_space<vmem>>, vector<2x8x8x32xf32>
    %31 = vector.shape_cast %30 : vector<2x8x8x32xf32> to vector<128x32xf32>
    %32 = arith.truncf %31 : vector<128x32xf32> to vector<128x32xbf16>
    %c0_26 = arith.constant 0 : index
    %c0_27 = arith.constant 0 : index
    %c0_28 = arith.constant 0 : index
    %33 = vector.load %arg4[%c0_26, %c0_27, %c0_28] : memref<9x32x64xbf16, #tpu.memory_space<vmem>>, vector<1x32x64xbf16>
    %34 = vector.shape_cast %33 : vector<1x32x64xbf16> to vector<32x64xbf16>
    %cst_29 = arith.constant dense<0.000000e+00> : vector<128x64xf32>
    %35 = tpu.matmul %32, %34, %cst_29 {dimension_numbers = #tpu.dot_dimension_numbers<[1], [0], [0], [1], [0, 0, 1, 1], [], []>} : vector<128x32xbf16>, vector<32x64xbf16>, vector<128x64xf32> -> vector<128x64xf32>
    %36 = arith.addf %29, %35 : vector<128x64xf32>
    %c0_30 = arith.constant 0 : index
    %c0_31 = arith.constant 0 : index
    %c1_32 = arith.constant 1 : index
    %c0_33 = arith.constant 0 : index
    %37 = vector.load %arg15[%c0_30, %c0_31, %c1_32, %c0_33] : memref<2x10x16x32xf32, #tpu.memory_space<vmem>>, vector<2x8x8x32xf32>
    %38 = vector.shape_cast %37 : vector<2x8x8x32xf32> to vector<128x32xf32>
    %39 = arith.truncf %38 : vector<128x32xf32> to vector<128x32xbf16>
    %c1_34 = arith.constant 1 : index
    %c0_35 = arith.constant 0 : index
    %c0_36 = arith.constant 0 : index
    %40 = vector.load %arg4[%c1_34, %c0_35, %c0_36] : memref<9x32x64xbf16, #tpu.memory_space<vmem>>, vector<1x32x64xbf16>
    %41 = vector.shape_cast %40 : vector<1x32x64xbf16> to vector<32x64xbf16>
    %cst_37 = arith.constant dense<0.000000e+00> : vector<128x64xf32>
    %42 = tpu.matmul %39, %41, %cst_37 {dimension_numbers = #tpu.dot_dimension_numbers<[1], [0], [0], [1], [0, 0, 1, 1], [], []>} : vector<128x32xbf16>, vector<32x64xbf16>, vector<128x64xf32> -> vector<128x64xf32>
    %43 = arith.addf %36, %42 : vector<128x64xf32>
    %c0_38 = arith.constant 0 : index
    %c0_39 = arith.constant 0 : index
    %c2 = arith.constant 2 : index
    %c0_40 = arith.constant 0 : index
    %44 = vector.load %arg15[%c0_38, %c0_39, %c2, %c0_40] : memref<2x10x16x32xf32, #tpu.memory_space<vmem>>, vector<2x8x8x32xf32>
    %45 = vector.shape_cast %44 : vector<2x8x8x32xf32> to vector<128x32xf32>
    %46 = arith.truncf %45 : vector<128x32xf32> to vector<128x32xbf16>
    %c2_41 = arith.constant 2 : index
    %c0_42 = arith.constant 0 : index
    %c0_43 = arith.constant 0 : index
    %47 = vector.load %arg4[%c2_41, %c0_42, %c0_43] : memref<9x32x64xbf16, #tpu.memory_space<vmem>>, vector<1x32x64xbf16>
    %48 = vector.shape_cast %47 : vector<1x32x64xbf16> to vector<32x64xbf16>
    %cst_44 = arith.constant dense<0.000000e+00> : vector<128x64xf32>
    %49 = tpu.matmul %46, %48, %cst_44 {dimension_numbers = #tpu.dot_dimension_numbers<[1], [0], [0], [1], [0, 0, 1, 1], [], []>} : vector<128x32xbf16>, vector<32x64xbf16>, vector<128x64xf32> -> vector<128x64xf32>
    %50 = arith.addf %43, %49 : vector<128x64xf32>
    %c0_45 = arith.constant 0 : index
    %c1_46 = arith.constant 1 : index
    %c0_47 = arith.constant 0 : index
    %c0_48 = arith.constant 0 : index
    %51 = vector.load %arg15[%c0_45, %c1_46, %c0_47, %c0_48] : memref<2x10x16x32xf32, #tpu.memory_space<vmem>>, vector<2x8x8x32xf32>
    %52 = vector.shape_cast %51 : vector<2x8x8x32xf32> to vector<128x32xf32>
    %53 = arith.truncf %52 : vector<128x32xf32> to vector<128x32xbf16>
    %c3 = arith.constant 3 : index
    %c0_49 = arith.constant 0 : index
    %c0_50 = arith.constant 0 : index
    %54 = vector.load %arg4[%c3, %c0_49, %c0_50] : memref<9x32x64xbf16, #tpu.memory_space<vmem>>, vector<1x32x64xbf16>
    %55 = vector.shape_cast %54 : vector<1x32x64xbf16> to vector<32x64xbf16>
    %cst_51 = arith.constant dense<0.000000e+00> : vector<128x64xf32>
    %56 = tpu.matmul %53, %55, %cst_51 {dimension_numbers = #tpu.dot_dimension_numbers<[1], [0], [0], [1], [0, 0, 1, 1], [], []>} : vector<128x32xbf16>, vector<32x64xbf16>, vector<128x64xf32> -> vector<128x64xf32>
    %57 = arith.addf %50, %56 : vector<128x64xf32>
    %c0_52 = arith.constant 0 : index
    %c1_53 = arith.constant 1 : index
    %c1_54 = arith.constant 1 : index
    %c0_55 = arith.constant 0 : index
    %58 = vector.load %arg15[%c0_52, %c1_53, %c1_54, %c0_55] : memref<2x10x16x32xf32, #tpu.memory_space<vmem>>, vector<2x8x8x32xf32>
    %59 = vector.shape_cast %58 : vector<2x8x8x32xf32> to vector<128x32xf32>
    %60 = arith.truncf %59 : vector<128x32xf32> to vector<128x32xbf16>
    %c4 = arith.constant 4 : index
    %c0_56 = arith.constant 0 : index
    %c0_57 = arith.constant 0 : index
    %61 = vector.load %arg4[%c4, %c0_56, %c0_57] : memref<9x32x64xbf16, #tpu.memory_space<vmem>>, vector<1x32x64xbf16>
    %62 = vector.shape_cast %61 : vector<1x32x64xbf16> to vector<32x64xbf16>
    %cst_58 = arith.constant dense<0.000000e+00> : vector<128x64xf32>
    %63 = tpu.matmul %60, %62, %cst_58 {dimension_numbers = #tpu.dot_dimension_numbers<[1], [0], [0], [1], [0, 0, 1, 1], [], []>} : vector<128x32xbf16>, vector<32x64xbf16>, vector<128x64xf32> -> vector<128x64xf32>
    %64 = arith.addf %57, %63 : vector<128x64xf32>
    %c0_59 = arith.constant 0 : index
    %c1_60 = arith.constant 1 : index
    %c2_61 = arith.constant 2 : index
    %c0_62 = arith.constant 0 : index
    %65 = vector.load %arg15[%c0_59, %c1_60, %c2_61, %c0_62] : memref<2x10x16x32xf32, #tpu.memory_space<vmem>>, vector<2x8x8x32xf32>
    %66 = vector.shape_cast %65 : vector<2x8x8x32xf32> to vector<128x32xf32>
    %67 = arith.truncf %66 : vector<128x32xf32> to vector<128x32xbf16>
    %c5 = arith.constant 5 : index
    %c0_63 = arith.constant 0 : index
    %c0_64 = arith.constant 0 : index
    %68 = vector.load %arg4[%c5, %c0_63, %c0_64] : memref<9x32x64xbf16, #tpu.memory_space<vmem>>, vector<1x32x64xbf16>
    %69 = vector.shape_cast %68 : vector<1x32x64xbf16> to vector<32x64xbf16>
    %cst_65 = arith.constant dense<0.000000e+00> : vector<128x64xf32>
    %70 = tpu.matmul %67, %69, %cst_65 {dimension_numbers = #tpu.dot_dimension_numbers<[1], [0], [0], [1], [0, 0, 1, 1], [], []>} : vector<128x32xbf16>, vector<32x64xbf16>, vector<128x64xf32> -> vector<128x64xf32>
    %71 = arith.addf %64, %70 : vector<128x64xf32>
    %c0_66 = arith.constant 0 : index
    %c2_67 = arith.constant 2 : index
    %c0_68 = arith.constant 0 : index
    %c0_69 = arith.constant 0 : index
    %72 = vector.load %arg15[%c0_66, %c2_67, %c0_68, %c0_69] : memref<2x10x16x32xf32, #tpu.memory_space<vmem>>, vector<2x8x8x32xf32>
    %73 = vector.shape_cast %72 : vector<2x8x8x32xf32> to vector<128x32xf32>
    %74 = arith.truncf %73 : vector<128x32xf32> to vector<128x32xbf16>
    %c6 = arith.constant 6 : index
    %c0_70 = arith.constant 0 : index
    %c0_71 = arith.constant 0 : index
    %75 = vector.load %arg4[%c6, %c0_70, %c0_71] : memref<9x32x64xbf16, #tpu.memory_space<vmem>>, vector<1x32x64xbf16>
    %76 = vector.shape_cast %75 : vector<1x32x64xbf16> to vector<32x64xbf16>
    %cst_72 = arith.constant dense<0.000000e+00> : vector<128x64xf32>
    %77 = tpu.matmul %74, %76, %cst_72 {dimension_numbers = #tpu.dot_dimension_numbers<[1], [0], [0], [1], [0, 0, 1, 1], [], []>} : vector<128x32xbf16>, vector<32x64xbf16>, vector<128x64xf32> -> vector<128x64xf32>
    %78 = arith.addf %71, %77 : vector<128x64xf32>
    %c0_73 = arith.constant 0 : index
    %c2_74 = arith.constant 2 : index
    %c1_75 = arith.constant 1 : index
    %c0_76 = arith.constant 0 : index
    %79 = vector.load %arg15[%c0_73, %c2_74, %c1_75, %c0_76] : memref<2x10x16x32xf32, #tpu.memory_space<vmem>>, vector<2x8x8x32xf32>
    %80 = vector.shape_cast %79 : vector<2x8x8x32xf32> to vector<128x32xf32>
    %81 = arith.truncf %80 : vector<128x32xf32> to vector<128x32xbf16>
    %c7 = arith.constant 7 : index
    %c0_77 = arith.constant 0 : index
    %c0_78 = arith.constant 0 : index
    %82 = vector.load %arg4[%c7, %c0_77, %c0_78] : memref<9x32x64xbf16, #tpu.memory_space<vmem>>, vector<1x32x64xbf16>
    %83 = vector.shape_cast %82 : vector<1x32x64xbf16> to vector<32x64xbf16>
    %cst_79 = arith.constant dense<0.000000e+00> : vector<128x64xf32>
    %84 = tpu.matmul %81, %83, %cst_79 {dimension_numbers = #tpu.dot_dimension_numbers<[1], [0], [0], [1], [0, 0, 1, 1], [], []>} : vector<128x32xbf16>, vector<32x64xbf16>, vector<128x64xf32> -> vector<128x64xf32>
    %85 = arith.addf %78, %84 : vector<128x64xf32>
    %c0_80 = arith.constant 0 : index
    %c2_81 = arith.constant 2 : index
    %c2_82 = arith.constant 2 : index
    %c0_83 = arith.constant 0 : index
    %86 = vector.load %arg15[%c0_80, %c2_81, %c2_82, %c0_83] : memref<2x10x16x32xf32, #tpu.memory_space<vmem>>, vector<2x8x8x32xf32>
    %87 = vector.shape_cast %86 : vector<2x8x8x32xf32> to vector<128x32xf32>
    %88 = arith.truncf %87 : vector<128x32xf32> to vector<128x32xbf16>
    %c8 = arith.constant 8 : index
    %c0_84 = arith.constant 0 : index
    %c0_85 = arith.constant 0 : index
    %89 = vector.load %arg4[%c8, %c0_84, %c0_85] : memref<9x32x64xbf16, #tpu.memory_space<vmem>>, vector<1x32x64xbf16>
    %90 = vector.shape_cast %89 : vector<1x32x64xbf16> to vector<32x64xbf16>
    %cst_86 = arith.constant dense<0.000000e+00> : vector<128x64xf32>
    %91 = tpu.matmul %88, %90, %cst_86 {dimension_numbers = #tpu.dot_dimension_numbers<[1], [0], [0], [1], [0, 0, 1, 1], [], []>} : vector<128x32xbf16>, vector<32x64xbf16>, vector<128x64xf32> -> vector<128x64xf32>
    %92 = arith.addf %85, %91 : vector<128x64xf32>
    %c0_87 = arith.constant 0 : index
    %c0_88 = arith.constant 0 : index
    %93 = vector.load %arg5[%c0_87, %c0_88] : memref<1x64xf32, #tpu.memory_space<vmem>>, vector<1x64xf32>
    %94 = vector.broadcast %93 : vector<1x64xf32> to vector<128x64xf32>
    %95 = arith.addf %92, %94 : vector<128x64xf32>
    %cst_89 = arith.constant 0.000000e+00 : f32
    %96 = vector.broadcast %cst_89 : f32 to vector<128x64xf32>
    %97 = arith.maximumf %95, %96 : vector<128x64xf32>
    %98 = vector.shape_cast %97 : vector<128x64xf32> to vector<2x64x64xf32>
    %c0_90 = arith.constant 0 : index
    %c0_91 = arith.constant 0 : index
    %99 = vector.load %arg7[%c0_90, %c0_91] : memref<64x64xbf16, #tpu.memory_space<vmem>>, vector<64x64xbf16>
    %100 = vector.extract_strided_slice %98 {offsets = [0, 0, 0], sizes = [1, 64, 64], strides = [1, 1, 1]} : vector<2x64x64xf32> to vector<1x64x64xf32>
    %101 = vector.shape_cast %100 : vector<1x64x64xf32> to vector<64x64xf32>
    %102 = arith.truncf %101 : vector<64x64xf32> to vector<64x64xbf16>
    %cst_92 = arith.constant dense<0.000000e+00> : vector<64x64xf32>
    %103 = tpu.matmul %99, %102, %cst_92 {dimension_numbers = #tpu.dot_dimension_numbers<[1], [0], [0], [1], [0, 0, 1, 1], [], []>} : vector<64x64xbf16>, vector<64x64xbf16>, vector<64x64xf32> -> vector<64x64xf32>
    %104 = vector.shape_cast %103 : vector<64x64xf32> to vector<4x16x64xf32>
    %cst_93 = arith.constant dense<0xFF800000> : vector<16x64xf32>
    %105 = vector.multi_reduction <maximumf>, %104, %cst_93 [0] : vector<4x16x64xf32> to vector<16x64xf32>
    %c0_94 = arith.constant 0 : index
    %c0_95 = arith.constant 0 : index
    %c0_96 = arith.constant 0 : index
    %106 = vector.load %arg16[%c0_94, %c0_95, %c0_96] : memref<2x16x64xf32, #tpu.memory_space<vmem>>, vector<1x16x64xf32>
    %107 = vector.shape_cast %106 : vector<1x16x64xf32> to vector<16x64xf32>
    %108 = vector.shape_cast %105 : vector<16x64xf32> to vector<1x16x64xf32>
    tpu.vector_store %arg16[%c0_94, %c0_95, %c0_96], %108 {strides = array<i32>} : memref<2x16x64xf32, #tpu.memory_space<vmem>>, vector<1x16x64xf32>,
    %c0_97 = arith.constant 0 : index
    %c0_98 = arith.constant 0 : index
    %109 = vector.load %arg7[%c0_97, %c0_98] : memref<64x64xbf16, #tpu.memory_space<vmem>>, vector<64x64xbf16>
    %110 = vector.extract_strided_slice %98 {offsets = [1, 0, 0], sizes = [1, 64, 64], strides = [1, 1, 1]} : vector<2x64x64xf32> to vector<1x64x64xf32>
    %111 = vector.shape_cast %110 : vector<1x64x64xf32> to vector<64x64xf32>
    %112 = arith.truncf %111 : vector<64x64xf32> to vector<64x64xbf16>
    %cst_99 = arith.constant dense<0.000000e+00> : vector<64x64xf32>
    %113 = tpu.matmul %109, %112, %cst_99 {dimension_numbers = #tpu.dot_dimension_numbers<[1], [0], [0], [1], [0, 0, 1, 1], [], []>} : vector<64x64xbf16>, vector<64x64xbf16>, vector<64x64xf32> -> vector<64x64xf32>
    %114 = vector.shape_cast %113 : vector<64x64xf32> to vector<4x16x64xf32>
    %cst_100 = arith.constant dense<0xFF800000> : vector<16x64xf32>
    %115 = vector.multi_reduction <maximumf>, %114, %cst_100 [0] : vector<4x16x64xf32> to vector<16x64xf32>
    %c1_101 = arith.constant 1 : index
    %c0_102 = arith.constant 0 : index
    %c0_103 = arith.constant 0 : index
    %116 = vector.load %arg16[%c1_101, %c0_102, %c0_103] : memref<2x16x64xf32, #tpu.memory_space<vmem>>, vector<1x16x64xf32>
    %117 = vector.shape_cast %116 : vector<1x16x64xf32> to vector<16x64xf32>
    %118 = vector.shape_cast %115 : vector<16x64xf32> to vector<1x16x64xf32>
    tpu.vector_store %arg16[%c1_101, %c0_102, %c0_103], %118 {strides = array<i32>} : memref<2x16x64xf32, #tpu.memory_space<vmem>>, vector<1x16x64xf32>,
    %c0_104 = arith.constant 0 : index
    %c0_105 = arith.constant 0 : index
    %c0_106 = arith.constant 0 : index
    %119 = vector.load %arg16[%c0_104, %c0_105, %c0_106] : memref<2x16x64xf32, #tpu.memory_space<vmem>>, vector<2x16x64xf32>
    %c0_107 = arith.constant 0 : index
    %c0_108 = arith.constant 0 : index
    %120 = vector.load %arg9[%c0_107, %c0_108] : memref<1x128xf32, #tpu.memory_space<vmem>>, vector<1x128xf32>
    %121 = vector.shape_cast %120 : vector<1x128xf32> to vector<1x128xf32>
    %122 = vector.broadcast %121 : vector<1x128xf32> to vector<2x128xf32>
    %123 = vector.extract_strided_slice %119 {offsets = [0, 0, 0], sizes = [2, 1, 64], strides = [1, 1, 1]} : vector<2x16x64xf32> to vector<2x1x64xf32>
    %124 = vector.shape_cast %123 : vector<2x1x64xf32> to vector<2x64xf32>
    %125 = arith.truncf %124 : vector<2x64xf32> to vector<2x64xbf16>
    %c0_109 = arith.constant 0 : index
    %c0_110 = arith.constant 0 : index
    %c0_111 = arith.constant 0 : index
    %126 = vector.load %arg8[%c0_109, %c0_110, %c0_111] : memref<16x64x128xbf16, #tpu.memory_space<vmem>>, vector<1x64x128xbf16>
    %127 = vector.shape_cast %126 : vector<1x64x128xbf16> to vector<64x128xbf16>
    %cst_112 = arith.constant dense<0.000000e+00> : vector<2x128xf32>
    %128 = tpu.matmul %125, %127, %cst_112 {dimension_numbers = #tpu.dot_dimension_numbers<[1], [0], [0], [1], [0, 0, 1, 1], [], []>} : vector<2x64xbf16>, vector<64x128xbf16>, vector<2x128xf32> -> vector<2x128xf32>
    %129 = arith.addf %122, %128 : vector<2x128xf32>
    %130 = vector.extract_strided_slice %119 {offsets = [0, 1, 0], sizes = [2, 1, 64], strides = [1, 1, 1]} : vector<2x16x64xf32> to vector<2x1x64xf32>
    %131 = vector.shape_cast %130 : vector<2x1x64xf32> to vector<2x64xf32>
    %132 = arith.truncf %131 : vector<2x64xf32> to vector<2x64xbf16>
    %c1_113 = arith.constant 1 : index
    %c0_114 = arith.constant 0 : index
    %c0_115 = arith.constant 0 : index
    %133 = vector.load %arg8[%c1_113, %c0_114, %c0_115] : memref<16x64x128xbf16, #tpu.memory_space<vmem>>, vector<1x64x128xbf16>
    %134 = vector.shape_cast %133 : vector<1x64x128xbf16> to vector<64x128xbf16>
    %cst_116 = arith.constant dense<0.000000e+00> : vector<2x128xf32>
    %135 = tpu.matmul %132, %134, %cst_116 {dimension_numbers = #tpu.dot_dimension_numbers<[1], [0], [0], [1], [0, 0, 1, 1], [], []>} : vector<2x64xbf16>, vector<64x128xbf16>, vector<2x128xf32> -> vector<2x128xf32>
    %136 = arith.addf %129, %135 : vector<2x128xf32>
    %137 = vector.extract_strided_slice %119 {offsets = [0, 2, 0], sizes = [2, 1, 64], strides = [1, 1, 1]} : vector<2x16x64xf32> to vector<2x1x64xf32>
    %138 = vector.shape_cast %137 : vector<2x1x64xf32> to vector<2x64xf32>
    %139 = arith.truncf %138 : vector<2x64xf32> to vector<2x64xbf16>
    %c2_117 = arith.constant 2 : index
    %c0_118 = arith.constant 0 : index
    %c0_119 = arith.constant 0 : index
    %140 = vector.load %arg8[%c2_117, %c0_118, %c0_119] : memref<16x64x128xbf16, #tpu.memory_space<vmem>>, vector<1x64x128xbf16>
    %141 = vector.shape_cast %140 : vector<1x64x128xbf16> to vector<64x128xbf16>
    %cst_120 = arith.constant dense<0.000000e+00> : vector<2x128xf32>
    %142 = tpu.matmul %139, %141, %cst_120 {dimension_numbers = #tpu.dot_dimension_numbers<[1], [0], [0], [1], [0, 0, 1, 1], [], []>} : vector<2x64xbf16>, vector<64x128xbf16>, vector<2x128xf32> -> vector<2x128xf32>
    %143 = arith.addf %136, %142 : vector<2x128xf32>
    %144 = vector.extract_strided_slice %119 {offsets = [0, 3, 0], sizes = [2, 1, 64], strides = [1, 1, 1]} : vector<2x16x64xf32> to vector<2x1x64xf32>
    %145 = vector.shape_cast %144 : vector<2x1x64xf32> to vector<2x64xf32>
    %146 = arith.truncf %145 : vector<2x64xf32> to vector<2x64xbf16>
    %c3_121 = arith.constant 3 : index
    %c0_122 = arith.constant 0 : index
    %c0_123 = arith.constant 0 : index
    %147 = vector.load %arg8[%c3_121, %c0_122, %c0_123] : memref<16x64x128xbf16, #tpu.memory_space<vmem>>, vector<1x64x128xbf16>
    %148 = vector.shape_cast %147 : vector<1x64x128xbf16> to vector<64x128xbf16>
    %cst_124 = arith.constant dense<0.000000e+00> : vector<2x128xf32>
    %149 = tpu.matmul %146, %148, %cst_124 {dimension_numbers = #tpu.dot_dimension_numbers<[1], [0], [0], [1], [0, 0, 1, 1], [], []>} : vector<2x64xbf16>, vector<64x128xbf16>, vector<2x128xf32> -> vector<2x128xf32>
    %150 = arith.addf %143, %149 : vector<2x128xf32>
    %151 = vector.extract_strided_slice %119 {offsets = [0, 4, 0], sizes = [2, 1, 64], strides = [1, 1, 1]} : vector<2x16x64xf32> to vector<2x1x64xf32>
    %152 = vector.shape_cast %151 : vector<2x1x64xf32> to vector<2x64xf32>
    %153 = arith.truncf %152 : vector<2x64xf32> to vector<2x64xbf16>
    %c4_125 = arith.constant 4 : index
    %c0_126 = arith.constant 0 : index
    %c0_127 = arith.constant 0 : index
    %154 = vector.load %arg8[%c4_125, %c0_126, %c0_127] : memref<16x64x128xbf16, #tpu.memory_space<vmem>>, vector<1x64x128xbf16>
    %155 = vector.shape_cast %154 : vector<1x64x128xbf16> to vector<64x128xbf16>
    %cst_128 = arith.constant dense<0.000000e+00> : vector<2x128xf32>
    %156 = tpu.matmul %153, %155, %cst_128 {dimension_numbers = #tpu.dot_dimension_numbers<[1], [0], [0], [1], [0, 0, 1, 1], [], []>} : vector<2x64xbf16>, vector<64x128xbf16>, vector<2x128xf32> -> vector<2x128xf32>
    %157 = arith.addf %150, %156 : vector<2x128xf32>
    %158 = vector.extract_strided_slice %119 {offsets = [0, 5, 0], sizes = [2, 1, 64], strides = [1, 1, 1]} : vector<2x16x64xf32> to vector<2x1x64xf32>
    %159 = vector.shape_cast %158 : vector<2x1x64xf32> to vector<2x64xf32>
    %160 = arith.truncf %159 : vector<2x64xf32> to vector<2x64xbf16>
    %c5_129 = arith.constant 5 : index
    %c0_130 = arith.constant 0 : index
    %c0_131 = arith.constant 0 : index
    %161 = vector.load %arg8[%c5_129, %c0_130, %c0_131] : memref<16x64x128xbf16, #tpu.memory_space<vmem>>, vector<1x64x128xbf16>
    %162 = vector.shape_cast %161 : vector<1x64x128xbf16> to vector<64x128xbf16>
    %cst_132 = arith.constant dense<0.000000e+00> : vector<2x128xf32>
    %163 = tpu.matmul %160, %162, %cst_132 {dimension_numbers = #tpu.dot_dimension_numbers<[1], [0], [0], [1], [0, 0, 1, 1], [], []>} : vector<2x64xbf16>, vector<64x128xbf16>, vector<2x128xf32> -> vector<2x128xf32>
    %164 = arith.addf %157, %163 : vector<2x128xf32>
    %165 = vector.extract_strided_slice %119 {offsets = [0, 6, 0], sizes = [2, 1, 64], strides = [1, 1, 1]} : vector<2x16x64xf32> to vector<2x1x64xf32>
    %166 = vector.shape_cast %165 : vector<2x1x64xf32> to vector<2x64xf32>
    %167 = arith.truncf %166 : vector<2x64xf32> to vector<2x64xbf16>
    %c6_133 = arith.constant 6 : index
    %c0_134 = arith.constant 0 : index
    %c0_135 = arith.constant 0 : index
    %168 = vector.load %arg8[%c6_133, %c0_134, %c0_135] : memref<16x64x128xbf16, #tpu.memory_space<vmem>>, vector<1x64x128xbf16>
    %169 = vector.shape_cast %168 : vector<1x64x128xbf16> to vector<64x128xbf16>
    %cst_136 = arith.constant dense<0.000000e+00> : vector<2x128xf32>
    %170 = tpu.matmul %167, %169, %cst_136 {dimension_numbers = #tpu.dot_dimension_numbers<[1], [0], [0], [1], [0, 0, 1, 1], [], []>} : vector<2x64xbf16>, vector<64x128xbf16>, vector<2x128xf32> -> vector<2x128xf32>
    %171 = arith.addf %164, %170 : vector<2x128xf32>
    %172 = vector.extract_strided_slice %119 {offsets = [0, 7, 0], sizes = [2, 1, 64], strides = [1, 1, 1]} : vector<2x16x64xf32> to vector<2x1x64xf32>
    %173 = vector.shape_cast %172 : vector<2x1x64xf32> to vector<2x64xf32>
    %174 = arith.truncf %173 : vector<2x64xf32> to vector<2x64xbf16>
    %c7_137 = arith.constant 7 : index
    %c0_138 = arith.constant 0 : index
    %c0_139 = arith.constant 0 : index
    %175 = vector.load %arg8[%c7_137, %c0_138, %c0_139] : memref<16x64x128xbf16, #tpu.memory_space<vmem>>, vector<1x64x128xbf16>
    %176 = vector.shape_cast %175 : vector<1x64x128xbf16> to vector<64x128xbf16>
    %cst_140 = arith.constant dense<0.000000e+00> : vector<2x128xf32>
    %177 = tpu.matmul %174, %176, %cst_140 {dimension_numbers = #tpu.dot_dimension_numbers<[1], [0], [0], [1], [0, 0, 1, 1], [], []>} : vector<2x64xbf16>, vector<64x128xbf16>, vector<2x128xf32> -> vector<2x128xf32>
    %178 = arith.addf %171, %177 : vector<2x128xf32>
    %179 = vector.extract_strided_slice %119 {offsets = [0, 8, 0], sizes = [2, 1, 64], strides = [1, 1, 1]} : vector<2x16x64xf32> to vector<2x1x64xf32>
    %180 = vector.shape_cast %179 : vector<2x1x64xf32> to vector<2x64xf32>
    %181 = arith.truncf %180 : vector<2x64xf32> to vector<2x64xbf16>
    %c8_141 = arith.constant 8 : index
    %c0_142 = arith.constant 0 : index
    %c0_143 = arith.constant 0 : index
    %182 = vector.load %arg8[%c8_141, %c0_142, %c0_143] : memref<16x64x128xbf16, #tpu.memory_space<vmem>>, vector<1x64x128xbf16>
    %183 = vector.shape_cast %182 : vector<1x64x128xbf16> to vector<64x128xbf16>
    %cst_144 = arith.constant dense<0.000000e+00> : vector<2x128xf32>
    %184 = tpu.matmul %181, %183, %cst_144 {dimension_numbers = #tpu.dot_dimension_numbers<[1], [0], [0], [1], [0, 0, 1, 1], [], []>} : vector<2x64xbf16>, vector<64x128xbf16>, vector<2x128xf32> -> vector<2x128xf32>
    %185 = arith.addf %178, %184 : vector<2x128xf32>
    %186 = vector.extract_strided_slice %119 {offsets = [0, 9, 0], sizes = [2, 1, 64], strides = [1, 1, 1]} : vector<2x16x64xf32> to vector<2x1x64xf32>
    %187 = vector.shape_cast %186 : vector<2x1x64xf32> to vector<2x64xf32>
    %188 = arith.truncf %187 : vector<2x64xf32> to vector<2x64xbf16>
    %c9 = arith.constant 9 : index
    %c0_145 = arith.constant 0 : index
    %c0_146 = arith.constant 0 : index
    %189 = vector.load %arg8[%c9, %c0_145, %c0_146] : memref<16x64x128xbf16, #tpu.memory_space<vmem>>, vector<1x64x128xbf16>
    %190 = vector.shape_cast %189 : vector<1x64x128xbf16> to vector<64x128xbf16>
    %cst_147 = arith.constant dense<0.000000e+00> : vector<2x128xf32>
    %191 = tpu.matmul %188, %190, %cst_147 {dimension_numbers = #tpu.dot_dimension_numbers<[1], [0], [0], [1], [0, 0, 1, 1], [], []>} : vector<2x64xbf16>, vector<64x128xbf16>, vector<2x128xf32> -> vector<2x128xf32>
    %192 = arith.addf %185, %191 : vector<2x128xf32>
    %193 = vector.extract_strided_slice %119 {offsets = [0, 10, 0], sizes = [2, 1, 64], strides = [1, 1, 1]} : vector<2x16x64xf32> to vector<2x1x64xf32>
    %194 = vector.shape_cast %193 : vector<2x1x64xf32> to vector<2x64xf32>
    %195 = arith.truncf %194 : vector<2x64xf32> to vector<2x64xbf16>
    %c10 = arith.constant 10 : index
    %c0_148 = arith.constant 0 : index
    %c0_149 = arith.constant 0 : index
    %196 = vector.load %arg8[%c10, %c0_148, %c0_149] : memref<16x64x128xbf16, #tpu.memory_space<vmem>>, vector<1x64x128xbf16>
    %197 = vector.shape_cast %196 : vector<1x64x128xbf16> to vector<64x128xbf16>
    %cst_150 = arith.constant dense<0.000000e+00> : vector<2x128xf32>
    %198 = tpu.matmul %195, %197, %cst_150 {dimension_numbers = #tpu.dot_dimension_numbers<[1], [0], [0], [1], [0, 0, 1, 1], [], []>} : vector<2x64xbf16>, vector<64x128xbf16>, vector<2x128xf32> -> vector<2x128xf32>
    %199 = arith.addf %192, %198 : vector<2x128xf32>
    %200 = vector.extract_strided_slice %119 {offsets = [0, 11, 0], sizes = [2, 1, 64], strides = [1, 1, 1]} : vector<2x16x64xf32> to vector<2x1x64xf32>
    %201 = vector.shape_cast %200 : vector<2x1x64xf32> to vector<2x64xf32>
    %202 = arith.truncf %201 : vector<2x64xf32> to vector<2x64xbf16>
    %c11 = arith.constant 11 : index
    %c0_151 = arith.constant 0 : index
    %c0_152 = arith.constant 0 : index
    %203 = vector.load %arg8[%c11, %c0_151, %c0_152] : memref<16x64x128xbf16, #tpu.memory_space<vmem>>, vector<1x64x128xbf16>
    %204 = vector.shape_cast %203 : vector<1x64x128xbf16> to vector<64x128xbf16>
    %cst_153 = arith.constant dense<0.000000e+00> : vector<2x128xf32>
    %205 = tpu.matmul %202, %204, %cst_153 {dimension_numbers = #tpu.dot_dimension_numbers<[1], [0], [0], [1], [0, 0, 1, 1], [], []>} : vector<2x64xbf16>, vector<64x128xbf16>, vector<2x128xf32> -> vector<2x128xf32>
    %206 = arith.addf %199, %205 : vector<2x128xf32>
    %207 = vector.extract_strided_slice %119 {offsets = [0, 12, 0], sizes = [2, 1, 64], strides = [1, 1, 1]} : vector<2x16x64xf32> to vector<2x1x64xf32>
    %208 = vector.shape_cast %207 : vector<2x1x64xf32> to vector<2x64xf32>
    %209 = arith.truncf %208 : vector<2x64xf32> to vector<2x64xbf16>
    %c12 = arith.constant 12 : index
    %c0_154 = arith.constant 0 : index
    %c0_155 = arith.constant 0 : index
    %210 = vector.load %arg8[%c12, %c0_154, %c0_155] : memref<16x64x128xbf16, #tpu.memory_space<vmem>>, vector<1x64x128xbf16>
    %211 = vector.shape_cast %210 : vector<1x64x128xbf16> to vector<64x128xbf16>
    %cst_156 = arith.constant dense<0.000000e+00> : vector<2x128xf32>
    %212 = tpu.matmul %209, %211, %cst_156 {dimension_numbers = #tpu.dot_dimension_numbers<[1], [0], [0], [1], [0, 0, 1, 1], [], []>} : vector<2x64xbf16>, vector<64x128xbf16>, vector<2x128xf32> -> vector<2x128xf32>
    %213 = arith.addf %206, %212 : vector<2x128xf32>
    %214 = vector.extract_strided_slice %119 {offsets = [0, 13, 0], sizes = [2, 1, 64], strides = [1, 1, 1]} : vector<2x16x64xf32> to vector<2x1x64xf32>
    %215 = vector.shape_cast %214 : vector<2x1x64xf32> to vector<2x64xf32>
    %216 = arith.truncf %215 : vector<2x64xf32> to vector<2x64xbf16>
    %c13 = arith.constant 13 : index
    %c0_157 = arith.constant 0 : index
    %c0_158 = arith.constant 0 : index
    %217 = vector.load %arg8[%c13, %c0_157, %c0_158] : memref<16x64x128xbf16, #tpu.memory_space<vmem>>, vector<1x64x128xbf16>
    %218 = vector.shape_cast %217 : vector<1x64x128xbf16> to vector<64x128xbf16>
    %cst_159 = arith.constant dense<0.000000e+00> : vector<2x128xf32>
    %219 = tpu.matmul %216, %218, %cst_159 {dimension_numbers = #tpu.dot_dimension_numbers<[1], [0], [0], [1], [0, 0, 1, 1], [], []>} : vector<2x64xbf16>, vector<64x128xbf16>, vector<2x128xf32> -> vector<2x128xf32>
    %220 = arith.addf %213, %219 : vector<2x128xf32>
    %221 = vector.extract_strided_slice %119 {offsets = [0, 14, 0], sizes = [2, 1, 64], strides = [1, 1, 1]} : vector<2x16x64xf32> to vector<2x1x64xf32>
    %222 = vector.shape_cast %221 : vector<2x1x64xf32> to vector<2x64xf32>
    %223 = arith.truncf %222 : vector<2x64xf32> to vector<2x64xbf16>
    %c14 = arith.constant 14 : index
    %c0_160 = arith.constant 0 : index
    %c0_161 = arith.constant 0 : index
    %224 = vector.load %arg8[%c14, %c0_160, %c0_161] : memref<16x64x128xbf16, #tpu.memory_space<vmem>>, vector<1x64x128xbf16>
    %225 = vector.shape_cast %224 : vector<1x64x128xbf16> to vector<64x128xbf16>
    %cst_162 = arith.constant dense<0.000000e+00> : vector<2x128xf32>
    %226 = tpu.matmul %223, %225, %cst_162 {dimension_numbers = #tpu.dot_dimension_numbers<[1], [0], [0], [1], [0, 0, 1, 1], [], []>} : vector<2x64xbf16>, vector<64x128xbf16>, vector<2x128xf32> -> vector<2x128xf32>
    %227 = arith.addf %220, %226 : vector<2x128xf32>
    %228 = vector.extract_strided_slice %119 {offsets = [0, 15, 0], sizes = [2, 1, 64], strides = [1, 1, 1]} : vector<2x16x64xf32> to vector<2x1x64xf32>
    %229 = vector.shape_cast %228 : vector<2x1x64xf32> to vector<2x64xf32>
    %230 = arith.truncf %229 : vector<2x64xf32> to vector<2x64xbf16>
    %c15 = arith.constant 15 : index
    %c0_163 = arith.constant 0 : index
    %c0_164 = arith.constant 0 : index
    %231 = vector.load %arg8[%c15, %c0_163, %c0_164] : memref<16x64x128xbf16, #tpu.memory_space<vmem>>, vector<1x64x128xbf16>
    %232 = vector.shape_cast %231 : vector<1x64x128xbf16> to vector<64x128xbf16>
    %cst_165 = arith.constant dense<0.000000e+00> : vector<2x128xf32>
    %233 = tpu.matmul %230, %232, %cst_165 {dimension_numbers = #tpu.dot_dimension_numbers<[1], [0], [0], [1], [0, 0, 1, 1], [], []>} : vector<2x64xbf16>, vector<64x128xbf16>, vector<2x128xf32> -> vector<2x128xf32>
    %234 = arith.addf %227, %233 : vector<2x128xf32>
    %cst_166 = arith.constant 0.000000e+00 : f32
    %235 = vector.broadcast %cst_166 : f32 to vector<2x128xf32>
    %236 = arith.maximumf %234, %235 : vector<2x128xf32>
    %237 = arith.truncf %236 : vector<2x128xf32> to vector<2x128xbf16>
    %c0_167 = arith.constant 0 : index
    %c0_168 = arith.constant 0 : index
    %238 = vector.load %arg10[%c0_167, %c0_168] : memref<128x64xbf16, #tpu.memory_space<vmem>>, vector<128x64xbf16>
    %cst_169 = arith.constant dense<0.000000e+00> : vector<2x64xf32>
    %239 = tpu.matmul %237, %238, %cst_169 {dimension_numbers = #tpu.dot_dimension_numbers<[1], [0], [0], [1], [0, 0, 1, 1], [], []>} : vector<2x128xbf16>, vector<128x64xbf16>, vector<2x64xf32> -> vector<2x64xf32>
    %c0_170 = arith.constant 0 : index
    %c0_171 = arith.constant 0 : index
    %240 = vector.load %arg11[%c0_170, %c0_171] : memref<1x64xf32, #tpu.memory_space<vmem>>, vector<1x64xf32>
    %241 = vector.broadcast %240 : vector<1x64xf32> to vector<2x64xf32>
    %242 = arith.addf %239, %241 : vector<2x64xf32>
    %cst_172 = arith.constant 0.000000e+00 : f32
    %243 = vector.broadcast %cst_172 : f32 to vector<2x64xf32>
    %244 = arith.maximumf %242, %243 : vector<2x64xf32>
    %245 = arith.truncf %244 : vector<2x64xf32> to vector<2x64xbf16>
    %246 = arith.extf %245 : vector<2x64xbf16> to vector<2x64xf32>
    %c0_173 = arith.constant 0 : index
    %c0_174 = arith.constant 0 : index
    %247 = vector.load %arg12[%c0_173, %c0_174] : memref<1x64xbf16, #tpu.memory_space<vmem>>, vector<1x64xbf16>
    %248 = arith.extf %247 : vector<1x64xbf16> to vector<1x64xf32>
    %249 = vector.broadcast %248 : vector<1x64xf32> to vector<2x64xf32>
    %250 = arith.mulf %246, %249 : vector<2x64xf32>
    %cst_175 = arith.constant dense<0.000000e+00> : vector<2xf32>
    %251 = vector.multi_reduction <add>, %250, %cst_175 [1] : vector<2x64xf32> to vector<2xf32>
    %252 = vector.shape_cast %251 : vector<2xf32> to vector<2x1xf32>
    %c0_176 = arith.constant 0 : index
    %c0_177 = arith.constant 0 : index
    %253 = vector.load %arg13[%c0_176, %c0_177] : memref<1x1xf32, #tpu.memory_space<vmem>>, vector<1x1xf32>
    %254 = vector.broadcast %253 : vector<1x1xf32> to vector<2x1xf32>
    %255 = arith.addf %252, %254 : vector<2x1xf32>
    %cst_178 = arith.constant 0.000000e+00 : f32
    %256 = vector.broadcast %cst_178 : f32 to vector<2x1xf32>
    %257 = arith.subf %256, %255 : vector<2x1xf32>
    %258 = math.exp %257 : vector<2x1xf32>
    %cst_179 = arith.constant 1.000000e+00 : f32
    %259 = vector.broadcast %cst_179 : f32 to vector<2x1xf32>
    %260 = arith.addf %259, %258 : vector<2x1xf32>
    %cst_180 = arith.constant 1.000000e+00 : f32
    %261 = vector.broadcast %cst_180 : f32 to vector<2x1xf32>
    %262 = arith.divf %261, %260 : vector<2x1xf32>
    %c0_181 = arith.constant 0 : index
    %c0_182 = arith.constant 0 : index
    %263 = vector.load %arg14[%c0_181, %c0_182] : memref<2x1xf32, #tpu.memory_space<vmem>>, vector<2x1xf32>
    tpu.vector_store %arg14[%c0_181, %c0_182], %262 {strides = array<i32>} : memref<2x1xf32, #tpu.memory_space<vmem>>, vector<2x1xf32>,
    return
  }
  func.func @transform_0(%arg0: i32) -> (i32, i32, i32) {
    %c0_i32 = arith.constant 0 : i32
    %c0_i32_0 = arith.constant 0 : i32
    %c0_i32_1 = arith.constant 0 : i32
    return %arg0, %c0_i32, %c0_i32_0 : i32, i32, i32
  }
  func.func @transform_1(%arg0: i32) -> (i32, i32) {
    %c0_i32 = arith.constant 0 : i32
    %c0_i32_0 = arith.constant 0 : i32
    %c0_i32_1 = arith.constant 0 : i32
    return %c0_i32, %c0_i32_0 : i32, i32
  }
  func.func @transform_2(%arg0: i32) -> (i32, i32) {
    %c0_i32 = arith.constant 0 : i32
    %c0_i32_0 = arith.constant 0 : i32
    %c0_i32_1 = arith.constant 0 : i32
    return %c0_i32, %c0_i32_0 : i32, i32
  }
  func.func @transform_3(%arg0: i32) -> (i32, i32, i32) {
    %c0_i32 = arith.constant 0 : i32
    %c0_i32_0 = arith.constant 0 : i32
    %c0_i32_1 = arith.constant 0 : i32
    %c0_i32_2 = arith.constant 0 : i32
    return %c0_i32, %c0_i32_0, %c0_i32_1 : i32, i32, i32
  }
  func.func @transform_4(%arg0: i32) -> (i32, i32) {
    %c0_i32 = arith.constant 0 : i32
    %c0_i32_0 = arith.constant 0 : i32
    %c0_i32_1 = arith.constant 0 : i32
    return %c0_i32, %c0_i32_0 : i32, i32
  }
  func.func @transform_5(%arg0: i32) -> (i32, i32) {
    %c0_i32 = arith.constant 0 : i32
    %c0_i32_0 = arith.constant 0 : i32
    %c0_i32_1 = arith.constant 0 : i32
    return %c0_i32, %c0_i32_0 : i32, i32
  }
  func.func @transform_6(%arg0: i32) -> (i32, i32) {
    %c0_i32 = arith.constant 0 : i32
    %c0_i32_0 = arith.constant 0 : i32
    %c0_i32_1 = arith.constant 0 : i32
    return %c0_i32, %c0_i32_0 : i32, i32
  }
  func.func @transform_7(%arg0: i32) -> (i32, i32, i32) {
    %c0_i32 = arith.constant 0 : i32
    %c0_i32_0 = arith.constant 0 : i32
    %c0_i32_1 = arith.constant 0 : i32
    %c0_i32_2 = arith.constant 0 : i32
    return %c0_i32, %c0_i32_0, %c0_i32_1 : i32, i32, i32
  }
  func.func @transform_8(%arg0: i32) -> (i32, i32) {
    %c0_i32 = arith.constant 0 : i32
    %c0_i32_0 = arith.constant 0 : i32
    %c0_i32_1 = arith.constant 0 : i32
    return %c0_i32, %c0_i32_0 : i32, i32
  }
  func.func @transform_9(%arg0: i32) -> (i32, i32) {
    %c0_i32 = arith.constant 0 : i32
    %c0_i32_0 = arith.constant 0 : i32
    %c0_i32_1 = arith.constant 0 : i32
    return %c0_i32, %c0_i32_0 : i32, i32
  }
  func.func @transform_10(%arg0: i32) -> (i32, i32) {
    %c0_i32 = arith.constant 0 : i32
    %c0_i32_0 = arith.constant 0 : i32
    %c0_i32_1 = arith.constant 0 : i32
    return %c0_i32, %c0_i32_0 : i32, i32
  }
  func.func @transform_11(%arg0: i32) -> (i32, i32) {
    %c0_i32 = arith.constant 0 : i32
    %c0_i32_0 = arith.constant 0 : i32
    %c0_i32_1 = arith.constant 0 : i32
    return %c0_i32, %c0_i32_0 : i32, i32
  }
  func.func @transform_12(%arg0: i32) -> (i32, i32) {
    %c0_i32 = arith.constant 0 : i32
    %c0_i32_0 = arith.constant 0 : i32
    %c0_i32_1 = arith.constant 0 : i32
    return %c0_i32, %c0_i32_0 : i32, i32
  }
  func.func @transform_13(%arg0: i32) -> (i32, i32) {
    %c0_i32 = arith.constant 0 : i32
    %c0_i32_0 = arith.constant 0 : i32
    return %arg0, %c0_i32 : i32, i32
  }
}

</mosaic_0001>

<bundles_post_ra>
// kernel: pallas_forward.1
= control target key start
LH: loop header
LB: loop body
LE: loop exit
PB: predicated region body
PF: predicated region fallthrough
CT: control target
= control target key end

     0   :  { %vm390_vm0 = vcmask 1044480   ;;  %vm391_vm1 = vcmask 1045504   ;;  %vm293_vm2 = vcmask 220160   ;;  %v6276_v1 = vmov 65535   ;;  %s7728_s1 = inlined_call_operand.vmem [shape: bf16[27,32], index: 1, kind: input, shape index: {}]   ;;  %s7729_s0 = inlined_call_operand.vmem [shape: bf16[2,256,27], index: 0, kind: input, shape index: {}]   ;;  %s7730_s5 = inlined_call_operand.vmem [shape: bf16[160,64], index: 5, kind: input, shape index: {}]   ;;  %s7731_s2 = inlined_call_operand.vmem [shape: f32[1,32], index: 2, kind: input, shape index: {}]   ;;  %s7732_s3 = inlined_call_operand.vmem [shape: bf16[9,32,64], index: 3, kind: input, shape index: {}]   ;;  %s7733_s6 = inlined_call_operand.vmem [shape: bf16[64,64], index: 6, kind: input, shape index: {}]   ;;  %s7734_s4 = inlined_call_operand.vmem [shape: f32[1,64], index: 4, kind: input, shape index: {}]   ;;  %s7735_s7 = inlined_call_operand.vmem [shape: bf16[16,64,128], index: 7, kind: input, shape index: {}]   ;;  %s7736_s9 = inlined_call_operand.vmem [shape: bf16[128,64], index: 9, kind: input, shape index: {}]   ;;  %s7737_s8 = inlined_call_operand.vmem [shape: f32[1,128], index: 8, kind: input, shape index: {}]   ;;  %s7738_s12 = inlined_call_operand.<no memory space> [shape: f32[1,1], index: 12, kind: input, shape index: {}]   ;;  %s7739_s10 = inlined_call_operand.vmem [shape: f32[1,64], index: 10, kind: input, shape index: {}]   ;;  %s7740_s11 = inlined_call_operand.vmem [shape: bf16[1,64], index: 11, kind: input, shape index: {}]   ;;  %s7741_s13 = inlined_call_operand.vmem [shape: f32[2,1], index: 13, kind: output, shape index: {}]  }
   0x1   :  { %v6120_v0 = vld [vmem:[%s7728_s1] sm:$0xff]   ;;  %v392_v2 = vsel %vm390_vm0, 4294967295, %v6276_v1  ;;  %v6121_v3 = vld [vmem:[%s7728_s1 + $0x8] sm:$0x3f]   ;;  %v6124_v8 = vld [vmem:[%s7729_s0 + $0x10] sm:$0xff]   ;;  %vm937_vm3 = vcmask 523264  }
   0x2   :  { %5376 = vmatprep.subr.bf16.mxu0 %v6120_v0  ;;  %v393_v4 = vsel %vm391_vm1, %v392_v2, 0  ;;  %v6122_v5 = vld [vmem:[%s7729_s0] sm:$0xff]   ;;  %5924 = vmatprep.subr.bf16.mxu1 %v6120_v0  ;;  %v6123_v7 = vld [vmem:[%s7729_s0 + $0x8] sm:$0xff]   ;;  %v6125_v9 = vld [vmem:[%s7729_s0 + $0x18] sm:$0xff]   ;;  %vm750_vm4 = vcmask 261120   ;;  %vm6278_vm5 = vmmov 0  }
   0x3   :  { %5377 = vmatpush3.bf16.msra.mxu0 %v6120_v0  ;;  %v395_v6 = vand.u32 %v6121_v3, %v393_v4  ;;  %5926 = vmatpush3.bf16.msra.mxu1 %v6120_v0  ;;  %v6126_v10 = vld [vmem:[%s7729_s0 + $0x20] sm:$0xff]   ;;  %v6127_v11 = vld [vmem:[%s7729_s0 + $0x28] sm:$0xff]   ;;  %v6128_v12 = vld [vmem:[%s7729_s0 + $0x30] sm:$0xff]   ;;  %vm3226_vm6 = vcmask 1041409   ;;  %vm4638_vm7 = vcmask 517120   ;;  %vm4656_vm8 = vcmask 1024  }
   0x4   :  { %5380 = vmatprep.mubr.msk.bf16.mxu0 %vm293_vm2, %v6122_v5  ;;  %v6146_v13 = vld [vmem:[%s7729_s0 + $0xe0] sm:$0xff]   ;;  %v6148_v14 = vld [vmem:[%s7729_s0 + $0xe8] sm:$0xff]   ;;  %v6129_v15 = vld [vmem:[%s7729_s0 + $0x38] sm:$0xff]  }
   0x5   :  { %5378 = vmatprep.subr.bf16.mxu0 %v395_v6  ;;  %5925 = vmatprep.subr.bf16.mxu1 %v395_v6  ;;  %v6150_v16 = vld [vmem:[%s7729_s0 + $0xf0] sm:$0xff]   ;;  %v6130_v17 = vld [vmem:[%s7729_s0 + $0x40] sm:$0xff]   ;;  %v6152_v18 = vld [vmem:[%s7729_s0 + $0xf8] sm:$0xff]  }
   0x6   :  { %5436 = vmatprep.mubr.msk.bf16.mxu1 %vm293_vm2, %v6146_v13  ;;  %v6131_v19 = vld [vmem:[%s7729_s0 + $0x48] sm:$0xff]   ;;  %v6132_v20 = vld [vmem:[%s7729_s0 + $0x50] sm:$0xff]   ;;  %v6133_v21 = vld [vmem:[%s7729_s0 + $0x58] sm:$0xff]  }
   0x7   :  { %5379 = vmatpush3.bf16.msra.mxu0 %v395_v6  ;;  %5927 = vmatpush3.bf16.msra.mxu1 %v395_v6  ;;  %v6134_v22 = vld [vmem:[%s7729_s0 + $0x60] sm:$0xff]   ;;  %v6135_v23 = vld [vmem:[%s7729_s0 + $0x68] sm:$0xff]   ;;  %v6136_v24 = vld [vmem:[%s7729_s0 + $0x70] sm:$0xff]  }
   0x8   :  { %v6137_v25 = vld [vmem:[%s7729_s0 + $0x78] sm:$0xff]   ;;  %v6138_v26 = vld [vmem:[%s7729_s0 + $0x80] sm:$0xff]   ;;  %v6139_v27 = vld [vmem:[%s7729_s0 + $0x88] sm:$0xff]  }
   0x9   :  { %v6140_v28 = vld [vmem:[%s7729_s0 + $0x90] sm:$0xff]   ;;  %v6141_v29 = vld [vmem:[%s7729_s0 + $0x98] sm:$0xff]   ;;  %v6142_v30 = vld [vmem:[%s7729_s0 + $0xa0] sm:$0xff]  }
   0xa   :  { %5381 = vmatmul.mubr.msk.bf16.vlgmr.msra.gmra.mrb[0].mxu0 %vm293_vm2, %v6123_v7  ;;  %5437 = vmatmul.mubr.msk.bf16.vlgmr.msra.gmra.mrb[0].mxu1 %vm293_vm2, %v6148_v14  ;;  %v6143_v31 = vld [vmem:[%s7729_s0 + $0xa8] sm:$0xff]   ;;  %v6144_v32 = vld [vmem:[%s7729_s0 + $0xb0] sm:$0xff]   ;;  %v6145_v33 = vld [vmem:[%s7729_s0 + $0xb8] sm:$0xff]  }
   0xb   :  { %5384 = vmatprep.mubr.msk.bf16.mxu0 %vm293_vm2, %v6124_v8  ;;  %5440 = vmatprep.mubr.msk.bf16.mxu1 %vm293_vm2, %v6150_v16  ;;  %v6147_v34 = vld [vmem:[%s7729_s0 + $0xc0] sm:$0xff]   ;;  %v6149_v35 = vld [vmem:[%s7729_s0 + $0xc8] sm:$0xff]   ;;  %v6151_v36 = vld [vmem:[%s7729_s0 + $0xd0] sm:$0xff]  }
   0xc   :  { %v6153_v37 = vld [vmem:[%s7729_s0 + $0xd8] sm:$0xff]   ;;  %v6154_v38 = vld [vmem:[%s7730_s5] sm:$0xff]  }
   0xd   :  { %v6490_v44 = vld [vmem:[%s7731_s2] ss:$0 sm:$0xff] }
  0x12   :  { %5385 = vmatmul.mubr.msk.bf16.gmra.mrb[4].mxu0 %vm293_vm2, %v6125_v9  ;;  %5441 = vmatmul.mubr.msk.bf16.gmra.mrb[4].mxu1 %vm293_vm2, %v6152_v18 }
  0x13   :  { %5388 = vmatprep.mubr.msk.bf16.mxu0 %vm293_vm2, %v6126_v10  ;;  %5452 = vmatprep.mubr.msk.bf16.mxu1 %vm937_vm3, %v6154_v38 }
  0x1a   :  { %5389 = vmatmul.mubr.msk.bf16.gmra.mrb[8].mxu0 %vm293_vm2, %v6127_v11 }
  0x1b   :  { %5392 = vmatprep.mubr.msk.bf16.mxu0 %vm293_vm2, %v6128_v12 }
  0x22   :  { %5393 = vmatmul.mubr.msk.bf16.gmra.mrb[12].mxu0 %vm293_vm2, %v6129_v15 }
  0x23   :  { %5396 = vmatprep.mubr.msk.bf16.mxu0 %vm293_vm2, %v6130_v17 }
  0x2a   :  { %5397 = vmatmul.mubr.msk.bf16.gmra.mrb[16].mxu0 %vm293_vm2, %v6131_v19 }
  0x2b   :  { %5400 = vmatprep.mubr.msk.bf16.mxu0 %vm293_vm2, %v6132_v20 }
  0x32   :  { %5401 = vmatmul.mubr.msk.bf16.gmra.mrb[20].mxu0 %vm293_vm2, %v6133_v21 }
  0x33   :  { %5404 = vmatprep.mubr.msk.bf16.mxu0 %vm293_vm2, %v6134_v22 }
  0x3a   :  { %5405 = vmatmul.mubr.msk.bf16.gmra.mrb[24].mxu0 %vm293_vm2, %v6135_v23 }
  0x3b   :  { %5408 = vmatprep.mubr.msk.bf16.mxu0 %vm293_vm2, %v6136_v24 }
  0x42   :  { %5409 = vmatmul.mubr.msk.bf16.gmra.mrb[28].mxu0 %vm293_vm2, %v6137_v25 }
  0x43   :  { %5412 = vmatprep.mubr.msk.bf16.mxu0 %vm293_vm2, %v6138_v26 }
  0x4a   :  { %5413 = vmatmul.mubr.msk.bf16.gmra.mrb[32].mxu0 %vm293_vm2, %v6139_v27 }
  0x4b   :  { %5416 = vmatprep.mubr.msk.bf16.mxu0 %vm293_vm2, %v6140_v28 }
  0x52   :  { %5417 = vmatmul.mubr.msk.bf16.gmra.mrb[36].mxu0 %vm293_vm2, %v6141_v29 }
  0x53   :  { %5420 = vmatprep.mubr.msk.bf16.mxu0 %vm293_vm2, %v6142_v30 }
  0x5a   :  { %5421 = vmatmul.mubr.msk.bf16.gmra.mrb[40].mxu0 %vm293_vm2, %v6143_v31 }
  0x5b   :  { %5424 = vmatprep.mubr.msk.bf16.mxu0 %vm293_vm2, %v6144_v32 }
  0x62   :  { %5425 = vmatmul.mubr.msk.bf16.gmra.mrb[44].mxu0 %vm293_vm2, %v6145_v33 }
  0x63   :  { %5428 = vmatprep.mubr.msk.bf16.mxu0 %vm293_vm2, %v6147_v34 }
  0x6a   :  { %5429 = vmatmul.mubr.msk.bf16.gmra.mrb[48].mxu0 %vm293_vm2, %v6149_v35 }
  0x6b   :  { %5432 = vmatprep.mubr.msk.bf16.mxu0 %vm293_vm2, %v6151_v36 }
  0x72   :  { %5433 = vmatmul.mubr.msk.bf16.gmra.mrb[52].mxu0 %vm293_vm2, %v6153_v37 }
  0xdd   :  { %v5382_v39 = vpop.f32.mrb[0].mxu0  ;;  %v6503_v3 = vpop.f32.mrb[0].mxu1 }
  0xde   :  { %v431_v40 = vpop.f32.mrb[1].mxu0  ;;  %v440_v48 = vadd.f32 %v5382_v39, %v6490_v44  ;;  %v6512_v8 = vpop.f32.mrb[1].mxu1 }
  0xdf   :  { %v5383_v41 = vpop.f32.mrb[2].mxu0  ;;  %v432_v49 = vadd.f32 %v6490_v44, %v431_v40  ;;  %v6520_v13 = vpop.f32.mrb[2].mxu1 }
  0xe0   :  { %v434_v42 = vpop.f32.mrb[3].mxu0  ;;  %v443_v50 = vadd.f32 %v5383_v41, %v6490_v44  ;;  %v688_v51 = vmax.f32 %v440_v48, 0.0  ;;  %v6527_v18 = vpop.f32.mrb[3].mxu1 }
  0xe1   :  { %v435_v52 = vadd.f32 %v6490_v44, %v434_v42  ;;  %v686_v54 = vmax.f32 %v432_v49, 0.0 }
  0xe2   :  { %v689_v59 = vmax.f32 %v443_v50, 0.0  ;;  %v6500_v63 = vsel %vm750_vm4, %v688_v51, -inf }
  0xe3   :  { %v687_v0 = vmax.f32 %v435_v52, 0.0  ;;  %v6506_v4 = vsel %vm750_vm4, %v686_v54, -inf }
  0xe4   :  { %v772_v14 = vsel %vm750_vm4, %v689_v59, -inf }
  0xe5   :  { %v5386_v43 = vpop.f32.mrb[4].mxu0  ;;  %v758_v19 = vsel %vm750_vm4, %v687_v0, -inf  ;;  %v5442_v38 = vpop.f32.mrb[4].mxu1 }
  0xe6   :  { %v447_v45 = vpop.f32.mrb[5].mxu0  ;;  %v456_v5 = vadd.f32 %v5386_v43, %v6490_v44  ;;  %v6539_v42 = vadd.f32 %v5442_v38, %v6490_v44  ;;  %v6541_v43 = vpop.f32.mrb[5].mxu1 }
  0xe7   :  { %v5387_v46 = vpop.f32.mrb[6].mxu0  ;;  %v448_v9 = vadd.f32 %v6490_v44, %v447_v45  ;;  %v5443_v49 = vpop.f32.mrb[6].mxu1 }
  0xe8   :  { %v450_v47 = vpop.f32.mrb[7].mxu0  ;;  %v459_v15 = vadd.f32 %v5387_v46, %v6490_v44  ;;  %v692_v24 = vmax.f32 %v456_v5, 0.0  ;;  %v6550_v54 = vpop.f32.mrb[7].mxu1 }
  0xe9   :  { %v451_v20 = vadd.f32 %v6490_v44, %v450_v47  ;;  %v690_v28 = vmax.f32 %v448_v9, 0.0 }
  0xea   :  { %v693_v31 = vmax.f32 %v459_v15, 0.0  ;;  %v793_v39 = vsel %vm750_vm4, %v692_v24, -inf }
  0xeb   :  { %v691_v35 = vmax.f32 %v451_v20, 0.0  ;;  %v779_v45 = vsel %vm750_vm4, %v690_v28, -inf }
  0xec   :  { %v800_v50 = vsel %vm750_vm4, %v693_v31, -inf }
  0xed   :  { %v5390_v53 = vpop.f32.mrb[8].mxu0 }
  0xee   :  { %v472_v55 = vadd.f32 %v5390_v53, %v6490_v44  ;;  %v463_v56 = vpop.f32.mrb[9].mxu0  ;;  %v6548_v53 = vadd.f32 %v5443_v49, %v6490_v44 }
  0xef   :  { %v464_v57 = vadd.f32 %v6490_v44, %v463_v56  ;;  %v5391_v58 = vpop.f32.mrb[10].mxu0 }
  0xf0   :  { %v696_v60 = vmax.f32 %v472_v55, 0.0  ;;  %v475_v61 = vadd.f32 %v5391_v58, %v6490_v44  ;;  %v466_v62 = vpop.f32.mrb[11].mxu0  ;;  %v786_v55 = vsel %vm750_vm4, %v691_v35, -inf }
  0xf1   :  { %v694_v1 = vmax.f32 %v464_v57, 0.0  ;;  %v467_v2 = vadd.f32 %v6490_v44, %v466_v62 }
  0xf2   :  { %v6510_v6 = vsel %vm750_vm4, %v696_v60, -inf  ;;  %v697_v7 = vmax.f32 %v475_v61, 0.0 }
  0xf3   :  { %v767_v10 = vmax.f32 %v6500_v63, %v6510_v6  ;;  %v6518_v11 = vsel %vm750_vm4, %v694_v1, -inf  ;;  %v695_v12 = vmax.f32 %v467_v2, 0.0 }
  0xf4   :  { %v753_v16 = vmax.f32 %v6506_v4, %v6518_v11  ;;  %v773_v17 = vsel %vm750_vm4, %v697_v7, -inf }
  0xf5   :  { %v774_v21 = vmax.f32 %v772_v14, %v773_v17  ;;  %v759_v22 = vsel %vm750_vm4, %v695_v12, -inf  ;;  %v5394_v23 = vpop.f32.mrb[12].mxu0 }
  0xf6   :  { %v760_v25 = vmax.f32 %v758_v19, %v759_v22  ;;  %v488_v26 = vadd.f32 %v5394_v23, %v6490_v44  ;;  %v479_v27 = vpop.f32.mrb[13].mxu0 }
  0xf7   :  { %v480_v29 = vadd.f32 %v6490_v44, %v479_v27  ;;  %v5395_v30 = vpop.f32.mrb[14].mxu0 }
  0xf8   :  { %v700_v32 = vmax.f32 %v488_v26, 0.0  ;;  %v491_v33 = vadd.f32 %v5395_v30, %v6490_v44  ;;  %v482_v34 = vpop.f32.mrb[15].mxu0 }
  0xf9   :  { %v698_v36 = vmax.f32 %v480_v29, 0.0  ;;  %v483_v37 = vadd.f32 %v6490_v44, %v482_v34 }
  0xfa   :  { %v794_v40 = vsel %vm750_vm4, %v700_v32, -inf  ;;  %v701_v41 = vmax.f32 %v491_v33, 0.0 }
  0xfb   :  { %v795_v46 = vmax.f32 %v793_v39, %v794_v40  ;;  %v780_v47 = vsel %vm750_vm4, %v698_v36, -inf  ;;  %v699_v48 = vmax.f32 %v483_v37, 0.0 }
  0xfc   :  { %v781_v51 = vmax.f32 %v779_v45, %v780_v47  ;;  %v801_v52 = vsel %vm750_vm4, %v701_v41, -inf }
  0xfd   :  { %v802_v56 = vmax.f32 %v800_v50, %v801_v52  ;;  %v787_v57 = vsel %vm750_vm4, %v699_v48, -inf  ;;  %v5398_v58 = vpop.f32.mrb[16].mxu0 }
  0xfe   :  { %v788_v59 = vmax.f32 %v786_v55, %v787_v57  ;;  %v504_v60 = vadd.f32 %v5398_v58, %v6490_v44  ;;  %v495_v61 = vpop.f32.mrb[17].mxu0 }
  0xff   :  { %v496_v62 = vadd.f32 %v6490_v44, %v495_v61  ;;  %v5399_v63 = vpop.f32.mrb[18].mxu0 }
 0x100   :  { %v704_v0 = vmax.f32 %v504_v60, 0.0  ;;  %v507_v1 = vadd.f32 %v5399_v63, %v6490_v44  ;;  %v498_v2 = vpop.f32.mrb[19].mxu0 }
 0x101   :  { %v702_v4 = vmax.f32 %v496_v62, 0.0  ;;  %v499_v5 = vadd.f32 %v6490_v44, %v498_v2 }
 0x102   :  { %v768_v6 = vsel %vm750_vm4, %v704_v0, -inf  ;;  %v705_v7 = vmax.f32 %v507_v1, 0.0 }
 0x103   :  { %v769_v9 = vmax.f32 %v767_v10, %v768_v6  ;;  %v754_v11 = vsel %vm750_vm4, %v702_v4, -inf  ;;  %v703_v12 = vmax.f32 %v499_v5, 0.0 }
 0x104   :  { %v755_v14 = vmax.f32 %v753_v16, %v754_v11  ;;  %v775_v15 = vsel %vm750_vm4, %v705_v7, -inf }
 0x105   :  { %v776_v17 = vmax.f32 %v774_v21, %v775_v15  ;;  %v761_v19 = vsel %vm750_vm4, %v703_v12, -inf  ;;  %v5402_v20 = vpop.f32.mrb[20].mxu0 }
 0x106   :  { %v762_v22 = vmax.f32 %v760_v25, %v761_v19  ;;  %v520_v23 = vadd.f32 %v5402_v20, %v6490_v44  ;;  %v511_v24 = vpop.f32.mrb[21].mxu0 }
 0x107   :  { %v512_v26 = vadd.f32 %v6490_v44, %v511_v24  ;;  %v5403_v27 = vpop.f32.mrb[22].mxu0 }
 0x108   :  { %v708_v28 = vmax.f32 %v520_v23, 0.0  ;;  %v523_v10 = vadd.f32 %v5403_v27, %v6490_v44  ;;  %v514_v29 = vpop.f32.mrb[23].mxu0 }
 0x109   :  { %v706_v30 = vmax.f32 %v512_v26, 0.0  ;;  %v515_v16 = vadd.f32 %v6490_v44, %v514_v29 }
 0x10a   :  { %v796_v31 = vsel %vm750_vm4, %v708_v28, -inf  ;;  %v709_v21 = vmax.f32 %v523_v10, 0.0 }
 0x10b   :  { %v797_v32 = vmax.f32 %v795_v46, %v796_v31  ;;  %v782_v33 = vsel %vm750_vm4, %v706_v30, -inf  ;;  %v707_v25 = vmax.f32 %v515_v16, 0.0 }
 0x10c   :  { %v783_v34 = vmax.f32 %v781_v51, %v782_v33  ;;  %v803_v35 = vsel %vm750_vm4, %v709_v21, -inf }
 0x10d   :  { %v804_v36 = vmax.f32 %v802_v56, %v803_v35  ;;  %v789_v37 = vsel %vm750_vm4, %v707_v25, -inf  ;;  %v5406_v38 = vpop.f32.mrb[24].mxu0 }
 0x10e   :  { %v790_v39 = vmax.f32 %v788_v59, %v789_v37  ;;  %v536_v40 = vadd.f32 %v5406_v38, %v6490_v44  ;;  %v527_v41 = vpop.f32.mrb[25].mxu0 }
 0x10f   :  { %v528_v45 = vadd.f32 %v6490_v44, %v527_v41  ;;  %v5407_v47 = vpop.f32.mrb[26].mxu0 }
 0x110   :  { %v712_v48 = vmax.f32 %v536_v40, 0.0  ;;  %v539_v46 = vadd.f32 %v5407_v47, %v6490_v44  ;;  %v530_v49 = vpop.f32.mrb[27].mxu0 }
 0x111   :  { %v710_v50 = vmax.f32 %v528_v45, 0.0  ;;  %v531_v51 = vadd.f32 %v6490_v44, %v530_v49 }
 0x112   :  { %v770_v52 = vsel %vm750_vm4, %v712_v48, -inf  ;;  %v713_v55 = vmax.f32 %v539_v46, 0.0 }
 0x113   :  { %v771_v56 = vmax.f32 %v769_v9, %v770_v52  ;;  %v756_v57 = vsel %vm750_vm4, %v710_v50, -inf  ;;  %v711_v58 = vmax.f32 %v531_v51, 0.0  ;;  %v6157_v50 = vld [vmem:[%s7730_s5 + $0x18] sm:$0xff]  }
 0x114   :  { %v757_v59 = vmax.f32 %v755_v14, %v756_v57  ;;  %v777_v60 = vsel %vm750_vm4, %v713_v55, -inf  ;;  %v6158_v55 = vld [vmem:[%s7730_s5 + $0x20] sm:$0xff]  }
 0x115   :  { %v778_v61 = vmax.f32 %v776_v17, %v777_v60  ;;  %v763_v62 = vsel %vm750_vm4, %v711_v58, -inf  ;;  %v5410_v63 = vpop.f32.mrb[28].mxu0 }
 0x116   :  { %v764_v0 = vmax.f32 %v762_v22, %v763_v62  ;;  %v552_v1 = vadd.f32 %v5410_v63, %v6490_v44  ;;  %v543_v2 = vpop.f32.mrb[29].mxu0 }
 0x117   :  { %v544_v4 = vadd.f32 %v6490_v44, %v543_v2  ;;  %v5411_v5 = vpop.f32.mrb[30].mxu0  ;;  %v884_v6 = vpack.c.bf16 %v778_v61, %v771_v56 }
 0x118   :  { %v716_v7 = vmax.f32 %v552_v1, 0.0  ;;  %v555_v9 = vadd.f32 %v5411_v5, %v6490_v44  ;;  %v546_v11 = vpop.f32.mrb[31].mxu0  ;;  %v883_v12 = vpack.c.bf16 %v764_v0, %v757_v59 }
 0x119   :  { %v714_v14 = vmax.f32 %v544_v4, 0.0  ;;  %v547_v15 = vadd.f32 %v6490_v44, %v546_v11 }
 0x11a   :  { %v798_v17 = vsel %vm750_vm4, %v716_v7, -inf  ;;  %v717_v19 = vmax.f32 %v555_v9, 0.0  ;;  %5444 = vmatprep.subr.bf16.mxu1 %v883_v12 }
 0x11b   :  { %v799_v20 = vmax.f32 %v797_v32, %v798_v17  ;;  %v784_v22 = vsel %vm750_vm4, %v714_v14, -inf  ;;  %v715_v23 = vmax.f32 %v547_v15, 0.0  ;;  %5445 = vmatpush3.bf16.msra.mxu1 %v883_v12 }
 0x11c   :  { %v785_v24 = vmax.f32 %v783_v34, %v784_v22  ;;  %v805_v26 = vsel %vm750_vm4, %v717_v19, -inf  ;;  %5446 = vmatprep.subr.bf16.mxu1 %v884_v6  ;;  %v6155_v34 = vld [vmem:[%s7730_s5 + $0x8] sm:$0xff]  }
 0x11d   :  { %v806_v27 = vmax.f32 %v804_v36, %v805_v26  ;;  %v791_v28 = vsel %vm750_vm4, %v715_v23, -inf  ;;  %v5414_v10 = vpop.f32.mrb[32].mxu0  ;;  %v6156_v36 = vld [vmem:[%s7730_s5 + $0x10] sm:$0xff]  }
 0x11e   :  { %v792_v29 = vmax.f32 %v790_v39, %v791_v28  ;;  %v559_v30 = vpop.f32.mrb[33].mxu0  ;;  %v568_v38 = vadd.f32 %v5414_v10, %v6490_v44  ;;  %v6159_v10 = vld [vmem:[%s7730_s5 + $0x28] sm:$0xff]  }
 0x11f   :  { %v5415_v16 = vpop.f32.mrb[34].mxu0  ;;  %5447 = vmatpush3.bf16.msra.mxu1 %v884_v6  ;;  %v886_v31 = vpack.c.bf16 %v806_v27, %v799_v20  ;;  %v560_v39 = vadd.f32 %v6490_v44, %v559_v30 }
 0x120   :  { %v562_v21 = vpop.f32.mrb[35].mxu0  ;;  %v885_v33 = vpack.c.bf16 %v792_v29, %v785_v24  ;;  %v571_v40 = vadd.f32 %v5415_v16, %v6490_v44  ;;  %v720_v41 = vmax.f32 %v568_v38, 0.0 }
 0x121   :  { %v563_v45 = vadd.f32 %v6490_v44, %v562_v21  ;;  %v718_v48 = vmax.f32 %v560_v39, 0.0 }
 0x122   :  { %5448 = vmatprep.subr.bf16.mxu1 %v885_v33  ;;  %v721_v56 = vmax.f32 %v571_v40, 0.0  ;;  %v6608_v60 = vsel %vm750_vm4, %v720_v41, -inf  ;;  %v656_v41 = vadd.f32 %v6490_v44, %v6512_v8 }
 0x123   :  { %5449 = vmatpush3.bf16.msra.mxu1 %v885_v33  ;;  %v719_v61 = vmax.f32 %v563_v45, 0.0  ;;  %v6612_v0 = vsel %vm750_vm4, %v718_v48, -inf }
 0x124   :  { %5450 = vmatprep.subr.bf16.mxu1 %v886_v31  ;;  %v6627_v11 = vsel %vm750_vm4, %v721_v56, -inf }
 0x125   :  { %v5418_v32 = vpop.f32.mrb[36].mxu0  ;;  %v6636_v17 = vsel %vm750_vm4, %v719_v61, -inf  ;;  %v742_v61 = vmax.f32 %v656_v41, 0.0 }
 0x126   :  { %v575_v25 = vpop.f32.mrb[37].mxu0  ;;  %v584_v1 = vadd.f32 %v5418_v32, %v6490_v44 }
 0x127   :  { %v5419_v35 = vpop.f32.mrb[38].mxu0  ;;  %5451 = vmatpush3.bf16.msra.mxu1 %v886_v31  ;;  %v576_v5 = vadd.f32 %v6490_v44, %v575_v25  ;;  %v6160_v31 = vld [vmem:[%s7730_s5 + $0x30] sm:$0xff]  }
 0x128   :  { %v578_v37 = vpop.f32.mrb[39].mxu0  ;;  %v587_v12 = vadd.f32 %v5419_v35, %v6490_v44  ;;  %v724_v24 = vmax.f32 %v584_v1, 0.0 }
 0x129   :  { %v579_v19 = vadd.f32 %v6490_v44, %v578_v37  ;;  %v722_v29 = vmax.f32 %v576_v5, 0.0  ;;  %v659_v5 = vadd.f32 %v6490_v44, %v6527_v18  ;;  %v672_v18 = vadd.f32 %v6490_v44, %v6541_v43 }
 0x12a   :  { %5453 = vmatmul.mubr.msk.bf16.vlgmr.msra.gmra.mrb[8].mxu1 %vm937_vm3, %v6155_v34  ;;  %v725_v21 = vmax.f32 %v587_v12, 0.0  ;;  %v664_v34 = vadd.f32 %v6503_v3, %v6490_v44  ;;  %v6659_v38 = vsel %vm750_vm4, %v724_v24, -inf }
 0x12b   :  { %5456 = vmatprep.mubr.msk.bf16.mxu1 %vm937_vm3, %v6156_v36  ;;  %v723_v35 = vmax.f32 %v579_v19, 0.0  ;;  %v6668_v45 = vsel %vm750_vm4, %v722_v29, -inf  ;;  %v812_v29 = vsel %vm750_vm4, %v742_v61, -inf }
 0x12d   :  { %v5422_v47 = vpop.f32.mrb[40].mxu0 }
 0x12e   :  { %v600_v46 = vadd.f32 %v5422_v47, %v6490_v44  ;;  %v591_v49 = vpop.f32.mrb[41].mxu0 }
 0x12f   :  { %v592_v51 = vadd.f32 %v6490_v44, %v591_v49  ;;  %v5423_v52 = vpop.f32.mrb[42].mxu0 }
 0x130   :  { %v728_v57 = vmax.f32 %v600_v46, 0.0  ;;  %v603_v58 = vadd.f32 %v5423_v52, %v6490_v44  ;;  %v594_v59 = vpop.f32.mrb[43].mxu0  ;;  %v6677_v46 = vsel %vm750_vm4, %v725_v21, -inf  ;;  %v743_v21 = vmax.f32 %v659_v5, 0.0 }
 0x131   :  { %v726_v62 = vmax.f32 %v592_v51, 0.0  ;;  %v595_v63 = vadd.f32 %v6490_v44, %v594_v59  ;;  %v6685_v51 = vsel %vm750_vm4, %v723_v35, -inf }
 0x132   :  { %v6616_v2 = vsel %vm750_vm4, %v728_v57, -inf  ;;  %v729_v4 = vmax.f32 %v603_v58, 0.0  ;;  %5457 = vmatmul.mubr.msk.bf16.gmra.mrb[12].mxu1 %vm937_vm3, %v6157_v50  ;;  %v744_v50 = vmax.f32 %v664_v34, 0.0  ;;  %v667_v57 = vadd.f32 %v6520_v13, %v6490_v44  ;;  %v6162_v13 = vld [vmem:[%s7730_s5 + $0x40] sm:$0xff]  }
 0x133   :  { %v823_v6 = vmax.f32 %v6608_v60, %v6616_v2  ;;  %v6623_v7 = vsel %vm750_vm4, %v726_v62, -inf  ;;  %v727_v9 = vmax.f32 %v595_v63, 0.0  ;;  %5460 = vmatprep.mubr.msk.bf16.mxu1 %vm937_vm3, %v6158_v55  ;;  %v6161_v63 = vld [vmem:[%s7730_s5 + $0x38] sm:$0xff]   ;;  %v748_v34 = vmax.f32 %v6539_v42, 0.0  ;;  %v6163_v42 = vld [vmem:[%s7730_s5 + $0x48] sm:$0xff]  }
 0x134   :  { %v809_v14 = vmax.f32 %v6612_v0, %v6623_v7  ;;  %v6633_v15 = vsel %vm750_vm4, %v729_v4, -inf  ;;  %v746_v7 = vmax.f32 %v672_v18, 0.0  ;;  %v6174_v18 = vld [vmem:[%s7732_s3 + $0x10] sm:$0xff]  }
 0x135   :  { %v830_v20 = vmax.f32 %v6627_v11, %v6633_v15  ;;  %v6642_v22 = vsel %vm750_vm4, %v727_v9, -inf  ;;  %v5426_v23 = vpop.f32.mrb[44].mxu0  ;;  %v819_v11 = vsel %vm750_vm4, %v743_v21, -inf }
 0x136   :  { %v816_v26 = vmax.f32 %v6636_v17, %v6642_v22  ;;  %v616_v27 = vadd.f32 %v5426_v23, %v6490_v44  ;;  %v607_v28 = vpop.f32.mrb[45].mxu0  ;;  %v826_v23 = vsel %vm750_vm4, %v744_v50, -inf  ;;  %v6164_v17 = vld [vmem:[%s7730_s5] sm:$0xff]   ;;  %v854_v22 = vsel %vm750_vm4, %v748_v34, -inf }
 0x137   :  { %v608_v30 = vadd.f32 %v6490_v44, %v607_v28  ;;  %v5427_v16 = vpop.f32.mrb[46].mxu0 }
 0x138   :  { %v732_v33 = vmax.f32 %v616_v27, 0.0  ;;  %v619_v32 = vadd.f32 %v5427_v16, %v6490_v44  ;;  %v610_v25 = vpop.f32.mrb[47].mxu0  ;;  %v745_v27 = vmax.f32 %v667_v57, 0.0 }
 0x139   :  { %v730_v36 = vmax.f32 %v608_v30, 0.0  ;;  %v611_v37 = vadd.f32 %v6490_v44, %v610_v25 }
 0x13a   :  { %v6662_v39 = vsel %vm750_vm4, %v732_v33, -inf  ;;  %v733_v40 = vmax.f32 %v619_v32, 0.0  ;;  %5461 = vmatmul.mubr.msk.bf16.gmra.mrb[16].mxu1 %vm937_vm3, %v6159_v10  ;;  %v833_v43 = vsel %vm750_vm4, %v745_v27, -inf }
 0x13b   :  { %v851_v3 = vmax.f32 %v6659_v38, %v6662_v39  ;;  %v6673_v47 = vsel %vm750_vm4, %v730_v36, -inf  ;;  %v731_v48 = vmax.f32 %v611_v37, 0.0  ;;  %5464 = vmatprep.mubr.msk.bf16.mxu1 %vm937_vm3, %v6160_v31 }
 0x13c   :  { %v837_v49 = vmax.f32 %v6668_v45, %v6673_v47  ;;  %v6682_v8 = vsel %vm750_vm4, %v733_v40, -inf  ;;  %v675_v40 = vadd.f32 %v6490_v44, %v6550_v54 }
 0x13d   :  { %v858_v52 = vmax.f32 %v6677_v46, %v6682_v8  ;;  %v6690_v55 = vsel %vm750_vm4, %v731_v48, -inf  ;;  %v5430_v56 = vpop.f32.mrb[48].mxu0  ;;  %v6165_v8 = vld [vmem:[%s7730_s5 + $0x8] sm:$0xff]  }
 0x13e   :  { %v844_v58 = vmax.f32 %v6685_v51, %v6690_v55  ;;  %v632_v59 = vadd.f32 %v5430_v56, %v6490_v44  ;;  %v623_v62 = vpop.f32.mrb[49].mxu0  ;;  %v6166_v51 = vld [vmem:[%s7730_s5 + $0x10] sm:$0xff]   ;;  %v6168_v55 = vld [vmem:[%s7730_s5 + $0x20] sm:$0xff]  }
 0x13f   :  { %v624_v1 = vadd.f32 %v6490_v44, %v623_v62  ;;  %v5431_v4 = vpop.f32.mrb[50].mxu0 }
 0x140   :  { %v736_v9 = vmax.f32 %v632_v59, 0.0  ;;  %v635_v12 = vadd.f32 %v5431_v4, %v6490_v44  ;;  %v626_v19 = vpop.f32.mrb[51].mxu0  ;;  %v749_v59 = vmax.f32 %v6548_v53, 0.0 }
 0x141   :  { %v734_v24 = vmax.f32 %v624_v1, 0.0  ;;  %v627_v28 = vadd.f32 %v6490_v44, %v626_v19 }
 0x142   :  { %v824_v10 = vsel %vm750_vm4, %v736_v9, -inf  ;;  %v737_v30 = vmax.f32 %v635_v12, 0.0  ;;  %5465 = vmatmul.mubr.msk.bf16.gmra.mrb[20].mxu1 %vm937_vm3, %v6161_v63  ;;  %v840_v63 = vsel %vm750_vm4, %v746_v7, -inf  ;;  %v747_v9 = vmax.f32 %v675_v40, 0.0 }
 0x143   :  { %v825_v16 = vmax.f32 %v823_v6, %v824_v10  ;;  %v810_v31 = vsel %vm750_vm4, %v734_v24, -inf  ;;  %v735_v33 = vmax.f32 %v627_v28, 0.0  ;;  %5468 = vmatprep.mubr.msk.bf16.mxu1 %vm937_vm3, %v6162_v13  ;;  %v6170_v28 = vld [vmem:[%s7730_s5 + $0x30] sm:$0xff]   ;;  %v6171_v10 = vld [vmem:[%s7730_s5 + $0x38] sm:$0xff]  }
 0x144   :  { %v811_v32 = vmax.f32 %v809_v14, %v810_v31  ;;  %v831_v25 = vsel %vm750_vm4, %v737_v30, -inf  ;;  %v847_v47 = vsel %vm750_vm4, %v747_v9, -inf  ;;  %v6173_v30 = vld [vmem:[%s7730_s5 + $0x48] sm:$0xff]   ;;  %v6176_v31 = vld [vmem:[%s7732_s3] sm:$0xff]  }
 0x145   :  { %v832_v60 = vmax.f32 %v830_v20, %v831_v25  ;;  %v817_v2 = vsel %vm750_vm4, %v735_v33, -inf  ;;  %v5434_v6 = vpop.f32.mrb[52].mxu0  ;;  %v827_v35 = vmax.f32 %v825_v16, %v826_v23  ;;  %v6175_v16 = vld [vmem:[%s7732_s3 + $0x18] sm:$0xff]  }
 0x146   :  { %v818_v36 = vmax.f32 %v816_v26, %v817_v2  ;;  %v648_v0 = vadd.f32 %v5434_v6, %v6490_v44  ;;  %v639_v14 = vpop.f32.mrb[53].mxu0  ;;  %v813_v37 = vmax.f32 %v811_v32, %v812_v29  ;;  %v6172_v29 = vld [vmem:[%s7730_s5 + $0x40] sm:$0xff]  }
 0x147   :  { %v640_v15 = vadd.f32 %v6490_v44, %v639_v14  ;;  %v5435_v20 = vpop.f32.mrb[54].mxu0  ;;  %v834_v41 = vmax.f32 %v832_v60, %v833_v43 }
 0x148   :  { %v740_v26 = vmax.f32 %v648_v0, 0.0  ;;  %v651_v48 = vadd.f32 %v5435_v20, %v6490_v44  ;;  %v642_v50 = vpop.f32.mrb[55].mxu0  ;;  %v820_v56 = vmax.f32 %v818_v36, %v819_v11 }
 0x149   :  { %v738_v57 = vmax.f32 %v640_v15, 0.0  ;;  %v643_v61 = vadd.f32 %v6490_v44, %v642_v50  ;;  %v1122_v62 = vpack.c.bf16 %v834_v41, %v827_v35  ;;  %v6177_v41 = vld [vmem:[%s7732_s3 + $0x8] sm:$0xff]  }
 0x14a   :  { %v852_v54 = vsel %vm750_vm4, %v740_v26, -inf  ;;  %v741_v1 = vmax.f32 %v651_v48, 0.0  ;;  %5469 = vmatmul.mubr.msk.bf16.gmra.mrb[24].mxu1 %vm937_vm3, %v6163_v42  ;;  %v1121_v4 = vpack.c.bf16 %v820_v56, %v813_v37  ;;  %v6853_v48 = vld [vmem:[%s7732_s3 + $0x20] sm:$0xff]  }
 0x14b   :  { %v853_v5 = vmax.f32 %v851_v3, %v852_v54  ;;  %v838_v13 = vsel %vm750_vm4, %v738_v57, -inf  ;;  %v739_v12 = vmax.f32 %v643_v61, 0.0  ;;  %5480 = vmatprep.mubr.msk.bf16.mxu1 %vm937_vm3, %v6164_v17  ;;  %v861_v3 = vsel %vm750_vm4, %v749_v59, -inf  ;;  %v6183_v17 = vld [vmem:[%s7732_s3 + $0x48] sm:$0xff]  }
 0x14c   :  { %v839_v44 = vmax.f32 %v837_v49, %v838_v13  ;;  %v859_v53 = vsel %vm750_vm4, %v741_v1, -inf  ;;  %5472 = vmatprep.subr.bf16.mxu1 %v1121_v4 }
 0x14d   :  { %v860_v19 = vmax.f32 %v858_v52, %v859_v53  ;;  %v845_v38 = vsel %vm750_vm4, %v739_v12, -inf  ;;  %5473 = vmatpush3.bf16.msra.mxu1 %v1121_v4  ;;  %v855_v39 = vmax.f32 %v853_v5, %v854_v22  ;;  %v6167_v52 = vld [vmem:[%s7730_s5 + $0x18] sm:$0xff]  }
 0x14e   :  { %v846_v23 = vmax.f32 %v844_v58, %v845_v38  ;;  %5474 = vmatprep.subr.bf16.mxu1 %v1122_v62  ;;  %v841_v45 = vmax.f32 %v839_v44, %v840_v63  ;;  %v6169_v58 = vld [vmem:[%s7730_s5 + $0x28] sm:$0xff]   ;;  %v6181_v4 = vld [vmem:[%s7732_s3 + $0x38] sm:$0xff]  }
 0x14f   :  { %v862_v49 = vmax.f32 %v860_v19, %v861_v3 }
 0x150   :  { %v848_v24 = vmax.f32 %v846_v23, %v847_v47 }
 0x151   :  { %5475 = vmatpush3.bf16.msra.mxu1 %v1122_v62  ;;  %v1124_v27 = vpack.c.bf16 %v862_v49, %v855_v39 }
 0x152   :  { %v1123_v46 = vpack.c.bf16 %v848_v24, %v841_v45 }
 0x154   :  { %5476 = vmatprep.subr.bf16.mxu1 %v1123_v46 }
 0x155   :  { %5477 = vmatpush3.bf16.msra.mxu1 %v1123_v46 }
 0x156   :  { %5478 = vmatprep.subr.bf16.mxu1 %v1124_v27 }
 0x159   :  { %5479 = vmatpush3.bf16.msra.mxu1 %v1124_v27 }
 0x15a   :  { %5500 = vmatprep.subr.bf16.mxu1 %v6174_v18 }
 0x15c   :  { %5481 = vmatmul.mubr.msk.bf16.vlgmr.msra.gmra.mrb[28].mxu1 %vm937_vm3, %v6165_v8 }
 0x15d   :  { %5484 = vmatprep.mubr.msk.bf16.mxu1 %vm937_vm3, %v6166_v51  ;;  %5501 = vmatpush3.bf16.msra.mxu1 %v6174_v18 }
 0x15e   :  { %5502 = vmatprep.subr.bf16.mxu1 %v6175_v16 }
 0x161   :  { %5503 = vmatpush3.bf16.msra.mxu1 %v6175_v16 }
 0x162   :  { %5520 = vmatprep.subr.bf16.mxu1 %v6176_v31 }
 0x164   :  { %5485 = vmatmul.mubr.msk.bf16.gmra.mrb[32].mxu1 %vm937_vm3, %v6167_v52 }
 0x165   :  { %5488 = vmatprep.mubr.msk.bf16.mxu1 %vm937_vm3, %v6168_v55 }
 0x16c   :  { %5489 = vmatmul.mubr.msk.bf16.gmra.mrb[36].mxu1 %vm937_vm3, %v6169_v58 }
 0x16d   :  { %5492 = vmatprep.mubr.msk.bf16.mxu1 %vm937_vm3, %v6170_v28 }
 0x174   :  { %5493 = vmatmul.mubr.msk.bf16.gmra.mrb[40].mxu1 %vm937_vm3, %v6171_v10 }
 0x175   :  { %5496 = vmatprep.mubr.msk.bf16.mxu1 %vm937_vm3, %v6172_v29 }
 0x17c   :  { %5497 = vmatmul.mubr.msk.bf16.gmra.mrb[44].mxu1 %vm937_vm3, %v6173_v30 }
 0x1fd   :  { %v5454_v21 = vpop.f32.mrb[8].mxu1 }
 0x1fe   :  { %1083 = vst.msk [vmem:[#allocation2 + $0x10] sm:$0xff] %vm750_vm4, %v5454_v21  ;;  %v1002_v33 = vpop.f32.mrb[9].mxu1 }
 0x1ff   :  { %1081 = vst.msk [vmem:[#allocation2] sm:$0xff] %vm750_vm4, %v1002_v33  ;;  %v5455_v32 = vpop.f32.mrb[10].mxu1 }
 0x200   :  { %1084 = vst.msk [vmem:[#allocation2 + $0x18] sm:$0xff] %vm750_vm4, %v5455_v32  ;;  %v1005_v25 = vpop.f32.mrb[11].mxu1 }
 0x201   :  { %1082 = vst.msk [vmem:[#allocation2 + $0x8] sm:$0xff] %vm750_vm4, %v1005_v25 }
 0x205   :  { %v5458_v34 = vpop.f32.mrb[12].mxu1 }
 0x206   :  { %1087 = vst.msk [vmem:[#allocation2 + $0x30] sm:$0xff] %vm750_vm4, %v5458_v34  ;;  %v1018_v43 = vpop.f32.mrb[13].mxu1 }
 0x207   :  { %1085 = vst.msk [vmem:[#allocation2 + $0x20] sm:$0xff] %vm750_vm4, %v1018_v43  ;;  %v5459_v60 = vpop.f32.mrb[14].mxu1  ;;  %v6819_v2 = vld [vmem:[#allocation2 + $0x11] sm:$0xff] }
 0x208   :  { %1088 = vst.msk [vmem:[#allocation2 + $0x38] sm:$0xff] %vm750_vm4, %v5459_v60  ;;  %v1021_v6 = vpop.f32.mrb[15].mxu1  ;;  %v1367_v35 = vld [vmem:[#allocation2 + $0x1] sm:$0xff]  ;;  %v6826_v14 = vld [vmem:[#allocation2 + $0x12] sm:$0xff] }
 0x209   :  { %1086 = vst.msk [vmem:[#allocation2 + $0x28] sm:$0xff] %vm750_vm4, %v1021_v6  ;;  %v1383_v36 = vpack.c.bf16 %v6819_v2, %v1367_v35 }
 0x20b   :  { %5504 = vmatprep.mubr.msk.bf16.mxu1 %vm750_vm4, %v1383_v36 }
 0x20d   :  { %v5462_v0 = vpop.f32.mrb[16].mxu1 }
 0x20e   :  { %1091 = vst.msk [vmem:[#allocation2 + $0x50] sm:$0xff] %vm750_vm4, %v5462_v0  ;;  %v1034_v7 = vpop.f32.mrb[17].mxu1 }
 0x20f   :  { %1089 = vst.msk [vmem:[#allocation2 + $0x40] sm:$0xff] %vm750_vm4, %v1034_v7  ;;  %v5463_v42 = vpop.f32.mrb[18].mxu1  ;;  %v6829_v37 = vld [vmem:[#allocation2 + $0x31] sm:$0xff] }
 0x210   :  { %1092 = vst.msk [vmem:[#allocation2 + $0x58] sm:$0xff] %vm750_vm4, %v5463_v42  ;;  %v1037_v11 = vpop.f32.mrb[19].mxu1  ;;  %v6832_v15 = vld [vmem:[#allocation2 + $0x21] sm:$0xff]  ;;  %v6856_v56 = vld [vmem:[#allocation2 + $0x32] sm:$0xff] }
 0x211   :  { %v6834_v20 = vld [vmem:[#allocation2 + $0x22] sm:$0xff]  ;;  %1090 = vst.msk [vmem:[#allocation2 + $0x48] sm:$0xff] %vm750_vm4, %v1037_v11  ;;  %v6839_v40 = vpack.c.bf16 %v6829_v37, %v6832_v15 }
 0x212   :  { %v7030_v23 = vpack.c.bf16 %v6856_v56, %v6834_v20 }
 0x213   :  { %5505 = vmatmul.mubr.msk.bf16.vlgmr.msra.gmra.mrb[48].mxu1 %vm750_vm4, %v6839_v40 }
 0x214   :  { %5521 = vmatpush3.bf16.msra.mxu1 %v6176_v31 }
 0x215   :  { %v5466_v26 = vpop.f32.mrb[20].mxu1  ;;  %5522 = vmatprep.subr.bf16.mxu1 %v6177_v41 }
 0x216   :  { %1095 = vst.msk [vmem:[#allocation2 + $0x70] sm:$0xff] %vm750_vm4, %v5466_v26  ;;  %v1050_v50 = vpop.f32.mrb[21].mxu1 }
 0x217   :  { %1093 = vst.msk [vmem:[#allocation2 + $0x60] sm:$0xff] %vm750_vm4, %v1050_v50  ;;  %v5467_v57 = vpop.f32.mrb[22].mxu1  ;;  %v6859_v59 = vld [vmem:[#allocation2 + $0x51] sm:$0xff] }
 0x218   :  { %1096 = vst.msk [vmem:[#allocation2 + $0x78] sm:$0xff] %vm750_vm4, %v5467_v57  ;;  %v1053_v61 = vpop.f32.mrb[23].mxu1  ;;  %v6862_v62 = vld [vmem:[#allocation2 + $0x41] sm:$0xff]  ;;  %5523 = vmatpush3.bf16.msra.mxu1 %v6177_v41  ;;  %v6879_v9 = vld [vmem:[#allocation2 + $0x52] sm:$0xff] }
 0x219   :  { %v6864_v54 = vld [vmem:[#allocation2 + $0x42] sm:$0xff]  ;;  %1094 = vst.msk [vmem:[#allocation2 + $0x68] sm:$0xff] %vm750_vm4, %v1053_v61  ;;  %v6869_v63 = vpack.c.bf16 %v6859_v59, %v6862_v62  ;;  %5540 = vmatprep.subr.bf16.mxu1 %v6853_v48 }
 0x21a   :  { %v1662_v41 = vld [vmem:[#allocation2 + $0x2] sm:$0xff]  ;;  %v7037_v22 = vpack.c.bf16 %v6879_v9, %v6864_v54 }
 0x21b   :  { %5508 = vmatprep.mubr.msk.bf16.mxu1 %vm750_vm4, %v6869_v63 }
 0x21d   :  { %v5470_v5 = vpop.f32.mrb[24].mxu1 }
 0x21e   :  { %1099 = vst.msk [vmem:[#allocation2 + $0x90] sm:$0xff] %vm750_vm4, %v5470_v5  ;;  %v1066_v13 = vpop.f32.mrb[25].mxu1  ;;  %v1339_v5 = vld [vmem:[#allocation2] sm:$0xff] }
 0x21f   :  { %1097 = vst.msk [vmem:[#allocation2 + $0x80] sm:$0xff] %vm750_vm4, %v1066_v13  ;;  %v5471_v12 = vpop.f32.mrb[26].mxu1  ;;  %v6882_v44 = vld [vmem:[#allocation2 + $0x71] sm:$0xff] }
 0x220   :  { %1100 = vst.msk [vmem:[#allocation2 + $0x98] sm:$0xff] %vm750_vm4, %v5471_v12  ;;  %v1069_v53 = vpop.f32.mrb[27].mxu1  ;;  %v6885_v19 = vld [vmem:[#allocation2 + $0x61] sm:$0xff]  ;;  %v6960_v13 = vld [vmem:[#allocation2 + $0x10] sm:$0xff] }
 0x221   :  { %v6887_v38 = vld [vmem:[#allocation2 + $0x62] sm:$0xff]  ;;  %1098 = vst.msk [vmem:[#allocation2 + $0x88] sm:$0xff] %vm750_vm4, %v1069_v53  ;;  %v6892_v39 = vpack.c.bf16 %v6882_v44, %v6885_v19 }
 0x223   :  { %5509 = vmatmul.mubr.msk.bf16.gmra.mrb[52].mxu1 %vm750_vm4, %v6892_v39 }
 0x22f   :  { %v5482_v45 = vpop.f32.mrb[28].mxu1 }
 0x230   :  { %1321 = vst.msk [vmem:[#allocation2 + $0xb0] sm:$0xff] %vm750_vm4, %v5482_v45  ;;  %v1239_v47 = vpop.f32.mrb[29].mxu1 }
 0x231   :  { %1319 = vst.msk [vmem:[#allocation2 + $0xa0] sm:$0xff] %vm750_vm4, %v1239_v47  ;;  %v5483_v49 = vpop.f32.mrb[30].mxu1 }
 0x232   :  { %1322 = vst.msk [vmem:[#allocation2 + $0xb8] sm:$0xff] %vm750_vm4, %v5483_v49  ;;  %v1242_v24 = vpop.f32.mrb[31].mxu1 }
 0x233   :  { %1320 = vst.msk [vmem:[#allocation2 + $0xa8] sm:$0xff] %vm750_vm4, %v1242_v24 }
 0x237   :  { %v5486_v27 = vpop.f32.mrb[32].mxu1 }
 0x238   :  { %1325 = vst.msk [vmem:[#allocation2 + $0xd0] sm:$0xff] %vm750_vm4, %v5486_v27  ;;  %v1255_v46 = vpop.f32.mrb[33].mxu1 }
 0x239   :  { %1323 = vst.msk [vmem:[#allocation2 + $0xc0] sm:$0xff] %vm750_vm4, %v1255_v46  ;;  %v5487_v8 = vpop.f32.mrb[34].mxu1  ;;  %v6906_v51 = vld [vmem:[#allocation2 + $0xb1] sm:$0xff]  ;;  %v1355_v46 = vpack.c.bf16 %v6960_v13, %v1339_v5 }
 0x23a   :  { %1326 = vst.msk [vmem:[#allocation2 + $0xd8] sm:$0xff] %vm750_vm4, %v5487_v8  ;;  %v1258_v52 = vpop.f32.mrb[35].mxu1  ;;  %v1375_v55 = vld [vmem:[#allocation2 + $0xa1] sm:$0xff]  ;;  %v6919_v31 = vld [vmem:[#allocation2 + $0xb2] sm:$0xff] }
 0x23b   :  { %1324 = vst.msk [vmem:[#allocation2 + $0xc8] sm:$0xff] %vm750_vm4, %v1258_v52  ;;  %v1387_v58 = vpack.c.bf16 %v6906_v51, %v1375_v55  ;;  %v6982_v8 = vld [vmem:[#allocation2 + $0x30] sm:$0xff]  ;;  %v1341_v55 = vld [vmem:[#allocation2 + $0x20] sm:$0xff] }
 0x23c   :  { %v6984_v52 = vld [vmem:[#allocation2 + $0x50] sm:$0xff]  ;;  %v1670_v24 = vld [vmem:[#allocation2 + $0xa2] sm:$0xff] }
 0x23d   :  { %5512 = vmatprep.mubr.msk.bf16.mxu1 %vm750_vm4, %v1387_v58  ;;  %v6987_v58 = vpack.c.bf16 %v6982_v8, %v1341_v55  ;;  %v1682_v32 = vpack.c.bf16 %v6919_v31, %v1670_v24 }
 0x23f   :  { %v5490_v28 = vpop.f32.mrb[36].mxu1 }
 0x240   :  { %1329 = vst.msk [vmem:[#allocation2 + $0xf0] sm:$0xff] %vm750_vm4, %v5490_v28  ;;  %v1271_v10 = vpop.f32.mrb[37].mxu1  ;;  %v1343_v28 = vld [vmem:[#allocation2 + $0x40] sm:$0xff] }
 0x241   :  { %1327 = vst.msk [vmem:[#allocation2 + $0xe0] sm:$0xff] %vm750_vm4, %v1271_v10  ;;  %v5491_v29 = vpop.f32.mrb[38].mxu1  ;;  %v6914_v30 = vld [vmem:[#allocation2 + $0xd1] sm:$0xff]  ;;  %v6179_v10 = vld [vmem:[%s7732_s3 + $0x28] sm:$0xff]   ;;  %v1858_v1 = vpack.c.bf16 %v1343_v28, %v6982_v8 }
 0x242   :  { %1330 = vst.msk [vmem:[#allocation2 + $0xf8] sm:$0xff] %vm750_vm4, %v5491_v29  ;;  %v1274_v18 = vpop.f32.mrb[39].mxu1  ;;  %v6917_v16 = vld [vmem:[#allocation2 + $0xc1] sm:$0xff]  ;;  %v6941_v0 = vld [vmem:[#allocation2 + $0xd2] sm:$0xff]  ;;  %v6993_v29 = vpack.c.bf16 %v6984_v52, %v1343_v28 }
 0x243   :  { %v6921_v21 = vld [vmem:[#allocation2 + $0xc2] sm:$0xff]  ;;  %1328 = vst.msk [vmem:[#allocation2 + $0xe8] sm:$0xff] %vm750_vm4, %v1274_v18  ;;  %v6926_v33 = vpack.c.bf16 %v6914_v30, %v6917_v16  ;;  %v6180_v18 = vld [vmem:[%s7732_s3 + $0x30] sm:$0xff]  }
 0x245   :  { %5513 = vmatmul.mubr.msk.bf16.gmra.mrb[56].mxu1 %vm750_vm4, %v6926_v33 }
 0x247   :  { %v5494_v34 = vpop.f32.mrb[40].mxu1 }
 0x248   :  { %1333 = vst.msk [vmem:[#allocation2 + $0x110] sm:$0xff] %vm750_vm4, %v5494_v34  ;;  %v1287_v43 = vpop.f32.mrb[41].mxu1  ;;  %v7003_v34 = vld [vmem:[#allocation2 + $0x70] sm:$0xff]  ;;  %v1351_v5 = vld [vmem:[#allocation2 + $0xe0] sm:$0xff] }
 0x249   :  { %1331 = vst.msk [vmem:[#allocation2 + $0x100] sm:$0xff] %vm750_vm4, %v1287_v43  ;;  %v5495_v60 = vpop.f32.mrb[42].mxu1  ;;  %v6936_v6 = vld [vmem:[#allocation2 + $0xf1] sm:$0xff]  ;;  %v1347_v43 = vld [vmem:[#allocation2 + $0xa0] sm:$0xff] }
 0x24a   :  { %1334 = vst.msk [vmem:[#allocation2 + $0x118] sm:$0xff] %vm750_vm4, %v5495_v60  ;;  %v1290_v35 = vpop.f32.mrb[43].mxu1  ;;  %v6939_v36 = vld [vmem:[#allocation2 + $0xe1] sm:$0xff]  ;;  %v6965_v45 = vld [vmem:[#allocation2 + $0xf2] sm:$0xff] }
 0x24b   :  { %v6943_v7 = vld [vmem:[#allocation2 + $0xe2] sm:$0xff]  ;;  %1332 = vst.msk [vmem:[#allocation2 + $0x108] sm:$0xff] %vm750_vm4, %v1290_v35  ;;  %v6948_v42 = vpack.c.bf16 %v6936_v6, %v6939_v36  ;;  %v7005_v60 = vld [vmem:[#allocation2 + $0xb0] sm:$0xff] }
 0x24c   :  { %v1345_v35 = vld [vmem:[#allocation2 + $0x60] sm:$0xff]  ;;  %v7062_v3 = vpack.c.bf16 %v6965_v45, %v6943_v7 }
 0x24d   :  { %5516 = vmatprep.mubr.msk.bf16.mxu1 %vm750_vm4, %v6948_v42 }
 0x24e   :  { %7743 = vst [vmem:[#allocation5_spill] sm:$0xff] %v7062_v3 }
 0x24f   :  { %v5498_v26 = vpop.f32.mrb[44].mxu1 }
 0x250   :  { %1337 = vst.msk [vmem:[#allocation2 + $0x130] sm:$0xff] %vm750_vm4, %v5498_v26  ;;  %v1303_v50 = vpop.f32.mrb[45].mxu1  ;;  %v7008_v26 = vpack.c.bf16 %v7003_v34, %v1345_v35 }
 0x251   :  { %1335 = vst.msk [vmem:[#allocation2 + $0x120] sm:$0xff] %vm750_vm4, %v1303_v50  ;;  %v5499_v57 = vpop.f32.mrb[46].mxu1  ;;  %v6958_v61 = vld [vmem:[#allocation2 + $0x111] sm:$0xff]  ;;  %v1359_v50 = vpack.c.bf16 %v7005_v60, %v1347_v43 }
 0x252   :  { %1338 = vst.msk [vmem:[#allocation2 + $0x138] sm:$0xff] %vm750_vm4, %v5499_v57  ;;  %v1306_v12 = vpop.f32.mrb[47].mxu1  ;;  %v6963_v53 = vld [vmem:[#allocation2 + $0x101] sm:$0xff]  ;;  %v1350_v57 = vld [vmem:[#allocation2 + $0xd0] sm:$0xff] }
 0x253   :  { %v6967_v47 = vld [vmem:[#allocation2 + $0x102] sm:$0xff]  ;;  %1336 = vst.msk [vmem:[#allocation2 + $0x128] sm:$0xff] %vm750_vm4, %v1306_v12  ;;  %v6972_v49 = vpack.c.bf16 %v6958_v61, %v6963_v53  ;;  %v1352_v12 = vld [vmem:[#allocation2 + $0xf0] sm:$0xff] }
 0x254   :  { %v7016_v27 = vpack.c.bf16 %v1352_v12, %v1351_v5  ;;  %v1354_v43 = vld [vmem:[#allocation2 + $0x110] sm:$0xff] }
 0x255   :  { %5517 = vmatmul.mubr.msk.bf16.gmra.mrb[60].mxu1 %vm750_vm4, %v6972_v49 }
 0x256   :  { %5524 = vmatprep.mubr.msk.bf16.mxu1 %vm750_vm4, %v1355_v46 }
 0x25d   :  { %5525 = vmatmul.mubr.msk.bf16.vlgmr.msra.gmra.mrb[48].mxu1 %vm750_vm4, %v6987_v58 }
 0x25e   :  { %5528 = vmatprep.mubr.msk.bf16.mxu1 %vm750_vm4, %v6993_v29  ;;  %5541 = vmatpush3.bf16.msra.mxu1 %v6853_v48  ;;  %v1349_v48 = vld [vmem:[#allocation2 + $0xc0] sm:$0xff] }
 0x25f   :  { %5542 = vmatprep.subr.bf16.mxu1 %v6179_v10  ;;  %v7014_v46 = vpack.c.bf16 %v1350_v57, %v1349_v48  ;;  %v1861_v28 = vpack.c.bf16 %v1349_v48, %v7005_v60  ;;  %v7745_v60 = vpack.c.bf16 %v6862_v62, %v6829_v37  ;;  %v7746_v48 = vpack.c.bf16 %v6885_v19, %v6859_v59  ;;  %v2034_v19 = vld [vmem:[#allocation2 + $0x121] sm:$0xff] }
 0x260   :  { %v7747_v37 = vpack.c.bf16 %v6917_v16, %v6906_v51  ;;  %v7748_v59 = vpack.c.bf16 %v6939_v36, %v6914_v30  ;;  %v7749_v62 = vpack.c.bf16 %v6963_v53, %v6936_v6  ;;  %v7750_v51 = vpack.c.bf16 %v6834_v20, %v6826_v14  ;;  %v6187_v30 = vld [vmem:[%s7732_s3 + $0x68] sm:$0xff]   ;;  %v2391_v53 = vld [vmem:[#allocation2 + $0x130] sm:$0xff] }
 0x261   :  { %v7751_v16 = vpack.c.bf16 %v6864_v54, %v6856_v56  ;;  %v7752_v6 = vpack.c.bf16 %v6887_v38, %v6879_v9  ;;  %v2204_v20 = vld [vmem:[#allocation2 + $0x82] sm:$0xff]  ;;  %v7753_v56 = vpack.c.bf16 %v6921_v21, %v6919_v31  ;;  %v7754_v54 = vpack.c.bf16 %v6943_v7, %v6941_v0  ;;  %v6189_v31 = vld [vmem:[%s7732_s3 + $0x78] sm:$0xff]  }
 0x262   :  { %5543 = vmatpush3.bf16.msra.mxu1 %v6179_v10  ;;  %v1353_v10 = vld [vmem:[#allocation2 + $0x100] sm:$0xff]  ;;  %v7755_v9 = vpack.c.bf16 %v6967_v47, %v6965_v45 }
 0x263   :  { %5560 = vmatprep.subr.bf16.mxu1 %v6180_v18  ;;  %v7022_v25 = vpack.c.bf16 %v1354_v43, %v1353_v10 }
 0x265   :  { %5529 = vmatmul.mubr.msk.bf16.gmra.mrb[52].mxu1 %vm750_vm4, %v7008_v26 }
 0x266   :  { %5532 = vmatprep.mubr.msk.bf16.mxu1 %vm750_vm4, %v1359_v50  ;;  %v1678_v50 = vpack.c.bf16 %v6826_v14, %v1662_v41  ;;  %v6182_v41 = vld [vmem:[%s7732_s3 + $0x40] sm:$0xff]   ;;  %v6188_v14 = vld [vmem:[%s7732_s3 + $0x70] sm:$0xff]  }
 0x26d   :  { %5533 = vmatmul.mubr.msk.bf16.gmra.mrb[56].mxu1 %vm750_vm4, %v7014_v46 }
 0x26e   :  { %5536 = vmatprep.mubr.msk.bf16.mxu1 %vm750_vm4, %v7016_v27 }
 0x275   :  { %5537 = vmatmul.mubr.msk.bf16.gmra.mrb[60].mxu1 %vm750_vm4, %v7022_v25 }
 0x276   :  { %5544 = vmatprep.mubr.msk.bf16.mxu1 %vm750_vm4, %v1678_v50  ;;  %v7046_v50 = vld [vmem:[#allocation2 + $0x72] sm:$0xff] }
 0x277   :  { %v7050_v11 = vpack.c.bf16 %v7046_v50, %v6887_v38  ;;  %v2216_v36 = vpack.c.bf16 %v2204_v20, %v7046_v50  ;;  %v2212_v38 = vld [vmem:[#allocation2 + $0x122] sm:$0xff] }
 0x27d   :  { %5545 = vmatmul.mubr.msk.bf16.vlgmr.msra.gmra.mrb[48].mxu1 %vm750_vm4, %v7030_v23 }
 0x27e   :  { %5548 = vmatprep.mubr.msk.bf16.mxu1 %vm750_vm4, %v7037_v22  ;;  %5561 = vmatpush3.bf16.msra.mxu1 %v6180_v18  ;;  %v7058_v18 = vpack.c.bf16 %v6941_v0, %v6921_v21  ;;  %v6190_v21 = vld [vmem:[%s7732_s3 + $0x80] sm:$0xff]   ;;  %v2383_v0 = vld [vmem:[#allocation2 + $0x90] sm:$0xff] }
 0x27f   :  { %5562 = vmatprep.subr.bf16.mxu1 %v6181_v4 }
 0x282   :  { %5563 = vmatpush3.bf16.msra.mxu1 %v6181_v4  ;;  %v7068_v4 = vld [vmem:[#allocation2 + $0x112] sm:$0xff] }
 0x283   :  { %5580 = vmatprep.subr.bf16.mxu1 %v6182_v41  ;;  %v7072_v24 = vpack.c.bf16 %v7068_v4, %v6967_v47  ;;  %v6191_v47 = vld [vmem:[%s7732_s3 + $0x88] sm:$0xff]  }
 0x285   :  { %5549 = vmatmul.mubr.msk.bf16.gmra.mrb[52].mxu1 %vm750_vm4, %v7050_v11 }
 0x286   :  { %5552 = vmatprep.mubr.msk.bf16.mxu1 %vm750_vm4, %v1682_v32  ;;  %v1857_v32 = vpack.c.bf16 %v1341_v55, %v6960_v13  ;;  %v6184_v13 = vld [vmem:[%s7732_s3 + $0x50] sm:$0xff]   ;;  %v1848_v55 = vld [vmem:[#allocation2 + $0x80] sm:$0xff] }
 0x287   :  { %v1860_v8 = vpack.c.bf16 %v1848_v55, %v7003_v34  ;;  %v6185_v34 = vld [vmem:[%s7732_s3 + $0x58] sm:$0xff]   ;;  %v2395_v7 = vpack.c.bf16 %v2383_v0, %v1848_v55 }
 0x28d   :  { %5553 = vmatmul.mubr.msk.bf16.gmra.mrb[56].mxu1 %vm750_vm4, %v7058_v18 }
 0x28e   :  { %5556 = vmatprep.mubr.msk.bf16.mxu1 %vm750_vm4, %v7062_v3  ;;  %v1859_v3 = vpack.c.bf16 %v1345_v35, %v6984_v52  ;;  %v1863_v52 = vpack.c.bf16 %v1353_v10, %v1352_v12 }
 0x295   :  { %5557 = vmatmul.mubr.msk.bf16.gmra.mrb[60].mxu1 %vm750_vm4, %v7072_v24 }
 0x296   :  { %5564 = vmatprep.mubr.msk.bf16.mxu1 %vm750_vm4, %v1857_v32 }
 0x29d   :  { %5565 = vmatmul.mubr.msk.bf16.vlgmr.msra.gmra.mrb[48].mxu1 %vm750_vm4, %v1858_v1  ;;  %v1862_v1 = vpack.c.bf16 %v1351_v5, %v1350_v57 }
 0x29e   :  { %5568 = vmatprep.mubr.msk.bf16.mxu1 %vm750_vm4, %v1859_v3  ;;  %5581 = vmatpush3.bf16.msra.mxu1 %v6182_v41  ;;  %v1856_v3 = vld [vmem:[#allocation2 + $0x120] sm:$0xff] }
 0x29f   :  { %5582 = vmatprep.subr.bf16.mxu1 %v6183_v17  ;;  %v1864_v35 = vpack.c.bf16 %v1856_v3, %v1354_v43  ;;  %v2399_v45 = vpack.c.bf16 %v2391_v53, %v1856_v3 }
 0x2a2   :  { %5583 = vmatpush3.bf16.msra.mxu1 %v6183_v17  ;;  %v7744_v17 = vpack.c.bf16 %v6832_v15, %v6819_v2  ;;  %v6186_v2 = vld [vmem:[%s7732_s3 + $0x60] sm:$0xff]  }
 0x2a3   :  { %5600 = vmatprep.subr.bf16.mxu1 %v6184_v13  ;;  %v2026_v15 = vld [vmem:[#allocation2 + $0x81] sm:$0xff] }
 0x2a4   :  { %v2038_v57 = vpack.c.bf16 %v2026_v15, %v6882_v44  ;;  %v2042_v44 = vpack.c.bf16 %v2034_v19, %v6958_v61  ;;  %v2220_v61 = vpack.c.bf16 %v2212_v38, %v7068_v4 }
 0x2a5   :  { %5569 = vmatmul.mubr.msk.bf16.gmra.mrb[52].mxu1 %vm750_vm4, %v1860_v8 }
 0x2a6   :  { %5572 = vmatprep.mubr.msk.bf16.mxu1 %vm750_vm4, %v1861_v28 }
 0x2ad   :  { %5573 = vmatmul.mubr.msk.bf16.gmra.mrb[56].mxu1 %vm750_vm4, %v1862_v1 }
 0x2ae   :  { %5576 = vmatprep.mubr.msk.bf16.mxu1 %vm750_vm4, %v1863_v52 }
 0x2b5   :  { %5577 = vmatmul.mubr.msk.bf16.gmra.mrb[60].mxu1 %vm750_vm4, %v1864_v35 }
 0x2b6   :  { %5584 = vmatprep.mubr.msk.bf16.mxu1 %vm750_vm4, %v7744_v17 }
 0x2bd   :  { %5585 = vmatmul.mubr.msk.bf16.vlgmr.msra.gmra.mrb[48].mxu1 %vm750_vm4, %v7745_v60 }
 0x2be   :  { %5588 = vmatprep.mubr.msk.bf16.mxu1 %vm750_vm4, %v7746_v48  ;;  %5601 = vmatpush3.bf16.msra.mxu1 %v6184_v13 }
 0x2bf   :  { %5602 = vmatprep.subr.bf16.mxu1 %v6185_v34 }
 0x2c2   :  { %5603 = vmatpush3.bf16.msra.mxu1 %v6185_v34 }
 0x2c3   :  { %5620 = vmatprep.subr.bf16.mxu1 %v6186_v2 }
 0x2c5   :  { %5589 = vmatmul.mubr.msk.bf16.gmra.mrb[52].mxu1 %vm750_vm4, %v2038_v57 }
 0x2c6   :  { %5592 = vmatprep.mubr.msk.bf16.mxu1 %vm750_vm4, %v7747_v37 }
 0x2cd   :  { %5593 = vmatmul.mubr.msk.bf16.gmra.mrb[56].mxu1 %vm750_vm4, %v7748_v59 }
 0x2ce   :  { %5596 = vmatprep.mubr.msk.bf16.mxu1 %vm750_vm4, %v7749_v62 }
 0x2d5   :  { %5597 = vmatmul.mubr.msk.bf16.gmra.mrb[60].mxu1 %vm750_vm4, %v2042_v44 }
 0x2d6   :  { %5604 = vmatprep.mubr.msk.bf16.mxu1 %vm750_vm4, %v7750_v51 }
 0x2dd   :  { %5605 = vmatmul.mubr.msk.bf16.vlgmr.msra.gmra.mrb[48].mxu1 %vm750_vm4, %v7751_v16 }
 0x2de   :  { %5608 = vmatprep.mubr.msk.bf16.mxu1 %vm750_vm4, %v7752_v6  ;;  %5621 = vmatpush3.bf16.msra.mxu1 %v6186_v2 }
 0x2df   :  { %5622 = vmatprep.subr.bf16.mxu1 %v6187_v30 }
 0x2e2   :  { %5623 = vmatpush3.bf16.msra.mxu1 %v6187_v30 }
 0x2e3   :  { %5640 = vmatprep.subr.bf16.mxu1 %v6188_v14 }
 0x2e5   :  { %5609 = vmatmul.mubr.msk.bf16.gmra.mrb[52].mxu1 %vm750_vm4, %v2216_v36  ;;  %v6193_v36 = vld [vmem:[%s7733_s6 + $0x8] sm:$0xff]  }
 0x2e6   :  { %5612 = vmatprep.mubr.msk.bf16.mxu1 %vm750_vm4, %v7753_v56 }
 0x2ed   :  { %5613 = vmatmul.mubr.msk.bf16.gmra.mrb[56].mxu1 %vm750_vm4, %v7754_v54  ;;  %v6194_v54 = vld [vmem:[%s7733_s6 + $0x10] sm:$0xff]  }
 0x2ee   :  { %5616 = vmatprep.mubr.msk.bf16.mxu1 %vm750_vm4, %v7755_v9 }
 0x2f5   :  { %5617 = vmatmul.mubr.msk.bf16.gmra.mrb[60].mxu1 %vm750_vm4, %v2220_v61 }
 0x2f6   :  { %5624 = vmatprep.mubr.msk.bf16.mxu1 %vm750_vm4, %v6987_v58 }
 0x2fd   :  { %5625 = vmatmul.mubr.msk.bf16.vlgmr.msra.gmra.mrb[48].mxu1 %vm750_vm4, %v6993_v29 }
 0x2fe   :  { %5628 = vmatprep.mubr.msk.bf16.mxu1 %vm750_vm4, %v7008_v26  ;;  %5641 = vmatpush3.bf16.msra.mxu1 %v6188_v14 }
 0x2ff   :  { %5642 = vmatprep.subr.bf16.mxu1 %v6189_v31 }
 0x302   :  { %5643 = vmatpush3.bf16.msra.mxu1 %v6189_v31 }
 0x303   :  { %5660 = vmatprep.subr.bf16.mxu1 %v6190_v21 }
 0x305   :  { %5629 = vmatmul.mubr.msk.bf16.gmra.mrb[52].mxu1 %vm750_vm4, %v2395_v7 }
 0x306   :  { %5632 = vmatprep.mubr.msk.bf16.mxu1 %vm750_vm4, %v7014_v46 }
 0x30d   :  { %5633 = vmatmul.mubr.msk.bf16.gmra.mrb[56].mxu1 %vm750_vm4, %v7016_v27 }
 0x30e   :  { %5636 = vmatprep.mubr.msk.bf16.mxu1 %vm750_vm4, %v7022_v25  ;;  %v2561_v25 = vld [vmem:[#allocation2 + $0x91] sm:$0xff] }
 0x30f   :  { %v2573_v27 = vpack.c.bf16 %v2561_v25, %v2026_v15 }
 0x315   :  { %5637 = vmatmul.mubr.msk.bf16.gmra.mrb[60].mxu1 %vm750_vm4, %v2399_v45 }
 0x316   :  { %5644 = vmatprep.mubr.msk.bf16.mxu1 %vm750_vm4, %v6839_v40  ;;  %v2569_v40 = vld [vmem:[#allocation2 + $0x131] sm:$0xff] }
 0x31d   :  { %5645 = vmatmul.mubr.msk.bf16.vlgmr.msra.gmra.mrb[48].mxu1 %vm750_vm4, %v6869_v63  ;;  %v2577_v63 = vpack.c.bf16 %v2569_v40, %v2034_v19 }
 0x31e   :  { %5648 = vmatprep.mubr.msk.bf16.mxu1 %vm750_vm4, %v6892_v39  ;;  %5661 = vmatpush3.bf16.msra.mxu1 %v6190_v21  ;;  %v2739_v39 = vld [vmem:[#allocation2 + $0x92] sm:$0xff] }
 0x31f   :  { %5662 = vmatprep.subr.bf16.mxu1 %v6191_v47 }
 0x322   :  { %5663 = vmatpush3.bf16.msra.mxu1 %v6191_v47 }
 0x325   :  { %5649 = vmatmul.mubr.msk.bf16.gmra.mrb[52].mxu1 %vm750_vm4, %v2573_v27 }
 0x326   :  { %5652 = vmatprep.mubr.msk.bf16.mxu1 %vm750_vm4, %v6926_v33  ;;  %v2751_v33 = vpack.c.bf16 %v2739_v39, %v2204_v20 }
 0x32d   :  { %5653 = vmatmul.mubr.msk.bf16.gmra.mrb[56].mxu1 %vm750_vm4, %v6948_v42  ;;  %v7756_v42 = vld [vmem:[#allocation5_spill] sm:$0xff] }
 0x32e   :  { %5656 = vmatprep.mubr.msk.bf16.mxu1 %vm750_vm4, %v6972_v49 }
 0x335   :  { %5657 = vmatmul.mubr.msk.bf16.gmra.mrb[60].mxu1 %vm750_vm4, %v2577_v63  ;;  %v6195_v63 = vld [vmem:[%s7733_s6 + $0x18] sm:$0xff]  }
 0x336   :  { %5664 = vmatprep.mubr.msk.bf16.mxu1 %vm750_vm4, %v7030_v23  ;;  %v2747_v23 = vld [vmem:[#allocation2 + $0x132] sm:$0xff] }
 0x337   :  { %v2755_v49 = vpack.c.bf16 %v2747_v23, %v2212_v38  ;;  %v6197_v23 = vld [vmem:[%s7733_s6 + $0x8] sm:$0xff]  }
 0x33d   :  { %5665 = vmatmul.mubr.msk.bf16.vlgmr.msra.gmra.mrb[48].mxu1 %vm750_vm4, %v7037_v22  ;;  %v6192_v22 = vld [vmem:[%s7733_s6] sm:$0xff]  }
 0x33e   :  { %5668 = vmatprep.mubr.msk.bf16.mxu1 %vm750_vm4, %v7050_v11  ;;  %5688 = vmatprep.mubr.msk.bf16.mxu0 %vm937_vm3, %v6192_v22  ;;  %v7221_v11 = vld [vmem:[%s7734_s4] ss:$0 sm:$0xff]  ;;  %v6199_v22 = vld [vmem:[%s7733_s6 + $0x18] sm:$0xff]  }
 0x345   :  { %5669 = vmatmul.mubr.msk.bf16.gmra.mrb[52].mxu1 %vm750_vm4, %v2751_v33  ;;  %v6196_v33 = vld [vmem:[%s7733_s6] sm:$0xff]  }
 0x346   :  { %5672 = vmatprep.mubr.msk.bf16.mxu1 %vm750_vm4, %v7058_v18 }
 0x34d   :  { %5673 = vmatmul.mubr.msk.bf16.gmra.mrb[56].mxu1 %vm750_vm4, %v7756_v42 }
 0x34e   :  { %5676 = vmatprep.mubr.msk.bf16.mxu1 %vm750_vm4, %v7072_v24 }
 0x355   :  { %5677 = vmatmul.mubr.msk.bf16.gmra.mrb[60].mxu1 %vm750_vm4, %v2755_v49  ;;  %v6198_v49 = vld [vmem:[%s7733_s6 + $0x10] sm:$0xff]  }
 0x410   :  { %v5666_v58 = vpop.f32.mrb[48].mxu1 }
 0x411   :  { %v2919_v29 = vadd.f32 %v5666_v58, %v7221_v11  ;;  %v2831_v26 = vpop.f32.mrb[49].mxu1  ;;  %v6277_v58 = vmov 0.0  }
 0x412   :  { %v2917_v5 = vadd.f32 %v7221_v11, %v2831_v26  ;;  %v5667_v12 = vpop.f32.mrb[50].mxu1  ;;  %5904 = vmatprep.subr.bf16.mxu1 %v6277_v58  ;;  %v6202_v26 = vld [vmem:[%s7735_s7 + $0x10] sm:$0xff]   ;;  %5920 = vmatprep.mubr.msk.bf16.mxu1 %vm6278_vm5, %v6277_v58 }
 0x413   :  { %v2920_v46 = vadd.f32 %v5667_v12, %v7221_v11  ;;  %v2834_v10 = vpop.f32.mrb[51].mxu1  ;;  %v2935_v41 = vmax.f32 %v2919_v29, 0.0  ;;  %v6201_v29 = vld [vmem:[%s7735_s7 + $0x8] sm:$0xff]  }
 0x414   :  { %v2918_v43 = vadd.f32 %v7221_v11, %v2834_v10  ;;  %v2933_v18 = vmax.f32 %v2917_v5, 0.0  ;;  %v6203_v5 = vld [vmem:[%s7735_s7 + $0x18] sm:$0xff]  }
 0x415   :  { %v2936_v50 = vmax.f32 %v2920_v46, 0.0 }
 0x416   :  { %v2934_v4 = vmax.f32 %v2918_v43, 0.0 }
 0x417   :  { %v2958_v24 = vpack.c.bf16 %v2936_v50, %v2935_v41 }
 0x418   :  { %v2957_v32 = vpack.c.bf16 %v2934_v4, %v2933_v18  ;;  %v5670_v13 = vpop.f32.mrb[52].mxu1 }
 0x419   :  { %v2923_v55 = vadd.f32 %v5670_v13, %v7221_v11  ;;  %v2847_v8 = vpop.f32.mrb[53].mxu1 }
 0x41a   :  { %v2921_v28 = vadd.f32 %v7221_v11, %v2847_v8  ;;  %v5671_v1 = vpop.f32.mrb[54].mxu1  ;;  %5680 = vmatprep.subr.bf16.mxu0 %v2957_v32 }
 0x41b   :  { %v2924_v52 = vadd.f32 %v5671_v1, %v7221_v11  ;;  %v2850_v3 = vpop.f32.mrb[55].mxu1  ;;  %5681 = vmatpush3.bf16.msra.mxu0 %v2957_v32  ;;  %v2939_v17 = vmax.f32 %v2923_v55, 0.0 }
 0x41c   :  { %v2922_v35 = vadd.f32 %v7221_v11, %v2850_v3  ;;  %5682 = vmatprep.subr.bf16.mxu0 %v2958_v24  ;;  %v2937_v60 = vmax.f32 %v2921_v28, 0.0 }
 0x41d   :  { %v2940_v34 = vmax.f32 %v2924_v52, 0.0 }
 0x41e   :  { %v2938_v48 = vmax.f32 %v2922_v35, 0.0 }
 0x41f   :  { %v2960_v2 = vpack.c.bf16 %v2940_v34, %v2939_v17  ;;  %5683 = vmatpush3.bf16.msra.mxu0 %v2958_v24 }
 0x420   :  { %v2959_v15 = vpack.c.bf16 %v2938_v48, %v2937_v60  ;;  %v5674_v57 = vpop.f32.mrb[56].mxu1 }
 0x421   :  { %v2927_v37 = vadd.f32 %v5674_v57, %v7221_v11  ;;  %v2863_v59 = vpop.f32.mrb[57].mxu1 }
 0x422   :  { %v2925_v62 = vadd.f32 %v7221_v11, %v2863_v59  ;;  %v5675_v19 = vpop.f32.mrb[58].mxu1  ;;  %5684 = vmatprep.subr.bf16.mxu0 %v2959_v15 }
 0x423   :  { %v2928_v44 = vadd.f32 %v5675_v19, %v7221_v11  ;;  %v2866_v51 = vpop.f32.mrb[59].mxu1  ;;  %5685 = vmatpush3.bf16.msra.mxu0 %v2959_v15  ;;  %v2943_v16 = vmax.f32 %v2927_v37, 0.0 }
 0x424   :  { %v2926_v30 = vadd.f32 %v7221_v11, %v2866_v51  ;;  %5686 = vmatprep.subr.bf16.mxu0 %v2960_v2  ;;  %v2941_v14 = vmax.f32 %v2925_v62, 0.0 }
 0x425   :  { %v2944_v6 = vmax.f32 %v2928_v44, 0.0 }
 0x426   :  { %v2942_v20 = vmax.f32 %v2926_v30, 0.0 }
 0x427   :  { %v3083_v56 = vpack.c.bf16 %v2944_v6, %v2943_v16  ;;  %5687 = vmatpush3.bf16.msra.mxu0 %v2960_v2 }
 0x428   :  { %v3082_v9 = vpack.c.bf16 %v2942_v20, %v2941_v14  ;;  %v5678_v38 = vpop.f32.mrb[60].mxu1 }
 0x429   :  { %v2931_v61 = vadd.f32 %v5678_v38, %v7221_v11  ;;  %v2879_v31 = vpop.f32.mrb[61].mxu1 }
 0x42a   :  { %v2929_v21 = vadd.f32 %v7221_v11, %v2879_v31  ;;  %v5679_v0 = vpop.f32.mrb[62].mxu1  ;;  %5689 = vmatmul.mubr.msk.bf16.vlgmr.msra.gmra.mrb[56].mxu0 %vm937_vm3, %v6193_v36  ;;  %5696 = vmatprep.subr.bf16.mxu0 %v3082_v9 }
 0x42b   :  { %v2932_v7 = vadd.f32 %v5679_v0, %v7221_v11  ;;  %v2882_v53 = vpop.f32.mrb[63].mxu1  ;;  %5697 = vmatpush3.bf16.msra.mxu0 %v3082_v9  ;;  %5692 = vmatprep.mubr.msk.bf16.mxu0 %vm937_vm3, %v6194_v54  ;;  %v2947_v47 = vmax.f32 %v2931_v61, 0.0 }
 0x42c   :  { %v2930_v45 = vadd.f32 %v7221_v11, %v2882_v53  ;;  %5698 = vmatprep.subr.bf16.mxu0 %v3083_v56  ;;  %v2945_v27 = vmax.f32 %v2929_v21, 0.0  ;;  %v6200_v11 = vld [vmem:[%s7735_s7] sm:$0xff]  }
 0x42d   :  { %v2948_v25 = vmax.f32 %v2932_v7, 0.0 }
 0x42e   :  { %v2946_v40 = vmax.f32 %v2930_v45, 0.0 }
 0x42f   :  { %v3085_v39 = vpack.c.bf16 %v2948_v25, %v2947_v47  ;;  %5699 = vmatpush3.bf16.msra.mxu0 %v3083_v56 }
 0x430   :  { %v3084_v42 = vpack.c.bf16 %v2946_v40, %v2945_v27 }
 0x432   :  { %5693 = vmatmul.mubr.msk.bf16.gmra.mrb[60].mxu0 %vm937_vm3, %v6195_v63  ;;  %5700 = vmatprep.subr.bf16.mxu0 %v3084_v42 }
 0x433   :  { %5701 = vmatpush3.bf16.msra.mxu0 %v3084_v42  ;;  %5704 = vmatprep.mubr.msk.bf16.mxu0 %vm937_vm3, %v6196_v33 }
 0x434   :  { %5702 = vmatprep.subr.bf16.mxu0 %v3085_v39 }
 0x437   :  { %5703 = vmatpush3.bf16.msra.mxu0 %v3085_v39 }
 0x438   :  { %5712 = vmatprep.subr.bf16.mxu0 %v6277_v58 }
 0x43a   :  { %5705 = vmatmul.mubr.msk.bf16.vlgmr.msra.gmra.mrb[64].mxu0 %vm937_vm3, %v6197_v23 }
 0x43b   :  { %5708 = vmatprep.mubr.msk.bf16.mxu0 %vm937_vm3, %v6198_v49  ;;  %5713 = vmatpush3.bf16.msra.mxu0 %v6200_v11 }
 0x43c   :  { %5714 = vmatprep.subr.bf16.mxu0 %v6277_v58 }
 0x43f   :  { %5715 = vmatpush3.bf16.msra.mxu0 %v6201_v29 }
 0x440   :  { %5716 = vmatprep.subr.bf16.mxu0 %v6277_v58 }
 0x442   :  { %5709 = vmatmul.mubr.msk.bf16.gmra.mrb[68].mxu0 %vm937_vm3, %v6199_v22 }
 0x443   :  { %5717 = vmatpush3.bf16.msra.mxu0 %v6202_v26  ;;  %5720 = vmatprep.mubr.msk.bf16.mxu0 %vm6278_vm5, %v6277_v58  ;;  %v6204_v26 = vld [vmem:[%s7735_s7 + $0x20] sm:$0xff]  }
 0x444   :  { %5718 = vmatprep.subr.bf16.mxu0 %v6277_v58 }
 0x447   :  { %5719 = vmatpush3.bf16.msra.mxu0 %v6203_v5 }
 0x448   :  { %5724 = vmatprep.subr.bf16.mxu0 %v6277_v58 }
 0x4fd   :  { %v5690_v12 = vpop.f32.mrb[56].mxu0 }
 0x4fe   :  { %v3027_v46 = vpop.f32.mrb[57].mxu0  ;;  %v3059_v50 = vsel %vm937_vm3, %v5690_v12, -inf }
 0x4ff   :  { %v5691_v10 = vpop.f32.mrb[58].mxu0  ;;  %v3058_v24 = vsel %vm937_vm3, %v3027_v46, -inf }
 0x500   :  { %v3030_v43 = vpop.f32.mrb[59].mxu0  ;;  %v3066_v8 = vsel %vm937_vm3, %v5691_v10, -inf }
 0x501   :  { %v3065_v3 = vsel %vm937_vm3, %v3030_v43, -inf }
 0x505   :  { %v5694_v41 = vpop.f32.mrb[60].mxu0 }
 0x506   :  { %v3062_v18 = vsel %vm937_vm3, %v5694_v41, -inf  ;;  %v3043_v4 = vpop.f32.mrb[61].mxu0 }
 0x507   :  { %v3063_v32 = vmax.f32 %v3059_v50, %v3062_v18  ;;  %v3060_v13 = vsel %vm937_vm3, %v3043_v4, -inf  ;;  %v5695_v55 = vpop.f32.mrb[62].mxu0 }
 0x508   :  { %v3061_v28 = vmax.f32 %v3058_v24, %v3060_v13  ;;  %v3069_v1 = vsel %vm937_vm3, %v5695_v55, -inf  ;;  %v3046_v52 = vpop.f32.mrb[63].mxu0 }
 0x509   :  { %v3070_v35 = vmax.f32 %v3066_v8, %v3069_v1  ;;  %v3067_v17 = vsel %vm937_vm3, %v3046_v52, -inf }
 0x50a   :  { %v3064_v34 = vmax.f32 %v3061_v28, %v3063_v32  ;;  %v3068_v60 = vmax.f32 %v3065_v3, %v3067_v17  ;;  %v6205_v32 = vld [vmem:[%s7735_s7 + $0x28] sm:$0xff]   ;;  %v6206_v17 = vld [vmem:[%s7735_s7 + $0x30] sm:$0xff]  }
 0x50c   :  { %3072 = vst.msk [vmem:[#allocation3] sm:$0xff] %vm937_vm3, %v3064_v34  ;;  %v3071_v48 = vmax.f32 %v3068_v60, %v3070_v35 }
 0x50d   :  { %v5706_v2 = vpop.f32.mrb[64].mxu0 }
 0x50e   :  { %3073 = vst.msk [vmem:[#allocation3 + $0x8] sm:$0xff] %vm937_vm3, %v3071_v48  ;;  %v3152_v15 = vpop.f32.mrb[65].mxu0  ;;  %v3184_v62 = vsel %vm937_vm3, %v5706_v2, -inf }
 0x50f   :  { %v5707_v57 = vpop.f32.mrb[66].mxu0  ;;  %v3183_v51 = vsel %vm937_vm3, %v3152_v15, -inf  ;;  %v6207_v15 = vld [vmem:[%s7735_s7 + $0x38] sm:$0xff]  }
 0x510   :  { %v3155_v37 = vpop.f32.mrb[67].mxu0  ;;  %v3191_v36 = vsel %vm937_vm3, %v5707_v57, -inf }
 0x511   :  { %v3190_v56 = vsel %vm937_vm3, %v3155_v37, -inf }
 0x513   :  { %v3200_v0 = vld [vmem:[#allocation3] sm:$0xff] }
 0x514   :  { %v3211_v7 = vpack.c.bf16 %v3200_v0, %v3200_v0  ;;  %v6217_v0 = vld [vmem:[%s7735_s7 + $0x88] sm:$0xff]  }
 0x515   :  { %v5710_v59 = vpop.f32.mrb[68].mxu0  ;;  %v3201_v53 = vld [vmem:[#allocation3 + $0x8] sm:$0xff] }
 0x516   :  { %v3187_v19 = vsel %vm937_vm3, %v5710_v59, -inf  ;;  %v3168_v44 = vpop.f32.mrb[69].mxu0  ;;  %v3863_v47 = vpack.c.bf16 %v3201_v53, %v3201_v53  ;;  %v7309_v27 = vunpack.c.l.b16 %v3211_v7  ;;  %v6208_v59 = vld [vmem:[%s7735_s7 + $0x40] sm:$0xff]   ;;  %v6218_v7 = vld [vmem:[%s7735_s7 + $0x90] sm:$0xff]   ;;  %v6219_v53 = vld [vmem:[%s7735_s7 + $0x98] sm:$0xff]  }
 0x517   :  { %v3188_v30 = vmax.f32 %v3184_v62, %v3187_v19  ;;  %v3185_v16 = vsel %vm937_vm3, %v3168_v44, -inf  ;;  %v5711_v6 = vpop.f32.mrb[70].mxu0  ;;  %v6209_v19 = vld [vmem:[%s7735_s7 + $0x48] sm:$0xff]   ;;  %v6210_v44 = vld [vmem:[%s7735_s7 + $0x50] sm:$0xff]  }
 0x518   :  { %v3186_v14 = vmax.f32 %v3183_v51, %v3185_v16  ;;  %v3171_v20 = vpop.f32.mrb[71].mxu0  ;;  %v3194_v54 = vsel %vm937_vm3, %v5711_v6, -inf  ;;  %v7313_v33 = vunpack.c.l.b16 %v3863_v47  ;;  %v3548_v23 = vrot.slane %v7309_v27, 4 }
 0x519   :  { %v3192_v9 = vsel %vm937_vm3, %v3171_v20, -inf  ;;  %v3195_v61 = vmax.f32 %v3191_v36, %v3194_v54  ;;  %v3629_v22 = vrot.slane %v7309_v27, 5  ;;  %v3710_v5 = vrot.slane %v7309_v27, 6  ;;  %v6213_v36 = vld [vmem:[%s7735_s7 + $0x68] sm:$0xff]  }
 0x51a   :  { %v3189_v38 = vmax.f32 %v3186_v14, %v3188_v30  ;;  %v3193_v31 = vmax.f32 %v3190_v56, %v3192_v9  ;;  %v3791_v50 = vrot.slane %v7309_v27, 7  ;;  %v4200_v13 = vrot.slane %v7313_v33, 4  ;;  %v6211_v30 = vld [vmem:[%s7735_s7 + $0x58] sm:$0xff]   ;;  %v6212_v14 = vld [vmem:[%s7735_s7 + $0x60] sm:$0xff]   ;;  %v6214_v56 = vld [vmem:[%s7735_s7 + $0x70] sm:$0xff]  }
 0x51b   :  { %v4281_v8 = vrot.slane %v7313_v33, 5  ;;  %v4362_v1 = vrot.slane %v7313_v33, 6  ;;  %v4443_v60 = vrot.slane %v7313_v33, 7  ;;  %v3306_v57 = vrot.slane %v7309_v27, 1  ;;  %v6215_v9 = vld [vmem:[%s7735_s7 + $0x78] sm:$0xff]  }
 0x51c   :  { %3198 = vst.msk [vmem:[#allocation3 + $0x10] sm:$0xff] %vm937_vm3, %v3189_v38  ;;  %v3196_v21 = vmax.f32 %v3193_v31, %v3195_v61  ;;  %v3386_v16 = vrot.slane %v7309_v27, 2  ;;  %v3467_v38 = vrot.slane %v7309_v27, 3  ;;  %v6216_v31 = vld [vmem:[%s7735_s7 + $0x80] sm:$0xff]  }
 0x51e   :  { %3199 = vst.msk [vmem:[#allocation3 + $0x18] sm:$0xff] %vm937_vm3, %v3196_v21 }
 0x523   :  { %v3202_v45 = vld [vmem:[#allocation3 + $0x10] sm:$0xff] }
 0x524   :  { %v3212_v25 = vpack.c.bf16 %v3202_v45, %v3202_v45  ;;  %v6220_v45 = vld [vmem:[%s7735_s7 + $0xa0] sm:$0xff]  }
 0x525   :  { %v3203_v40 = vld [vmem:[#allocation3 + $0x18] sm:$0xff] }
 0x526   :  { %v7311_v63 = vunpack.c.l.b16 %v3212_v25  ;;  %v3864_v39 = vpack.c.bf16 %v3203_v40, %v3203_v40  ;;  %v6221_v25 = vld [vmem:[%s7735_s7 + $0xa8] sm:$0xff]   ;;  %v6223_v40 = vld [vmem:[%s7735_s7 + $0xb8] sm:$0xff]  }
 0x528   :  { %v3225_v42 = vrot.slane %v7311_v63, 7  ;;  %v3549_v49 = vrot.slane %v7311_v63, 3  ;;  %v3630_v11 = vrot.slane %v7311_v63, 4  ;;  %v3711_v12 = vrot.slane %v7311_v63, 5 }
 0x529   :  { %v3792_v46 = vrot.slane %v7311_v63, 6  ;;  %v7328_v43 = vunpack.c.l.b16 %v3864_v39  ;;  %v3307_v37 = vsel %vm3226_vm6, %v7311_v63, %v3306_v57  ;;  %v3387_v51 = vrot.slane %v7311_v63, 1 }
 0x52a   :  { %v3227_v29 = vsel %vm3226_vm6, %v3225_v42, %v7309_v27  ;;  %v7331_v41 = vsel %vm3226_vm6, %v3549_v49, %v3548_v23  ;;  %v7335_v18 = vsel %vm3226_vm6, %v3630_v11, %v3629_v22  ;;  %v7338_v4 = vsel %vm3226_vm6, %v3711_v12, %v3710_v5  ;;  %v6222_v27 = vld [vmem:[%s7735_s7 + $0xb0] sm:$0xff]   ;;  %v6225_v42 = vld [vmem:[%s7735_s7 + $0xc8] sm:$0xff]   ;;  %v6227_v49 = vld [vmem:[%s7735_s7 + $0xd8] sm:$0xff]  }
 0x52b   :  { %v3228_v10 = vpack.c.b16 %v3227_v29, %v3227_v29  ;;  %v7342_v24 = vsel %vm3226_vm6, %v3792_v46, %v3791_v50  ;;  %v4201_v55 = vrot.slane %v7328_v43, 3  ;;  %v4282_v28 = vrot.slane %v7328_v43, 4  ;;  %v6226_v23 = vld [vmem:[%s7735_s7 + $0xd0] sm:$0xff]   ;;  %v6228_v22 = vld [vmem:[%s7735_s7 + $0xe0] sm:$0xff]   ;;  %v6229_v29 = vld [vmem:[%s7735_s7 + $0xe8] sm:$0xff]  }
 0x52c   :  { %v4363_v52 = vrot.slane %v7328_v43, 5  ;;  %v4444_v48 = vrot.slane %v7328_v43, 6  ;;  %v3308_v62 = vpack.c.b16 %v3307_v37, %v3307_v37  ;;  %v3388_v6 = vsel %vm3226_vm6, %v3387_v51, %v3386_v16  ;;  %v6231_v5 = vld [vmem:[%s7735_s7 + $0xf8] sm:$0xff]   ;;  %v6232_v12 = vld [vmem:[%s7735_s7 + $0x100] sm:$0xff]   ;;  %v6265_v50 = vld [vmem:[%s7736_s9 + $0x8] sm:$0xff]  }
 0x52d   :  { %5721 = vmatmul.mubr.msk.bf16.vlgmr.msra.gmra.mrb[72].mxu0 %vm937_vm3, %v3228_v10  ;;  %v7357_v3 = vsel %vm3226_vm6, %v4201_v55, %v4200_v13  ;;  %v7360_v35 = vsel %vm3226_vm6, %v4282_v28, %v4281_v8  ;;  %v3389_v20 = vpack.c.b16 %v3388_v6, %v3388_v6  ;;  %v3468_v54 = vrot.slane %v7311_v63, 2  ;;  %v6224_v63 = vld [vmem:[%s7735_s7 + $0xc0] sm:$0xff]   ;;  %v6233_v10 = vld [vmem:[%s7735_s7 + $0x108] sm:$0xff]   ;;  %v6267_v55 = vld [vmem:[%s7736_s9 + $0x18] sm:$0xff]  }
 0x52e   :  { %5725 = vmatpush3.bf16.msra.mxu0 %v6204_v26  ;;  %5732 = vmatprep.mubr.msk.bf16.mxu0 %vm6278_vm5, %v6277_v58  ;;  %v7366_v34 = vsel %vm3226_vm6, %v4363_v52, %v4362_v1  ;;  %v7372_v2 = vsel %vm3226_vm6, %v4444_v48, %v4443_v60  ;;  %v3551_v47 = vpack.c.b16 %v7331_v41, %v7331_v41  ;;  %v6230_v26 = vld [vmem:[%s7735_s7 + $0xf0] sm:$0xff]   ;;  %v6264_v41 = vld [vmem:[%s7736_s9] sm:$0xff]   ;;  %v6237_v52 = vld [vmem:[%s7735_s7 + $0x128] sm:$0xff]  }
 0x52f   :  { %5726 = vmatprep.subr.bf16.mxu0 %v6277_v58  ;;  %v3469_v61 = vsel %vm3226_vm6, %v3468_v54, %v3467_v38  ;;  %v3632_v39 = vpack.c.b16 %v7335_v18, %v7335_v18  ;;  %v3713_v11 = vpack.c.b16 %v7338_v4, %v7338_v4  ;;  %v3794_v46 = vpack.c.b16 %v7342_v24, %v7342_v24  ;;  %v6234_v18 = vld [vmem:[%s7735_s7 + $0x110] sm:$0xff]   ;;  %v6236_v8 = vld [vmem:[%s7735_s7 + $0x120] sm:$0xff]   ;;  %v6239_v48 = vld [vmem:[%s7735_s7 + $0x138] sm:$0xff]  }
 0x530   :  { %v3470_v21 = vpack.c.b16 %v3469_v61, %v3469_v61  ;;  %5905 = vmatpush3.bf16.msra.mxu1 %v6264_v41  ;;  %v3878_v4 = vrot.slane %v7328_v43, 7  ;;  %v6266_v24 = vld [vmem:[%s7736_s9 + $0x10] sm:$0xff]   ;;  %v6268_v1 = vld [vmem:[%s7736_s9 + $0x20] sm:$0xff]   ;;  %v6243_v51 = vld [vmem:[%s7735_s7 + $0x158] sm:$0xff]  }
 0x531   :  { %5906 = vmatprep.subr.bf16.mxu1 %v6277_v58  ;;  %v6238_v60 = vld [vmem:[%s7735_s7 + $0x130] sm:$0xff]   ;;  %v6240_v37 = vld [vmem:[%s7735_s7 + $0x140] sm:$0xff]   ;;  %v6247_v54 = vld [vmem:[%s7735_s7 + $0x178] sm:$0xff]  }
 0x532   :  { %5727 = vmatpush3.bf16.msra.mxu0 %v6205_v32  ;;  %v6235_v32 = vld [vmem:[%s7735_s7 + $0x118] sm:$0xff]   ;;  %v3879_v13 = vsel %vm3226_vm6, %v3878_v4, %v7313_v33  ;;  %v6244_v6 = vld [vmem:[%s7735_s7 + $0x160] sm:$0xff]  }
 0x533   :  { %5728 = vmatprep.subr.bf16.mxu0 %v6277_v58  ;;  %v3880_v28 = vpack.c.b16 %v3879_v13, %v3879_v13  ;;  %v6248_v61 = vld [vmem:[%s7735_s7 + $0x180] sm:$0xff]  }
 0x534   :  { %5907 = vmatpush3.bf16.msra.mxu1 %v6265_v50  ;;  %v18_v50 = vstv %s7738_s12  ;;  %v5109_v4 = vld [vmem:[%s7739_s10] ss:$0 sm:$0xff] }
 0x535   :  { %5908 = vmatprep.subr.bf16.mxu1 %v6277_v58  ;;  %19 = vst [vmem:[#allocation4] sm:$0x1] %v18_v50 }
 0x536   :  { %5729 = vmatpush3.bf16.msra.mxu0 %v6206_v17  ;;  %v6269_v17 = vld [vmem:[%s7736_s9 + $0x28] sm:$0xff]  }
 0x537   :  { %5730 = vmatprep.subr.bf16.mxu0 %v6277_v58 }
 0x538   :  { %5909 = vmatpush3.bf16.msra.mxu1 %v6266_v24  ;;  %v4631_v24 = vld [vmem:[%s7740_s11] sm:$0x1] }
 0x539   :  { %5910 = vmatprep.subr.bf16.mxu1 %v6277_v58 }
 0x53a   :  { %5731 = vmatpush3.bf16.msra.mxu0 %v6207_v15  ;;  %v3958_v15 = vrot.slane %v7313_v33, 1 }
 0x53b   :  { %5736 = vmatprep.subr.bf16.mxu0 %v6277_v58 }
 0x53c   :  { %5911 = vmatpush3.bf16.msra.mxu1 %v6267_v55  ;;  %v3959_v57 = vsel %vm3226_vm6, %v7328_v43, %v3958_v15 }
 0x53d   :  { %5733 = vmatmul.mubr.msk.bf16.vlgmr.msra.gmra.mrb[72].mxu0 %vm937_vm3, %v3308_v62  ;;  %5912 = vmatprep.subr.bf16.mxu1 %v6277_v58  ;;  %v6241_v62 = vld [vmem:[%s7735_s7 + $0x148] sm:$0xff]  }
 0x53e   :  { %5737 = vmatpush3.bf16.msra.mxu0 %v6208_v59  ;;  %5744 = vmatprep.mubr.msk.bf16.mxu0 %vm6278_vm5, %v6277_v58  ;;  %v3960_v59 = vpack.c.b16 %v3959_v57, %v3959_v57 }
 0x53f   :  { %5738 = vmatprep.subr.bf16.mxu0 %v6277_v58 }
 0x540   :  { %5913 = vmatpush3.bf16.msra.mxu1 %v6268_v1 }
 0x541   :  { %5914 = vmatprep.subr.bf16.mxu1 %v6277_v58 }
 0x542   :  { %5739 = vmatpush3.bf16.msra.mxu0 %v6209_v19  ;;  %v6242_v19 = vld [vmem:[%s7735_s7 + $0x150] sm:$0xff]  }
 0x543   :  { %5740 = vmatprep.subr.bf16.mxu0 %v6277_v58 }
 0x544   :  { %5915 = vmatpush3.bf16.msra.mxu1 %v6269_v17 }
 0x545   :  { %5916 = vmatprep.subr.bf16.mxu1 %v6277_v58 }
 0x546   :  { %5741 = vmatpush3.bf16.msra.mxu0 %v6210_v44  ;;  %v4039_v44 = vrot.slane %v7328_v43, 1 }
 0x547   :  { %5742 = vmatprep.subr.bf16.mxu0 %v6277_v58 }
 0x54a   :  { %5743 = vmatpush3.bf16.msra.mxu0 %v6211_v30  ;;  %v4038_v30 = vrot.slane %v7313_v33, 2 }
 0x54b   :  { %5748 = vmatprep.subr.bf16.mxu0 %v6277_v58 }
 0x54c   :  { %v4040_v16 = vsel %vm3226_vm6, %v4039_v44, %v4038_v30 }
 0x54d   :  { %5745 = vmatmul.mubr.msk.bf16.vlgmr.msra.gmra.mrb[72].mxu0 %vm937_vm3, %v3389_v20  ;;  %v6245_v20 = vld [vmem:[%s7735_s7 + $0x168] sm:$0xff]  }
 0x54e   :  { %5749 = vmatpush3.bf16.msra.mxu0 %v6212_v14  ;;  %5756 = vmatprep.mubr.msk.bf16.mxu0 %vm6278_vm5, %v6277_v58  ;;  %v4041_v14 = vpack.c.b16 %v4040_v16, %v4040_v16 }
 0x54f   :  { %5750 = vmatprep.subr.bf16.mxu0 %v6277_v58 }
 0x552   :  { %5751 = vmatpush3.bf16.msra.mxu0 %v6213_v36  ;;  %v6246_v36 = vld [vmem:[%s7735_s7 + $0x170] sm:$0xff]  }
 0x553   :  { %5752 = vmatprep.subr.bf16.mxu0 %v6277_v58 }
 0x556   :  { %5753 = vmatpush3.bf16.msra.mxu0 %v6214_v56  ;;  %v4120_v56 = vrot.slane %v7328_v43, 2  ;;  %v6249_v43 = vld [vmem:[%s7735_s7 + $0x188] sm:$0xff]  }
 0x557   :  { %5754 = vmatprep.subr.bf16.mxu0 %v6277_v58 }
 0x55a   :  { %5755 = vmatpush3.bf16.msra.mxu0 %v6215_v9  ;;  %v4119_v9 = vrot.slane %v7313_v33, 3  ;;  %v6250_v33 = vld [vmem:[%s7735_s7 + $0x190] sm:$0xff]  }
 0x55b   :  { %5760 = vmatprep.subr.bf16.mxu0 %v6277_v58 }
 0x55c   :  { %v4121_v38 = vsel %vm3226_vm6, %v4120_v56, %v4119_v9 }
 0x55d   :  { %5757 = vmatmul.mubr.msk.bf16.vlgmr.msra.gmra.mrb[72].mxu0 %vm937_vm3, %v3470_v21  ;;  %v6251_v21 = vld [vmem:[%s7735_s7 + $0x198] sm:$0xff]  }
 0x55e   :  { %5761 = vmatpush3.bf16.msra.mxu0 %v6216_v31  ;;  %5768 = vmatprep.mubr.msk.bf16.mxu0 %vm6278_vm5, %v6277_v58  ;;  %v4122_v31 = vpack.c.b16 %v4121_v38, %v4121_v38 }
 0x55f   :  { %5762 = vmatprep.subr.bf16.mxu0 %v6277_v58 }
 0x562   :  { %5763 = vmatpush3.bf16.msra.mxu0 %v6217_v0  ;;  %v6252_v0 = vld [vmem:[%s7735_s7 + $0x1a0] sm:$0xff]  }
 0x563   :  { %5764 = vmatprep.subr.bf16.mxu0 %v6277_v58 }
 0x566   :  { %5765 = vmatpush3.bf16.msra.mxu0 %v6218_v7  ;;  %v4203_v7 = vpack.c.b16 %v7357_v3, %v7357_v3  ;;  %v6255_v3 = vld [vmem:[%s7735_s7 + $0x1b8] sm:$0xff]  }
 0x567   :  { %5766 = vmatprep.subr.bf16.mxu0 %v6277_v58 }
 0x56a   :  { %5767 = vmatpush3.bf16.msra.mxu0 %v6219_v53  ;;  %v6253_v53 = vld [vmem:[%s7735_s7 + $0x1a8] sm:$0xff]  }
 0x56b   :  { %5772 = vmatprep.subr.bf16.mxu0 %v6277_v58 }
 0x56d   :  { %5769 = vmatmul.mubr.msk.bf16.vlgmr.msra.gmra.mrb[72].mxu0 %vm937_vm3, %v3551_v47  ;;  %v6256_v47 = vld [vmem:[%s7735_s7 + $0x1c0] sm:$0xff]  }
 0x56e   :  { %5773 = vmatpush3.bf16.msra.mxu0 %v6220_v45  ;;  %5780 = vmatprep.mubr.msk.bf16.mxu0 %vm6278_vm5, %v6277_v58  ;;  %v6254_v45 = vld [vmem:[%s7735_s7 + $0x1b0] sm:$0xff]  }
 0x56f   :  { %5774 = vmatprep.subr.bf16.mxu0 %v6277_v58 }
 0x572   :  { %5775 = vmatpush3.bf16.msra.mxu0 %v6221_v25  ;;  %v4284_v25 = vpack.c.b16 %v7360_v35, %v7360_v35  ;;  %v6259_v35 = vld [vmem:[%s7735_s7 + $0x1d8] sm:$0xff]  }
 0x573   :  { %5776 = vmatprep.subr.bf16.mxu0 %v6277_v58 }
 0x576   :  { %5777 = vmatpush3.bf16.msra.mxu0 %v6222_v27  ;;  %v6257_v27 = vld [vmem:[%s7735_s7 + $0x1c8] sm:$0xff]  }
 0x577   :  { %5778 = vmatprep.subr.bf16.mxu0 %v6277_v58 }
 0x57a   :  { %5779 = vmatpush3.bf16.msra.mxu0 %v6223_v40  ;;  %v6258_v40 = vld [vmem:[%s7735_s7 + $0x1d0] sm:$0xff]  }
 0x57b   :  { %5784 = vmatprep.subr.bf16.mxu0 %v6277_v58 }
 0x57d   :  { %5781 = vmatmul.mubr.msk.bf16.vlgmr.msra.gmra.mrb[72].mxu0 %vm937_vm3, %v3632_v39  ;;  %v4365_v39 = vpack.c.b16 %v7366_v34, %v7366_v34  ;;  %v6263_v34 = vld [vmem:[%s7735_s7 + $0x1f8] sm:$0xff]  }
 0x57e   :  { %5785 = vmatpush3.bf16.msra.mxu0 %v6224_v63  ;;  %5792 = vmatprep.mubr.msk.bf16.mxu0 %vm6278_vm5, %v6277_v58  ;;  %v6260_v63 = vld [vmem:[%s7735_s7 + $0x1e0] sm:$0xff]  }
 0x57f   :  { %5786 = vmatprep.subr.bf16.mxu0 %v6277_v58 }
 0x582   :  { %5787 = vmatpush3.bf16.msra.mxu0 %v6225_v42  ;;  %v6261_v42 = vld [vmem:[%s7735_s7 + $0x1e8] sm:$0xff]  }
 0x583   :  { %5788 = vmatprep.subr.bf16.mxu0 %v6277_v58 }
 0x586   :  { %5789 = vmatpush3.bf16.msra.mxu0 %v6226_v23  ;;  %v6262_v23 = vld [vmem:[%s7735_s7 + $0x1f0] sm:$0xff]  }
 0x587   :  { %5790 = vmatprep.subr.bf16.mxu0 %v6277_v58 }
 0x58a   :  { %5791 = vmatpush3.bf16.msra.mxu0 %v6227_v49  ;;  %v4446_v49 = vpack.c.b16 %v7372_v2, %v7372_v2 }
 0x58b   :  { %5796 = vmatprep.subr.bf16.mxu0 %v6277_v58 }
 0x58d   :  { %5793 = vmatmul.mubr.msk.bf16.vlgmr.msra.gmra.mrb[72].mxu0 %vm937_vm3, %v3713_v11  ;;  %v6271_v11 = vld [vmem:[%s7736_s9 + $0x38] sm:$0xff]  }
 0x58e   :  { %5797 = vmatpush3.bf16.msra.mxu0 %v6228_v22  ;;  %5804 = vmatprep.mubr.msk.bf16.mxu0 %vm6278_vm5, %v6277_v58  ;;  %v6270_v22 = vld [vmem:[%s7736_s9 + $0x30] sm:$0xff]  }
 0x58f   :  { %5798 = vmatprep.subr.bf16.mxu0 %v6277_v58  ;;  %5917 = vmatpush3.bf16.msra.mxu1 %v6270_v22 }
 0x590   :  { %5918 = vmatprep.subr.bf16.mxu1 %v6277_v58 }
 0x592   :  { %5799 = vmatpush3.bf16.msra.mxu0 %v6229_v29  ;;  %v4908_v29 = vld [vmem:[%s7737_s8] ss:$0 sm:$0xff] }
 0x593   :  { %5800 = vmatprep.subr.bf16.mxu0 %v6277_v58  ;;  %5919 = vmatpush3.bf16.msra.mxu1 %v6271_v11 }
 0x596   :  { %5801 = vmatpush3.bf16.msra.mxu0 %v6230_v26 }
 0x597   :  { %5802 = vmatprep.subr.bf16.mxu0 %v6277_v58 }
 0x59a   :  { %5803 = vmatpush3.bf16.msra.mxu0 %v6231_v5 }
 0x59b   :  { %5808 = vmatprep.subr.bf16.mxu0 %v6277_v58 }
 0x59d   :  { %5805 = vmatmul.mubr.msk.bf16.vlgmr.msra.gmra.mrb[72].mxu0 %vm937_vm3, %v3794_v46 }
 0x59e   :  { %5809 = vmatpush3.bf16.msra.mxu0 %v6232_v12  ;;  %5816 = vmatprep.mubr.msk.bf16.mxu0 %vm6278_vm5, %v6277_v58 }
 0x59f   :  { %5810 = vmatprep.subr.bf16.mxu0 %v6277_v58 }
 0x5a2   :  { %5811 = vmatpush3.bf16.msra.mxu0 %v6233_v10 }
 0x5a3   :  { %5812 = vmatprep.subr.bf16.mxu0 %v6277_v58 }
 0x5a6   :  { %5813 = vmatpush3.bf16.msra.mxu0 %v6234_v18  ;;  %v4633_v18 = vlaneseq }
 0x5a7   :  { %5814 = vmatprep.subr.bf16.mxu0 %v6277_v58 }
 0x5aa   :  { %5815 = vmatpush3.bf16.msra.mxu0 %v6235_v32 }
 0x5ab   :  { %5820 = vmatprep.subr.bf16.mxu0 %v6277_v58 }
 0x5ad   :  { %5817 = vmatmul.mubr.msk.bf16.vlgmr.msra.gmra.mrb[72].mxu0 %vm937_vm3, %v3880_v28 }
 0x5ae   :  { %5821 = vmatpush3.bf16.msra.mxu0 %v6236_v8  ;;  %5828 = vmatprep.mubr.msk.bf16.mxu0 %vm6278_vm5, %v6277_v58  ;;  %v4632_v8 = vunpack.c.l.bf16 %v4631_v24 }
 0x5af   :  { %5822 = vmatprep.subr.bf16.mxu0 %v6277_v58 }
 0x5b2   :  { %5823 = vmatpush3.bf16.msra.mxu0 %v6237_v52 }
 0x5b3   :  { %5824 = vmatprep.subr.bf16.mxu0 %v6277_v58 }
 0x5b6   :  { %5825 = vmatpush3.bf16.msra.mxu0 %v6238_v60 }
 0x5b7   :  { %5826 = vmatprep.subr.bf16.mxu0 %v6277_v58 }
 0x5ba   :  { %5827 = vmatpush3.bf16.msra.mxu0 %v6239_v48 }
 0x5bb   :  { %5832 = vmatprep.subr.bf16.mxu0 %v6277_v58 }
 0x5bd   :  { %5829 = vmatmul.mubr.msk.bf16.vlgmr.msra.gmra.mrb[72].mxu0 %vm937_vm3, %v3960_v59  ;;  %v5118_v59 = vld [vmem:[#allocation4] ss:$0 sm:$0xff] }
 0x5be   :  { %5833 = vmatpush3.bf16.msra.mxu0 %v6240_v37  ;;  %5840 = vmatprep.mubr.msk.bf16.mxu0 %vm6278_vm5, %v6277_v58 }
 0x5bf   :  { %5834 = vmatprep.subr.bf16.mxu0 %v6277_v58 }
 0x5c2   :  { %5835 = vmatpush3.bf16.msra.mxu0 %v6241_v62 }
 0x5c3   :  { %5836 = vmatprep.subr.bf16.mxu0 %v6277_v58 }
 0x5c6   :  { %5837 = vmatpush3.bf16.msra.mxu0 %v6242_v19 }
 0x5c7   :  { %5838 = vmatprep.subr.bf16.mxu0 %v6277_v58 }
 0x5ca   :  { %5839 = vmatpush3.bf16.msra.mxu0 %v6243_v51 }
 0x5cb   :  { %5844 = vmatprep.subr.bf16.mxu0 %v6277_v58 }
 0x5cd   :  { %5841 = vmatmul.mubr.msk.bf16.vlgmr.msra.gmra.mrb[72].mxu0 %vm937_vm3, %v4041_v14 }
 0x5ce   :  { %5845 = vmatpush3.bf16.msra.mxu0 %v6244_v6  ;;  %5852 = vmatprep.mubr.msk.bf16.mxu0 %vm6278_vm5, %v6277_v58 }
 0x5cf   :  { %5846 = vmatprep.subr.bf16.mxu0 %v6277_v58 }
 0x5d2   :  { %5847 = vmatpush3.bf16.msra.mxu0 %v6245_v20 }
 0x5d3   :  { %5848 = vmatprep.subr.bf16.mxu0 %v6277_v58 }
 0x5d6   :  { %5849 = vmatpush3.bf16.msra.mxu0 %v6246_v36 }
 0x5d7   :  { %5850 = vmatprep.subr.bf16.mxu0 %v6277_v58 }
 0x5da   :  { %5851 = vmatpush3.bf16.msra.mxu0 %v6247_v54 }
 0x5db   :  { %5856 = vmatprep.subr.bf16.mxu0 %v6277_v58 }
 0x5dd   :  { %5853 = vmatmul.mubr.msk.bf16.vlgmr.msra.gmra.mrb[72].mxu0 %vm937_vm3, %v4122_v31 }
 0x5de   :  { %5857 = vmatpush3.bf16.msra.mxu0 %v6248_v61  ;;  %5864 = vmatprep.mubr.msk.bf16.mxu0 %vm6278_vm5, %v6277_v58 }
 0x5df   :  { %5858 = vmatprep.subr.bf16.mxu0 %v6277_v58 }
 0x5e2   :  { %5859 = vmatpush3.bf16.msra.mxu0 %v6249_v43 }
 0x5e3   :  { %5860 = vmatprep.subr.bf16.mxu0 %v6277_v58 }
 0x5e6   :  { %5861 = vmatpush3.bf16.msra.mxu0 %v6250_v33 }
 0x5e7   :  { %5862 = vmatprep.subr.bf16.mxu0 %v6277_v58 }
 0x5ea   :  { %5863 = vmatpush3.bf16.msra.mxu0 %v6251_v21 }
 0x5eb   :  { %5868 = vmatprep.subr.bf16.mxu0 %v6277_v58 }
 0x5ed   :  { %5865 = vmatmul.mubr.msk.bf16.vlgmr.msra.gmra.mrb[72].mxu0 %vm937_vm3, %v4203_v7 }
 0x5ee   :  { %5869 = vmatpush3.bf16.msra.mxu0 %v6252_v0  ;;  %5876 = vmatprep.mubr.msk.bf16.mxu0 %vm6278_vm5, %v6277_v58 }
 0x5ef   :  { %5870 = vmatprep.subr.bf16.mxu0 %v6277_v58 }
 0x5f2   :  { %5871 = vmatpush3.bf16.msra.mxu0 %v6253_v53 }
 0x5f3   :  { %5872 = vmatprep.subr.bf16.mxu0 %v6277_v58 }
 0x5f6   :  { %5873 = vmatpush3.bf16.msra.mxu0 %v6254_v45 }
 0x5f7   :  { %5874 = vmatprep.subr.bf16.mxu0 %v6277_v58 }
 0x5fa   :  { %5875 = vmatpush3.bf16.msra.mxu0 %v6255_v3 }
 0x5fb   :  { %5880 = vmatprep.subr.bf16.mxu0 %v6277_v58 }
 0x5fd   :  { %5877 = vmatmul.mubr.msk.bf16.vlgmr.msra.gmra.mrb[72].mxu0 %vm937_vm3, %v4284_v25 }
 0x5fe   :  { %5881 = vmatpush3.bf16.msra.mxu0 %v6256_v47  ;;  %5888 = vmatprep.mubr.msk.bf16.mxu0 %vm6278_vm5, %v6277_v58 }
 0x5ff   :  { %5882 = vmatprep.subr.bf16.mxu0 %v6277_v58 }
 0x602   :  { %5883 = vmatpush3.bf16.msra.mxu0 %v6257_v27 }
 0x603   :  { %5884 = vmatprep.subr.bf16.mxu0 %v6277_v58 }
 0x606   :  { %5885 = vmatpush3.bf16.msra.mxu0 %v6258_v40 }
 0x607   :  { %5886 = vmatprep.subr.bf16.mxu0 %v6277_v58 }
 0x60a   :  { %5887 = vmatpush3.bf16.msra.mxu0 %v6259_v35 }
 0x60b   :  { %5892 = vmatprep.subr.bf16.mxu0 %v6277_v58 }
 0x60d   :  { %5889 = vmatmul.mubr.msk.bf16.vlgmr.msra.gmra.mrb[72].mxu0 %vm937_vm3, %v4365_v39 }
 0x60e   :  { %5893 = vmatpush3.bf16.msra.mxu0 %v6260_v63  ;;  %5900 = vmatprep.mubr.msk.bf16.mxu0 %vm6278_vm5, %v6277_v58 }
 0x60f   :  { %5894 = vmatprep.subr.bf16.mxu0 %v6277_v58 }
 0x612   :  { %5895 = vmatpush3.bf16.msra.mxu0 %v6261_v42 }
 0x613   :  { %5896 = vmatprep.subr.bf16.mxu0 %v6277_v58 }
 0x616   :  { %5897 = vmatpush3.bf16.msra.mxu0 %v6262_v23 }
 0x617   :  { %5898 = vmatprep.subr.bf16.mxu0 %v6277_v58  ;;  %v4634_v58 = vshrl.u32 %v4633_v18, 7 }
 0x619   :  { %v4635_v28 = vsub.s32 0, %v4634_v58 }
 0x61a   :  { %5899 = vmatpush3.bf16.msra.mxu0 %v6263_v34 }
 0x61b   :  { %v4636_v48 = vrot.slane %v4632_v8, %v4635_v28 }
 0x61d   :  { %5901 = vmatmul.mubr.msk.bf16.vlgmr.msra.gmra.mrb[72].mxu0 %vm937_vm3, %v4446_v49 }
 0x6f0   :  { %v4508_v26 = vpop.f32.mrb[72].mxu0 }
 0x6f1   :  { %v5928_v2 = vadd.f32 %v4908_v29, %v4508_v26  ;;  %v5902_v5 = vpop.f32.mrb[73].mxu0 }
 0x6f2   :  { %v4511_v12 = vpop.f32.mrb[74].mxu0 }
 0x6f3   :  { %v4515_v46 = vmax.f32 %v5928_v2, 0.0  ;;  %v5903_v10 = vpop.f32.mrb[75].mxu0 }
 0x6f5   :  { %v4516_v41 = vpack.c.bf16 %v4515_v46, %v4515_v46 }
 0x6f7   :  { %5921 = vmatmul.mubr.bf16.vlgmr.msra.gmra.mrb[64].mxu1 %v4516_v41 }
 0x7ca   :  { %v4622_v32 = vpop.f32.mrb[64].mxu1 }
 0x7cb   :  { %v4623_v13 = vadd.f32 %v5109_v4, %v4622_v32  ;;  %v5922_v55 = vpop.f32.mrb[65].mxu1 }
 0x7cc   :  { %v4625_v1 = vpop.f32.mrb[66].mxu1 }
 0x7cd   :  { %v4628_v52 = vmax.f32 %v4623_v13, 0.0  ;;  %v5923_v17 = vpop.f32.mrb[67].mxu1 }
 0x7cf   :  { %v4629_v60 = vpack.c.bf16 %v4628_v52, %v4628_v52 }
 0x7d1   :  { %v4630_v15 = vunpack.c.l.bf16 %v4629_v60 }
 0x7d3   :  { %v4637_v57 = vmul.f32 %v4636_v48, %v4630_v15 }
 0x7d5   :  { %v4639_v37 = vsel %vm4638_vm7, %v4637_v57, 0.0 }
 0x7d6   :  { %4640 = vadd.xlane.f32.xlu0 %v4639_v37 }
 0x863   :  { %v4641_v62 = vpop.xlane.xlu0 %4640 }
 0x864   :  { %v4649_v19 = vadd.f32 %v5118_v59, %v4641_v62 }
 0x866   :  { %v4650_v44 = vsub.f32 0.0, %v4649_v19 }
 0x868   :  { %v4651_v51 = vmul.f32 1.442695, %v4650_v44 }
 0x86a   :  { %6272 = vpow2.f32 %v4651_v51 }
 0x874   :  { %v6273_v30 = vpop.eup %6272 }
 0x875   :  { %v4653_v16 = vadd.f32 1.0, %v6273_v30 }
 0x877   :  { %6274 = vrcp.f32 %v4653_v16 }
 0x881   :  { %v6275_v6 = vpop.eup %6274 }
 0x882   :  { %4657 = vst.msk [vmem:[%s7741_s13] sm:$0x3] %vm4656_vm8, %v6275_v6 }

</bundles_post_ra>
